<compile_context>
chip_gen: v6e
topology: v6e:2x2x1
jax: 0.10.0
libtpu: 0.0.40
codegen_flags: <defaults>
</compile_context>

<pallas_src>
import functools

import numpy as np
import jax
import jax.numpy as jnp
from jax.experimental import pallas as pl
from jax.experimental.pallas import tpu as pltpu


# ----------------------------------------------------------------------------
# Fused kernel: `n_img` images per grid step, channel-major (C, n_img*HW).
# ----------------------------------------------------------------------------
def _se_basic_block_kernel(x_ref, masks_ref, imask_ref, w1_ref, b1_ref,
                           w2_ref, b2_ref, fc1t_ref, fc2_ref, out_ref,
                           pcol_ref, *, C, HW, n_img, shifts):
    f32 = jnp.float32
    masks = masks_ref[...]                     # (9, N) {0,1} border masks

    def conv_bn(src, w_ref, b_ref):
        # im2col: 9 lane-rolled, border-masked copies of `src`, stacked along
        # the K (sublane) axis in a bf16 VMEM scratch; then ONE
        # (C,9C) x (9C, n_img*HW) MXU matmul (bf16 operands, f32 accumulate).
        for t in range(9):
            if shifts[t]:
                piece = pltpu.roll(src, shifts[t], axis=1) * masks[t:t + 1, :]
            else:
                piece = src                    # center tap: no shift / all-ones mask
            pcol_ref[t * C:(t + 1) * C, :] = piece.astype(jnp.bfloat16)
        out = jnp.dot(w_ref[...], pcol_ref[...], preferred_element_type=f32)
        return out + b_ref[...]                # folded-BN shift, (C, 1) broadcast

    o1 = jnp.maximum(conv_bn(x_ref[0].astype(f32), w1_ref, b1_ref), 0.0)   # conv1+bn1+relu
    o2 = conv_bn(o1, w2_ref, b2_ref)                                        # conv2+bn2

    # ---- Squeeze-and-Excitation, per image, on the VPU/XLU only ----
    inv_hw = 1.0 / HW
    scaled = None
    for b in range(n_img):
        sel = imask_ref[b:b + 1, :]                                    # (1, N) selector
        o2b = o2 * sel
        y = jnp.sum(o2b, axis=1, keepdims=True) * inv_hw               # (C, 1) avgpool
        h = jnp.maximum(jnp.sum(fc1t_ref[...] * y, axis=0, keepdims=True), 0.0)   # (1, Ch)
        g = jax.nn.sigmoid(jnp.sum(fc2_ref[...] * h, axis=1, keepdims=True))      # (C, 1)
        contrib = o2b * g                                              # SE-scaled image b
        scaled = contrib if scaled is None else scaled + contrib

    # residual add (downsample=None) + final relu; x re-read here only.
    out = jnp.maximum(scaled + x_ref[0].astype(f32), 0.0)
    out_ref[0] = out.astype(out_ref.dtype)


# ----------------------------------------------------------------------------
# Wrapper
# ----------------------------------------------------------------------------
def se_basic_block_forward(x_nchw, params, *, eps=1e-5, images_per_step=2):
    # TODO(synk): stride>1 / downsample branch not implemented (module defaults:
    # stride=1, downsample=None, so residual = x).
    B, C, H, W = x_nchw.shape
    HW = H * W
    Ch = params["fc1_w"].shape[0]

    # Images per grid step: amortize per-step overhead and MXU weight loads,
    # but keep >= 2 grid steps when possible so both v7x TensorCores get work.
    bb = 1
    for cand in range(min(images_per_step, B), 1, -1):
        if B % cand == 0 and B // cand >= 2:
            bb = cand
            break
    steps = B // bb
    N = bb * HW                       # lane width per step (multiple of 128 here)

    # Fold BatchNorm (inference) into the conv weights + a per-channel shift.
    s1 = params["bn1_gamma"] / jnp.sqrt(params["bn1_var"] + eps)
    t1 = params["bn1_beta"] - params["bn1_mean"] * s1
    s2 = params["bn2_gamma"] / jnp.sqrt(params["bn2_var"] + eps)
    t2 = params["bn2_beta"] - params["bn2_mean"] * s2

    def flat_w(w):  # (Cout,Cin,3,3) -> (Cout,9*Cin), K index = (kh*3+kw)*Cin + cin
        return jnp.transpose(w, (0, 2, 3, 1)).reshape(w.shape[0], -1)

    # MXU operands in bf16 (f32 accumulate); SE weights / BN shifts stay f32.
    w1 = (flat_w(params["w1"]) * s1[:, None]).astype(jnp.bfloat16)   # (C, 9C)
    w2 = (flat_w(params["w2"]) * s2[:, None]).astype(jnp.bfloat16)   # (C, 9C)
    b1 = t1[:, None]                                                  # (C, 1)
    b2 = t2[:, None]                                                  # (C, 1)
    fc1t = params["fc1_w"].T                                          # (C, Ch)
    fc2 = params["fc2_w"]                                             # (C, Ch)

    # Per-tap lane shifts + border masks for the padding=1 3x3 conv, tiled over
    # the bb images sharing the lane axis.  The masks also zero every position
    # whose rolled source would be pulled across an image boundary (or wrap).
    hh, ww = np.arange(HW) // W, np.arange(HW) % W
    shifts, masks = [], []
    for dh in (-1, 0, 1):
        for dw in (-1, 0, 1):
            shifts.append(int((-(dh * W + dw)) % N))
            m = ((hh + dh >= 0) & (hh + dh < H) &
                 (ww + dw >= 0) & (ww + dw < W)).astype(np.float32)
            masks.append(np.tile(m, bb))
    masks = jnp.asarray(np.stack(masks))                 # (9, N)

    imask = np.zeros((bb, N), np.float32)                # per-image column selector
    for b in range(bb):
        imask[b, b * HW:(b + 1) * HW] = 1.0
    imask = jnp.asarray(imask)

    # (B,C,H,W) -> (steps, C, bb*HW): images of one step share the lane axis.
    x2 = (x_nchw.reshape(steps, bb, C, HW)
          .transpose(0, 2, 1, 3).reshape(steps, C, N))

    kernel = functools.partial(_se_basic_block_kernel, C=C, HW=HW, n_img=bb,
                               shifts=tuple(shifts))
    out = pl.pallas_call(
        kernel,
        out_shape=jax.ShapeDtypeStruct((steps, C, N), x_nchw.dtype),
        grid=(steps,),
        in_specs=[
            pl.BlockSpec((1, C, N), lambda s: (s, 0, 0)),   # x (bb images / step)
            pl.BlockSpec((9, N), lambda s: (0, 0)),         # border masks
            pl.BlockSpec((bb, N), lambda s: (0, 0)),        # per-image selectors
            pl.BlockSpec((C, 9 * C), lambda s: (0, 0)),     # w1 (bn1 folded, bf16)
            pl.BlockSpec((C, 1), lambda s: (0, 0)),         # bn1 shift
            pl.BlockSpec((C, 9 * C), lambda s: (0, 0)),     # w2 (bn2 folded, bf16)
            pl.BlockSpec((C, 1), lambda s: (0, 0)),         # bn2 shift
            pl.BlockSpec((C, Ch), lambda s: (0, 0)),        # SE fc1.T
            pl.BlockSpec((C, Ch), lambda s: (0, 0)),        # SE fc2
        ],
        out_specs=pl.BlockSpec((1, C, N), lambda s: (s, 0, 0)),
        scratch_shapes=[pltpu.VMEM((9 * C, N), jnp.bfloat16)],   # bf16 im2col slab
        # VMEM use here is tiny (<1 MiB); set vmem_limit_bytes explicitly only
        # when scaling this block to larger C/HW (first wall on v7x's 64 MiB).
        compiler_params=pltpu.CompilerParams(dimension_semantics=("parallel",)),
    )(x2, masks, imask, w1, b1, w2, b2, fc1t, fc2)

    return (out.reshape(steps, C, bb, HW)
            .transpose(0, 2, 1, 3).reshape(B, C, H, W))


# ----------------------------------------------------------------------------
# Pure-JAX reference (mirrors the PyTorch forward in eval mode)
# ----------------------------------------------------------------------------
def _ref_forward(x, p, eps=1e-5):
    def conv(x, w):
        return jax.lax.conv_general_dilated(
            x, w, (1, 1), ((1, 1), (1, 1)),
            dimension_numbers=("NCHW", "OIHW", "NCHW"))

    def bn(x, g, b, m, v):
        return ((x - m[None, :, None, None]) / jnp.sqrt(v[None, :, None, None] + eps)
                * g[None, :, None, None] + b[None, :, None, None])

    out = jax.nn.relu(bn(conv(x, p["w1"]), p["bn1_gamma"], p["bn1_beta"],
                         p["bn1_mean"], p["bn1_var"]))
    out = bn(conv(out, p["w2"]), p["bn2_gamma"], p["bn2_beta"],
             p["bn2_mean"], p["bn2_var"])
    y = jnp.mean(out, axis=(2, 3))                   # (B, C)
    y = jax.nn.relu(y @ p["fc1_w"].T)
    y = jax.nn.sigmoid(y @ p["fc2_w"].T)
    out = out * y[:, :, None, None]
    return jax.nn.relu(out + x)


# ----------------------------------------------------------------------------
if __name__ == "__main__":
    B, C, H, W = 4, 32, 16, 16          # inplanes = planes = 32, stride = 1
    reduction = 16
    Ch = C // reduction                  # 2

    key = jax.random.PRNGKey(0)
    ks = jax.random.split(key, 13)
    params = {
        "w1": 0.1 * jax.random.normal(ks[0], (C, C, 3, 3), jnp.float32),
        "w2": 0.1 * jax.random.normal(ks[1], (C, C, 3, 3), jnp.float32),
        "bn1_gamma": 1.0 + 0.1 * jax.random.normal(ks[2], (C,), jnp.float32),
        "bn1_beta": 0.1 * jax.random.normal(ks[3], (C,), jnp.float32),
        "bn1_mean": 0.1 * jax.random.normal(ks[4], (C,), jnp.float32),
        "bn1_var": 1.0 + 0.1 * jax.random.uniform(ks[5], (C,), jnp.float32),
        "bn2_gamma": 1.0 + 0.1 * jax.random.normal(ks[6], (C,), jnp.float32),
        "bn2_beta": 0.1 * jax.random.normal(ks[7], (C,), jnp.float32),
        "bn2_mean": 0.1 * jax.random.normal(ks[8], (C,), jnp.float32),
        "bn2_var": 1.0 + 0.1 * jax.random.uniform(ks[9], (C,), jnp.float32),
        "fc1_w": 0.3 * jax.random.normal(ks[10], (Ch, C), jnp.float32),   # Linear(C, C//r)
        "fc2_w": 0.3 * jax.random.normal(ks[11], (C, Ch), jnp.float32),   # Linear(C//r, C)
    }
    x = jax.random.normal(ks[12], (B, C, H, W), jnp.float32)

    out = jax.block_until_ready(se_basic_block_forward(x, params))
    ref = jax.block_until_ready(_ref_forward(x, params))

    assert out.shape == (B, C, H, W), out.shape
    max_err = float(jnp.max(jnp.abs(out - ref)))
    # bf16 MXU operands (f32 accumulate) -> ~1e-2-level relative error vs the
    # pure-f32 reference; tolerance loosened accordingly.
    assert jnp.allclose(out, ref, atol=1e-1, rtol=2e-2), max_err
    print("KERNEL_OK")
</pallas_src>

<mosaic_0001>
module attributes {stable_mosaic.version = 11 : i64} {
  func.func @_se_basic_block_kernel(%arg0: i32, %arg1: memref<1x32x512xf32, #tpu.memory_space<vmem>>, %arg2: memref<9x512xf32, #tpu.memory_space<vmem>>, %arg3: memref<2x512xf32, #tpu.memory_space<vmem>>, %arg4: memref<32x288xbf16, #tpu.memory_space<vmem>>, %arg5: memref<32x1xf32, #tpu.memory_space<vmem>>, %arg6: memref<32x288xbf16, #tpu.memory_space<vmem>>, %arg7: memref<32x1xf32, #tpu.memory_space<vmem>>, %arg8: memref<32x2xf32, #tpu.memory_space<vmem>>, %arg9: memref<32x2xf32, #tpu.memory_space<vmem>>, %arg10: memref<1x32x512xf32, #tpu.memory_space<vmem>>, %arg11: memref<288x512xbf16, #tpu.memory_space<vmem>>) attributes {dimension_semantics = [#tpu.dimension_semantics<parallel>], iteration_bounds = array<i64: 2>, scalar_prefetch = 0 : i64, scratch_operands = 1 : i64, tpu.core_type = #tpu.core_type<tc>, window_params = [{transform_indices = @transform_0, window_bounds = array<i64: 1, 32, 512>}, {pipeline_mode = #tpu.pipeline_mode<synchronous>, transform_indices = @transform_1, window_bounds = array<i64: 9, 512>}, {pipeline_mode = #tpu.pipeline_mode<synchronous>, transform_indices = @transform_2, window_bounds = array<i64: 2, 512>}, {pipeline_mode = #tpu.pipeline_mode<synchronous>, transform_indices = @transform_3, window_bounds = array<i64: 32, 288>}, {pipeline_mode = #tpu.pipeline_mode<synchronous>, transform_indices = @transform_4, window_bounds = array<i64: 32, 1>}, {pipeline_mode = #tpu.pipeline_mode<synchronous>, transform_indices = @transform_5, window_bounds = array<i64: 32, 288>}, {pipeline_mode = #tpu.pipeline_mode<synchronous>, transform_indices = @transform_6, window_bounds = array<i64: 32, 1>}, {pipeline_mode = #tpu.pipeline_mode<synchronous>, transform_indices = @transform_7, window_bounds = array<i64: 32, 2>}, {pipeline_mode = #tpu.pipeline_mode<synchronous>, transform_indices = @transform_8, window_bounds = array<i64: 32, 2>}, {transform_indices = @transform_9, window_bounds = array<i64: 1, 32, 512>}]} {
    %c0 = arith.constant 0 : index
    %c0_0 = arith.constant 0 : index
    %0 = vector.load %arg2[%c0, %c0_0] : memref<9x512xf32, #tpu.memory_space<vmem>>, vector<9x512xf32>
    %c0_1 = arith.constant 0 : index
    %c0_2 = arith.constant 0 : index
    %c0_3 = arith.constant 0 : index
    %1 = vector.load %arg1[%c0_1, %c0_2, %c0_3] : memref<1x32x512xf32, #tpu.memory_space<vmem>>, vector<1x32x512xf32>
    %2 = vector.shape_cast %1 : vector<1x32x512xf32> to vector<32x512xf32>
    %c17_i32 = arith.constant 17 : i32
    %3 = tpu.dynamic_rotate %2 by %c17_i32 dim 1 : vector<32x512xf32>, i32 -> vector<32x512xf32>
    %4 = vector.extract_strided_slice %0 {offsets = [0, 0], sizes = [1, 512], strides = [1, 1]} : vector<9x512xf32> to vector<1x512xf32>
    %5 = vector.broadcast %4 : vector<1x512xf32> to vector<32x512xf32>
    %6 = arith.mulf %3, %5 : vector<32x512xf32>
    %7 = arith.truncf %6 : vector<32x512xf32> to vector<32x512xbf16>
    %c0_4 = arith.constant 0 : index
    %c0_5 = arith.constant 0 : index
    %8 = vector.load %arg11[%c0_4, %c0_5] : memref<288x512xbf16, #tpu.memory_space<vmem>>, vector<32x512xbf16>
    tpu.vector_store %arg11[%c0_4, %c0_5], %7 {strides = array<i32>} : memref<288x512xbf16, #tpu.memory_space<vmem>>, vector<32x512xbf16>,
    %c16_i32 = arith.constant 16 : i32
    %9 = tpu.dynamic_rotate %2 by %c16_i32 dim 1 : vector<32x512xf32>, i32 -> vector<32x512xf32>
    %10 = vector.extract_strided_slice %0 {offsets = [1, 0], sizes = [1, 512], strides = [1, 1]} : vector<9x512xf32> to vector<1x512xf32>
    %11 = vector.broadcast %10 : vector<1x512xf32> to vector<32x512xf32>
    %12 = arith.mulf %9, %11 : vector<32x512xf32>
    %13 = arith.truncf %12 : vector<32x512xf32> to vector<32x512xbf16>
    %c32 = arith.constant 32 : index
    %c0_6 = arith.constant 0 : index
    %14 = vector.load %arg11[%c32, %c0_6] : memref<288x512xbf16, #tpu.memory_space<vmem>>, vector<32x512xbf16>
    tpu.vector_store %arg11[%c32, %c0_6], %13 {strides = array<i32>} : memref<288x512xbf16, #tpu.memory_space<vmem>>, vector<32x512xbf16>,
    %c15_i32 = arith.constant 15 : i32
    %15 = tpu.dynamic_rotate %2 by %c15_i32 dim 1 : vector<32x512xf32>, i32 -> vector<32x512xf32>
    %16 = vector.extract_strided_slice %0 {offsets = [2, 0], sizes = [1, 512], strides = [1, 1]} : vector<9x512xf32> to vector<1x512xf32>
    %17 = vector.broadcast %16 : vector<1x512xf32> to vector<32x512xf32>
    %18 = arith.mulf %15, %17 : vector<32x512xf32>
    %19 = arith.truncf %18 : vector<32x512xf32> to vector<32x512xbf16>
    %c64 = arith.constant 64 : index
    %c0_7 = arith.constant 0 : index
    %20 = vector.load %arg11[%c64, %c0_7] : memref<288x512xbf16, #tpu.memory_space<vmem>>, vector<32x512xbf16>
    tpu.vector_store %arg11[%c64, %c0_7], %19 {strides = array<i32>} : memref<288x512xbf16, #tpu.memory_space<vmem>>, vector<32x512xbf16>,
    %c1_i32 = arith.constant 1 : i32
    %21 = tpu.dynamic_rotate %2 by %c1_i32 dim 1 : vector<32x512xf32>, i32 -> vector<32x512xf32>
    %22 = vector.extract_strided_slice %0 {offsets = [3, 0], sizes = [1, 512], strides = [1, 1]} : vector<9x512xf32> to vector<1x512xf32>
    %23 = vector.broadcast %22 : vector<1x512xf32> to vector<32x512xf32>
    %24 = arith.mulf %21, %23 : vector<32x512xf32>
    %25 = arith.truncf %24 : vector<32x512xf32> to vector<32x512xbf16>
    %c96 = arith.constant 96 : index
    %c0_8 = arith.constant 0 : index
    %26 = vector.load %arg11[%c96, %c0_8] : memref<288x512xbf16, #tpu.memory_space<vmem>>, vector<32x512xbf16>
    tpu.vector_store %arg11[%c96, %c0_8], %25 {strides = array<i32>} : memref<288x512xbf16, #tpu.memory_space<vmem>>, vector<32x512xbf16>,
    %27 = arith.truncf %2 : vector<32x512xf32> to vector<32x512xbf16>
    %c128 = arith.constant 128 : index
    %c0_9 = arith.constant 0 : index
    %28 = vector.load %arg11[%c128, %c0_9] : memref<288x512xbf16, #tpu.memory_space<vmem>>, vector<32x512xbf16>
    tpu.vector_store %arg11[%c128, %c0_9], %27 {strides = array<i32>} : memref<288x512xbf16, #tpu.memory_space<vmem>>, vector<32x512xbf16>,
    %c511_i32 = arith.constant 511 : i32
    %29 = tpu.dynamic_rotate %2 by %c511_i32 dim 1 : vector<32x512xf32>, i32 -> vector<32x512xf32>
    %30 = vector.extract_strided_slice %0 {offsets = [5, 0], sizes = [1, 512], strides = [1, 1]} : vector<9x512xf32> to vector<1x512xf32>
    %31 = vector.broadcast %30 : vector<1x512xf32> to vector<32x512xf32>
    %32 = arith.mulf %29, %31 : vector<32x512xf32>
    %33 = arith.truncf %32 : vector<32x512xf32> to vector<32x512xbf16>
    %c160 = arith.constant 160 : index
    %c0_10 = arith.constant 0 : index
    %34 = vector.load %arg11[%c160, %c0_10] : memref<288x512xbf16, #tpu.memory_space<vmem>>, vector<32x512xbf16>
    tpu.vector_store %arg11[%c160, %c0_10], %33 {strides = array<i32>} : memref<288x512xbf16, #tpu.memory_space<vmem>>, vector<32x512xbf16>,
    %c497_i32 = arith.constant 497 : i32
    %35 = tpu.dynamic_rotate %2 by %c497_i32 dim 1 : vector<32x512xf32>, i32 -> vector<32x512xf32>
    %36 = vector.extract_strided_slice %0 {offsets = [6, 0], sizes = [1, 512], strides = [1, 1]} : vector<9x512xf32> to vector<1x512xf32>
    %37 = vector.broadcast %36 : vector<1x512xf32> to vector<32x512xf32>
    %38 = arith.mulf %35, %37 : vector<32x512xf32>
    %39 = arith.truncf %38 : vector<32x512xf32> to vector<32x512xbf16>
    %c192 = arith.constant 192 : index
    %c0_11 = arith.constant 0 : index
    %40 = vector.load %arg11[%c192, %c0_11] : memref<288x512xbf16, #tpu.memory_space<vmem>>, vector<32x512xbf16>
    tpu.vector_store %arg11[%c192, %c0_11], %39 {strides = array<i32>} : memref<288x512xbf16, #tpu.memory_space<vmem>>, vector<32x512xbf16>,
    %c496_i32 = arith.constant 496 : i32
    %41 = tpu.dynamic_rotate %2 by %c496_i32 dim 1 : vector<32x512xf32>, i32 -> vector<32x512xf32>
    %42 = vector.extract_strided_slice %0 {offsets = [7, 0], sizes = [1, 512], strides = [1, 1]} : vector<9x512xf32> to vector<1x512xf32>
    %43 = vector.broadcast %42 : vector<1x512xf32> to vector<32x512xf32>
    %44 = arith.mulf %41, %43 : vector<32x512xf32>
    %45 = arith.truncf %44 : vector<32x512xf32> to vector<32x512xbf16>
    %c224 = arith.constant 224 : index
    %c0_12 = arith.constant 0 : index
    %46 = vector.load %arg11[%c224, %c0_12] : memref<288x512xbf16, #tpu.memory_space<vmem>>, vector<32x512xbf16>
    tpu.vector_store %arg11[%c224, %c0_12], %45 {strides = array<i32>} : memref<288x512xbf16, #tpu.memory_space<vmem>>, vector<32x512xbf16>,
    %c495_i32 = arith.constant 495 : i32
    %47 = tpu.dynamic_rotate %2 by %c495_i32 dim 1 : vector<32x512xf32>, i32 -> vector<32x512xf32>
    %48 = vector.extract_strided_slice %0 {offsets = [8, 0], sizes = [1, 512], strides = [1, 1]} : vector<9x512xf32> to vector<1x512xf32>
    %49 = vector.broadcast %48 : vector<1x512xf32> to vector<32x512xf32>
    %50 = arith.mulf %47, %49 : vector<32x512xf32>
    %51 = arith.truncf %50 : vector<32x512xf32> to vector<32x512xbf16>
    %c256 = arith.constant 256 : index
    %c0_13 = arith.constant 0 : index
    %52 = vector.load %arg11[%c256, %c0_13] : memref<288x512xbf16, #tpu.memory_space<vmem>>, vector<32x512xbf16>
    tpu.vector_store %arg11[%c256, %c0_13], %51 {strides = array<i32>} : memref<288x512xbf16, #tpu.memory_space<vmem>>, vector<32x512xbf16>,
    %c0_14 = arith.constant 0 : index
    %c0_15 = arith.constant 0 : index
    %53 = vector.load %arg4[%c0_14, %c0_15] : memref<32x288xbf16, #tpu.memory_space<vmem>>, vector<32x288xbf16>
    %c0_16 = arith.constant 0 : index
    %c0_17 = arith.constant 0 : index
    %54 = vector.load %arg11[%c0_16, %c0_17] : memref<288x512xbf16, #tpu.memory_space<vmem>>, vector<288x512xbf16>
    %cst = arith.constant dense<0.000000e+00> : vector<32x512xf32>
    %55 = tpu.matmul %53, %54, %cst {dimension_numbers = #tpu.dot_dimension_numbers<[1], [0], [0], [1], [0, 0, 1, 1], [], []>} : vector<32x288xbf16>, vector<288x512xbf16>, vector<32x512xf32> -> vector<32x512xf32>
    %c0_18 = arith.constant 0 : index
    %c0_19 = arith.constant 0 : index
    %56 = vector.load %arg5[%c0_18, %c0_19] : memref<32x1xf32, #tpu.memory_space<vmem>>, vector<32x1xf32>
    %57 = vector.broadcast %56 : vector<32x1xf32> to vector<32x512xf32>
    %58 = arith.addf %55, %57 : vector<32x512xf32>
    %cst_20 = arith.constant 0.000000e+00 : f32
    %59 = vector.broadcast %cst_20 : f32 to vector<32x512xf32>
    %60 = arith.maximumf %58, %59 : vector<32x512xf32>
    %c17_i32_21 = arith.constant 17 : i32
    %61 = tpu.dynamic_rotate %60 by %c17_i32_21 dim 1 : vector<32x512xf32>, i32 -> vector<32x512xf32>
    %62 = vector.extract_strided_slice %0 {offsets = [0, 0], sizes = [1, 512], strides = [1, 1]} : vector<9x512xf32> to vector<1x512xf32>
    %63 = vector.broadcast %62 : vector<1x512xf32> to vector<32x512xf32>
    %64 = arith.mulf %61, %63 : vector<32x512xf32>
    %65 = arith.truncf %64 : vector<32x512xf32> to vector<32x512xbf16>
    %c0_22 = arith.constant 0 : index
    %c0_23 = arith.constant 0 : index
    %66 = vector.load %arg11[%c0_22, %c0_23] : memref<288x512xbf16, #tpu.memory_space<vmem>>, vector<32x512xbf16>
    tpu.vector_store %arg11[%c0_22, %c0_23], %65 {strides = array<i32>} : memref<288x512xbf16, #tpu.memory_space<vmem>>, vector<32x512xbf16>,
    %c16_i32_24 = arith.constant 16 : i32
    %67 = tpu.dynamic_rotate %60 by %c16_i32_24 dim 1 : vector<32x512xf32>, i32 -> vector<32x512xf32>
    %68 = vector.extract_strided_slice %0 {offsets = [1, 0], sizes = [1, 512], strides = [1, 1]} : vector<9x512xf32> to vector<1x512xf32>
    %69 = vector.broadcast %68 : vector<1x512xf32> to vector<32x512xf32>
    %70 = arith.mulf %67, %69 : vector<32x512xf32>
    %71 = arith.truncf %70 : vector<32x512xf32> to vector<32x512xbf16>
    %c32_25 = arith.constant 32 : index
    %c0_26 = arith.constant 0 : index
    %72 = vector.load %arg11[%c32_25, %c0_26] : memref<288x512xbf16, #tpu.memory_space<vmem>>, vector<32x512xbf16>
    tpu.vector_store %arg11[%c32_25, %c0_26], %71 {strides = array<i32>} : memref<288x512xbf16, #tpu.memory_space<vmem>>, vector<32x512xbf16>,
    %c15_i32_27 = arith.constant 15 : i32
    %73 = tpu.dynamic_rotate %60 by %c15_i32_27 dim 1 : vector<32x512xf32>, i32 -> vector<32x512xf32>
    %74 = vector.extract_strided_slice %0 {offsets = [2, 0], sizes = [1, 512], strides = [1, 1]} : vector<9x512xf32> to vector<1x512xf32>
    %75 = vector.broadcast %74 : vector<1x512xf32> to vector<32x512xf32>
    %76 = arith.mulf %73, %75 : vector<32x512xf32>
    %77 = arith.truncf %76 : vector<32x512xf32> to vector<32x512xbf16>
    %c64_28 = arith.constant 64 : index
    %c0_29 = arith.constant 0 : index
    %78 = vector.load %arg11[%c64_28, %c0_29] : memref<288x512xbf16, #tpu.memory_space<vmem>>, vector<32x512xbf16>
    tpu.vector_store %arg11[%c64_28, %c0_29], %77 {strides = array<i32>} : memref<288x512xbf16, #tpu.memory_space<vmem>>, vector<32x512xbf16>,
    %c1_i32_30 = arith.constant 1 : i32
    %79 = tpu.dynamic_rotate %60 by %c1_i32_30 dim 1 : vector<32x512xf32>, i32 -> vector<32x512xf32>
    %80 = vector.extract_strided_slice %0 {offsets = [3, 0], sizes = [1, 512], strides = [1, 1]} : vector<9x512xf32> to vector<1x512xf32>
    %81 = vector.broadcast %80 : vector<1x512xf32> to vector<32x512xf32>
    %82 = arith.mulf %79, %81 : vector<32x512xf32>
    %83 = arith.truncf %82 : vector<32x512xf32> to vector<32x512xbf16>
    %c96_31 = arith.constant 96 : index
    %c0_32 = arith.constant 0 : index
    %84 = vector.load %arg11[%c96_31, %c0_32] : memref<288x512xbf16, #tpu.memory_space<vmem>>, vector<32x512xbf16>
    tpu.vector_store %arg11[%c96_31, %c0_32], %83 {strides = array<i32>} : memref<288x512xbf16, #tpu.memory_space<vmem>>, vector<32x512xbf16>,
    %85 = arith.truncf %60 : vector<32x512xf32> to vector<32x512xbf16>
    %c128_33 = arith.constant 128 : index
    %c0_34 = arith.constant 0 : index
    %86 = vector.load %arg11[%c128_33, %c0_34] : memref<288x512xbf16, #tpu.memory_space<vmem>>, vector<32x512xbf16>
    tpu.vector_store %arg11[%c128_33, %c0_34], %85 {strides = array<i32>} : memref<288x512xbf16, #tpu.memory_space<vmem>>, vector<32x512xbf16>,
    %c511_i32_35 = arith.constant 511 : i32
    %87 = tpu.dynamic_rotate %60 by %c511_i32_35 dim 1 : vector<32x512xf32>, i32 -> vector<32x512xf32>
    %88 = vector.extract_strided_slice %0 {offsets = [5, 0], sizes = [1, 512], strides = [1, 1]} : vector<9x512xf32> to vector<1x512xf32>
    %89 = vector.broadcast %88 : vector<1x512xf32> to vector<32x512xf32>
    %90 = arith.mulf %87, %89 : vector<32x512xf32>
    %91 = arith.truncf %90 : vector<32x512xf32> to vector<32x512xbf16>
    %c160_36 = arith.constant 160 : index
    %c0_37 = arith.constant 0 : index
    %92 = vector.load %arg11[%c160_36, %c0_37] : memref<288x512xbf16, #tpu.memory_space<vmem>>, vector<32x512xbf16>
    tpu.vector_store %arg11[%c160_36, %c0_37], %91 {strides = array<i32>} : memref<288x512xbf16, #tpu.memory_space<vmem>>, vector<32x512xbf16>,
    %c497_i32_38 = arith.constant 497 : i32
    %93 = tpu.dynamic_rotate %60 by %c497_i32_38 dim 1 : vector<32x512xf32>, i32 -> vector<32x512xf32>
    %94 = vector.extract_strided_slice %0 {offsets = [6, 0], sizes = [1, 512], strides = [1, 1]} : vector<9x512xf32> to vector<1x512xf32>
    %95 = vector.broadcast %94 : vector<1x512xf32> to vector<32x512xf32>
    %96 = arith.mulf %93, %95 : vector<32x512xf32>
    %97 = arith.truncf %96 : vector<32x512xf32> to vector<32x512xbf16>
    %c192_39 = arith.constant 192 : index
    %c0_40 = arith.constant 0 : index
    %98 = vector.load %arg11[%c192_39, %c0_40] : memref<288x512xbf16, #tpu.memory_space<vmem>>, vector<32x512xbf16>
    tpu.vector_store %arg11[%c192_39, %c0_40], %97 {strides = array<i32>} : memref<288x512xbf16, #tpu.memory_space<vmem>>, vector<32x512xbf16>,
    %c496_i32_41 = arith.constant 496 : i32
    %99 = tpu.dynamic_rotate %60 by %c496_i32_41 dim 1 : vector<32x512xf32>, i32 -> vector<32x512xf32>
    %100 = vector.extract_strided_slice %0 {offsets = [7, 0], sizes = [1, 512], strides = [1, 1]} : vector<9x512xf32> to vector<1x512xf32>
    %101 = vector.broadcast %100 : vector<1x512xf32> to vector<32x512xf32>
    %102 = arith.mulf %99, %101 : vector<32x512xf32>
    %103 = arith.truncf %102 : vector<32x512xf32> to vector<32x512xbf16>
    %c224_42 = arith.constant 224 : index
    %c0_43 = arith.constant 0 : index
    %104 = vector.load %arg11[%c224_42, %c0_43] : memref<288x512xbf16, #tpu.memory_space<vmem>>, vector<32x512xbf16>
    tpu.vector_store %arg11[%c224_42, %c0_43], %103 {strides = array<i32>} : memref<288x512xbf16, #tpu.memory_space<vmem>>, vector<32x512xbf16>,
    %c495_i32_44 = arith.constant 495 : i32
    %105 = tpu.dynamic_rotate %60 by %c495_i32_44 dim 1 : vector<32x512xf32>, i32 -> vector<32x512xf32>
    %106 = vector.extract_strided_slice %0 {offsets = [8, 0], sizes = [1, 512], strides = [1, 1]} : vector<9x512xf32> to vector<1x512xf32>
    %107 = vector.broadcast %106 : vector<1x512xf32> to vector<32x512xf32>
    %108 = arith.mulf %105, %107 : vector<32x512xf32>
    %109 = arith.truncf %108 : vector<32x512xf32> to vector<32x512xbf16>
    %c256_45 = arith.constant 256 : index
    %c0_46 = arith.constant 0 : index
    %110 = vector.load %arg11[%c256_45, %c0_46] : memref<288x512xbf16, #tpu.memory_space<vmem>>, vector<32x512xbf16>
    tpu.vector_store %arg11[%c256_45, %c0_46], %109 {strides = array<i32>} : memref<288x512xbf16, #tpu.memory_space<vmem>>, vector<32x512xbf16>,
    %c0_47 = arith.constant 0 : index
    %c0_48 = arith.constant 0 : index
    %111 = vector.load %arg6[%c0_47, %c0_48] : memref<32x288xbf16, #tpu.memory_space<vmem>>, vector<32x288xbf16>
    %c0_49 = arith.constant 0 : index
    %c0_50 = arith.constant 0 : index
    %112 = vector.load %arg11[%c0_49, %c0_50] : memref<288x512xbf16, #tpu.memory_space<vmem>>, vector<288x512xbf16>
    %cst_51 = arith.constant dense<0.000000e+00> : vector<32x512xf32>
    %113 = tpu.matmul %111, %112, %cst_51 {dimension_numbers = #tpu.dot_dimension_numbers<[1], [0], [0], [1], [0, 0, 1, 1], [], []>} : vector<32x288xbf16>, vector<288x512xbf16>, vector<32x512xf32> -> vector<32x512xf32>
    %c0_52 = arith.constant 0 : index
    %c0_53 = arith.constant 0 : index
    %114 = vector.load %arg7[%c0_52, %c0_53] : memref<32x1xf32, #tpu.memory_space<vmem>>, vector<32x1xf32>
    %115 = vector.broadcast %114 : vector<32x1xf32> to vector<32x512xf32>
    %116 = arith.addf %113, %115 : vector<32x512xf32>
    %c0_54 = arith.constant 0 : index
    %c0_55 = arith.constant 0 : index
    %117 = vector.load %arg3[%c0_54, %c0_55] : memref<2x512xf32, #tpu.memory_space<vmem>>, vector<1x512xf32>
    %118 = vector.broadcast %117 : vector<1x512xf32> to vector<32x512xf32>
    %119 = arith.mulf %116, %118 : vector<32x512xf32>
    %cst_56 = arith.constant dense<0.000000e+00> : vector<32xf32>
    %120 = vector.multi_reduction <add>, %119, %cst_56 [1] : vector<32x512xf32> to vector<32xf32>
    %121 = vector.shape_cast %120 : vector<32xf32> to vector<32x1xf32>
    %cst_57 = arith.constant 3.906250e-03 : f32
    %122 = vector.broadcast %cst_57 : f32 to vector<32x1xf32>
    %123 = arith.mulf %121, %122 : vector<32x1xf32>
    %c0_58 = arith.constant 0 : index
    %c0_59 = arith.constant 0 : index
    %124 = vector.load %arg8[%c0_58, %c0_59] : memref<32x2xf32, #tpu.memory_space<vmem>>, vector<32x2xf32>
    %125 = vector.broadcast %123 : vector<32x1xf32> to vector<32x2xf32>
    %126 = arith.mulf %124, %125 : vector<32x2xf32>
    %cst_60 = arith.constant dense<0.000000e+00> : vector<2xf32>
    %127 = vector.multi_reduction <add>, %126, %cst_60 [0] : vector<32x2xf32> to vector<2xf32>
    %128 = vector.shape_cast %127 : vector<2xf32> to vector<1x2xf32>
    %cst_61 = arith.constant 0.000000e+00 : f32
    %129 = vector.broadcast %cst_61 : f32 to vector<1x2xf32>
    %130 = arith.maximumf %128, %129 : vector<1x2xf32>
    %c0_62 = arith.constant 0 : index
    %c0_63 = arith.constant 0 : index
    %131 = vector.load %arg9[%c0_62, %c0_63] : memref<32x2xf32, #tpu.memory_space<vmem>>, vector<32x2xf32>
    %132 = vector.broadcast %130 : vector<1x2xf32> to vector<32x2xf32>
    %133 = arith.mulf %131, %132 : vector<32x2xf32>
    %cst_64 = arith.constant dense<0.000000e+00> : vector<32xf32>
    %134 = vector.multi_reduction <add>, %133, %cst_64 [1] : vector<32x2xf32> to vector<32xf32>
    %135 = vector.shape_cast %134 : vector<32xf32> to vector<32x1xf32>
    %136 = arith.negf %135 : vector<32x1xf32>
    %137 = math.exp %136 : vector<32x1xf32>
    %cst_65 = arith.constant 1.000000e+00 : f32
    %138 = vector.broadcast %cst_65 : f32 to vector<32x1xf32>
    %139 = arith.addf %138, %137 : vector<32x1xf32>
    %140 = arith.divf %138, %139 : vector<32x1xf32>
    %141 = vector.broadcast %140 : vector<32x1xf32> to vector<32x512xf32>
    %142 = arith.mulf %119, %141 : vector<32x512xf32>
    %c1 = arith.constant 1 : index
    %c0_66 = arith.constant 0 : index
    %143 = vector.load %arg3[%c1, %c0_66] : memref<2x512xf32, #tpu.memory_space<vmem>>, vector<1x512xf32>
    %144 = vector.broadcast %143 : vector<1x512xf32> to vector<32x512xf32>
    %145 = arith.mulf %116, %144 : vector<32x512xf32>
    %cst_67 = arith.constant dense<0.000000e+00> : vector<32xf32>
    %146 = vector.multi_reduction <add>, %145, %cst_67 [1] : vector<32x512xf32> to vector<32xf32>
    %147 = vector.shape_cast %146 : vector<32xf32> to vector<32x1xf32>
    %cst_68 = arith.constant 3.906250e-03 : f32
    %148 = vector.broadcast %cst_68 : f32 to vector<32x1xf32>
    %149 = arith.mulf %147, %148 : vector<32x1xf32>
    %c0_69 = arith.constant 0 : index
    %c0_70 = arith.constant 0 : index
    %150 = vector.load %arg8[%c0_69, %c0_70] : memref<32x2xf32, #tpu.memory_space<vmem>>, vector<32x2xf32>
    %151 = vector.broadcast %149 : vector<32x1xf32> to vector<32x2xf32>
    %152 = arith.mulf %150, %151 : vector<32x2xf32>
    %cst_71 = arith.constant dense<0.000000e+00> : vector<2xf32>
    %153 = vector.multi_reduction <add>, %152, %cst_71 [0] : vector<32x2xf32> to vector<2xf32>
    %154 = vector.shape_cast %153 : vector<2xf32> to vector<1x2xf32>
    %cst_72 = arith.constant 0.000000e+00 : f32
    %155 = vector.broadcast %cst_72 : f32 to vector<1x2xf32>
    %156 = arith.maximumf %154, %155 : vector<1x2xf32>
    %c0_73 = arith.constant 0 : index
    %c0_74 = arith.constant 0 : index
    %157 = vector.load %arg9[%c0_73, %c0_74] : memref<32x2xf32, #tpu.memory_space<vmem>>, vector<32x2xf32>
    %158 = vector.broadcast %156 : vector<1x2xf32> to vector<32x2xf32>
    %159 = arith.mulf %157, %158 : vector<32x2xf32>
    %cst_75 = arith.constant dense<0.000000e+00> : vector<32xf32>
    %160 = vector.multi_reduction <add>, %159, %cst_75 [1] : vector<32x2xf32> to vector<32xf32>
    %161 = vector.shape_cast %160 : vector<32xf32> to vector<32x1xf32>
    %162 = arith.negf %161 : vector<32x1xf32>
    %163 = math.exp %162 : vector<32x1xf32>
    %cst_76 = arith.constant 1.000000e+00 : f32
    %164 = vector.broadcast %cst_76 : f32 to vector<32x1xf32>
    %165 = arith.addf %164, %163 : vector<32x1xf32>
    %166 = arith.divf %164, %165 : vector<32x1xf32>
    %167 = vector.broadcast %166 : vector<32x1xf32> to vector<32x512xf32>
    %168 = arith.mulf %145, %167 : vector<32x512xf32>
    %169 = arith.addf %142, %168 : vector<32x512xf32>
    %c0_77 = arith.constant 0 : index
    %c0_78 = arith.constant 0 : index
    %c0_79 = arith.constant 0 : index
    %170 = vector.load %arg1[%c0_77, %c0_78, %c0_79] : memref<1x32x512xf32, #tpu.memory_space<vmem>>, vector<1x32x512xf32>
    %171 = vector.shape_cast %170 : vector<1x32x512xf32> to vector<32x512xf32>
    %172 = arith.addf %169, %171 : vector<32x512xf32>
    %cst_80 = arith.constant 0.000000e+00 : f32
    %173 = vector.broadcast %cst_80 : f32 to vector<32x512xf32>
    %174 = arith.maximumf %172, %173 : vector<32x512xf32>
    %c0_81 = arith.constant 0 : index
    %c0_82 = arith.constant 0 : index
    %c0_83 = arith.constant 0 : index
    %175 = vector.load %arg10[%c0_81, %c0_82, %c0_83] : memref<1x32x512xf32, #tpu.memory_space<vmem>>, vector<1x32x512xf32>
    %176 = vector.shape_cast %175 : vector<1x32x512xf32> to vector<32x512xf32>
    %177 = vector.shape_cast %174 : vector<32x512xf32> to vector<1x32x512xf32>
    tpu.vector_store %arg10[%c0_81, %c0_82, %c0_83], %177 {strides = array<i32>} : memref<1x32x512xf32, #tpu.memory_space<vmem>>, vector<1x32x512xf32>,
    return
  }
  func.func @transform_0(%arg0: i32) -> (i32, i32, i32) {
    %c0_i32 = arith.constant 0 : i32
    %c0_i32_0 = arith.constant 0 : i32
    %c0_i32_1 = arith.constant 0 : i32
    return %arg0, %c0_i32, %c0_i32_0 : i32, i32, i32
  }
  func.func @transform_1(%arg0: i32) -> (i32, i32) {
    %c0_i32 = arith.constant 0 : i32
    %c0_i32_0 = arith.constant 0 : i32
    %c0_i32_1 = arith.constant 0 : i32
    return %c0_i32, %c0_i32_0 : i32, i32
  }
  func.func @transform_2(%arg0: i32) -> (i32, i32) {
    %c0_i32 = arith.constant 0 : i32
    %c0_i32_0 = arith.constant 0 : i32
    %c0_i32_1 = arith.constant 0 : i32
    return %c0_i32, %c0_i32_0 : i32, i32
  }
  func.func @transform_3(%arg0: i32) -> (i32, i32) {
    %c0_i32 = arith.constant 0 : i32
    %c0_i32_0 = arith.constant 0 : i32
    %c0_i32_1 = arith.constant 0 : i32
    return %c0_i32, %c0_i32_0 : i32, i32
  }
  func.func @transform_4(%arg0: i32) -> (i32, i32) {
    %c0_i32 = arith.constant 0 : i32
    %c0_i32_0 = arith.constant 0 : i32
    %c0_i32_1 = arith.constant 0 : i32
    return %c0_i32, %c0_i32_0 : i32, i32
  }
  func.func @transform_5(%arg0: i32) -> (i32, i32) {
    %c0_i32 = arith.constant 0 : i32
    %c0_i32_0 = arith.constant 0 : i32
    %c0_i32_1 = arith.constant 0 : i32
    return %c0_i32, %c0_i32_0 : i32, i32
  }
  func.func @transform_6(%arg0: i32) -> (i32, i32) {
    %c0_i32 = arith.constant 0 : i32
    %c0_i32_0 = arith.constant 0 : i32
    %c0_i32_1 = arith.constant 0 : i32
    return %c0_i32, %c0_i32_0 : i32, i32
  }
  func.func @transform_7(%arg0: i32) -> (i32, i32) {
    %c0_i32 = arith.constant 0 : i32
    %c0_i32_0 = arith.constant 0 : i32
    %c0_i32_1 = arith.constant 0 : i32
    return %c0_i32, %c0_i32_0 : i32, i32
  }
  func.func @transform_8(%arg0: i32) -> (i32, i32) {
    %c0_i32 = arith.constant 0 : i32
    %c0_i32_0 = arith.constant 0 : i32
    %c0_i32_1 = arith.constant 0 : i32
    return %c0_i32, %c0_i32_0 : i32, i32
  }
  func.func @transform_9(%arg0: i32) -> (i32, i32, i32) {
    %c0_i32 = arith.constant 0 : i32
    %c0_i32_0 = arith.constant 0 : i32
    %c0_i32_1 = arith.constant 0 : i32
    return %arg0, %c0_i32, %c0_i32_0 : i32, i32, i32
  }
}

</mosaic_0001>

<bundles_post_ra>
// kernel: tpu_custom_call.1
= control target key start
LH: loop header
LB: loop body
LE: loop exit
PB: predicated region body
PF: predicated region fallthrough
CT: control target
= control target key end

     0   :  { %s8229_s0 = inlined_call_operand.hbm [shape: f32[2,32,512], index: 0, kind: input, shape index: {}]   ;;  %s8230_s1 = inlined_call_operand.vmem [shape: f32[9,512], index: 1, kind: input, shape index: {}]   ;;  %s8231_s2 = inlined_call_operand.vmem [shape: f32[2,512], index: 2, kind: input, shape index: {}]   ;;  %s8232_s3 = inlined_call_operand.vmem [shape: bf16[32,288], index: 3, kind: input, shape index: {}]   ;;  %s8233_s4 = inlined_call_operand.vmem [shape: f32[32,1], index: 4, kind: input, shape index: {}]   ;;  %s8234_s5 = inlined_call_operand.hbm [shape: bf16[32,288], index: 5, kind: input, shape index: {}]   ;;  %s8235_s6 = inlined_call_operand.vmem [shape: f32[32,1], index: 6, kind: input, shape index: {}]   ;;  %s8236_s7 = inlined_call_operand.vmem [shape: f32[32,2], index: 7, kind: input, shape index: {}]   ;;  %s8237_s8 = inlined_call_operand.vmem [shape: f32[32,2], index: 8, kind: input, shape index: {}]   ;;  %s8238_s9 = inlined_call_operand.hbm [shape: f32[2,32,512], index: 9, kind: output, shape index: {}]  }
   0x1   :  { %8346 = sst [smem:[#allocation85_spill]] %s8234_s5 }
   0x2   :  { %14 = vsyncpa [#allocation4], 0 }
   0x3   :  { %16 = vsyncpa [#allocation4 + $0x1], 0 }
   0x4   :  { %17 = vsyncpa [#allocation7], 0 }
   0x5   :  { %18 = vsyncpa [#allocation5], 0 }
   0x6   :  { %20 = vsyncpa [#allocation5 + $0x1], 0  ;;  %s5423_s30 = smov 0   ;;  %s5425_s10 = smov 0  }
   0x7   :  { %s5427_s11 = smov 0   ;;  %s5429_s12 = smov 0  }
   0x8 LB: > { %s5444_s13 = sadd.s32 4294967295, %s5353_s12   ;;  %s4461_s14 = sadd.s32 4294967294, %s5353_s12   ;;  %s5353_s12 = sphi %s5429_s12, %s8511_s12   ;;  %s5349_s11 = sphi %s5427_s11, %s8514_s11   ;;  %s5345_s10 = sphi %s5425_s10, %s8513_s10   ;;  %s5341_s30 = sphi %s5423_s30, %s8512_s30  }
   0x9   : > { %p46_p0 = scmp.ne.s32.totalorder %s5345_s10, %s5341_s30  ;;  %p8242_p1 = scmp.eq.s32.totalorder %s5444_s13, 0 }
   0xa   : > { %p244_p3 = scmp.eq.s32.totalorder %s4461_s14, 1  ;;  %p4462_p5 = scmp.ge.s32.totalorder %s5353_s12, 1 }
   0xb   : > { %p5453_p4 = por %p8242_p1, %p46_p0  ;;  %p251_p7 = scmp.lt.s32.totalorder %s5353_s12, 3 }
   0xc   : > { %p5458_p6 = por %p244_p3, %p46_p0  ;;  %s5355_s18 = smov [#allocation6]  }
   0xd   : > { %s8347_s15 = scalar_select %p5453_p4, 1, 0 }
   0xe   : > { %s8348_s16 = scalar_select %p5458_p6, 1, 0 }
   0xf   : > { %p5463_p8 = pnand %p4462_p5, %p251_p7  ;;  %s275_s19 = sshll.u32 %s5355_s18, 4  ;;  %s276_s19 = int_to_ptr.vmem [resolvable:$true] %s275_s19 }
  0x10   : > { %8349 = sst [smem:[#allocation12_spill]] %s8348_s16  ;;  %s5477_s21 = sadd.s32 1, %s5353_s12  }
  0x11   : > { %s8350_s17 = scalar_select %p5463_p8, 1, 0 }
  0x12   : > { %p5096_p9 = pneg %p5463_p8  ;;  %8352 = sst [smem:[#allocation13_spill]] %s5477_s21 }
  0x13   : > { %s33_s22 = sadd.s32 1, %s5349_s11  ;;  %s30_s23 = ssub.s32 %s5353_s12, %s5477_s21 }
  0x14   : > { %p5472_p11 = pnand %p5096_p9, %p8242_p1  ;;  %s5242_s24 = scalar_lea.vmem %s276_s19, 768 }
  0x15   : > { %p5243_p13 = scmp.ne.s32.totalorder %s276_s19, %s5242_s24  ;;  %p5250_p5 = scmp.lt.s32.totalorder %s276_s19, %s276_s19 }
  0x16   : > { %p5233_p12 = pneg %p5472_p11  ;;  %p5251_p7 = scmp.lt.s32.totalorder %s5242_s24, %s5242_s24 }
  0x18   : > { %p5245_p0 = pnand %p5243_p13, %p5233_p12  ;;  %p5252_p10 = por %p5251_p7, %p5250_p5 }
  0x1a   : > { %p5246_p3 = pneg %p5245_p0 }
  0x1c   : > { %p5253_p2 = pnand %p5252_p10, %p5246_p3 }
  0x1e   : > { %5256 = shalt.err (!%p5253_p2)
}
  0x1f   : > { %s5356_s25 = smov 192   ;;  %s5357_s26 = smov 12  }
  0x20   : > { %s8353_s5 = sld [smem:[#allocation85_spill]]  ;;  %p31_p9 = scmp.eq.s32.totalorder %s30_s23, 0 }
  0x21   : > { %p40_p12 = scmp.ne.s32.totalorder %s5349_s11, %s5345_s10  ;;  %p41_p10 = scmp.eq.s32.totalorder %s5353_s12, 0 }
  0x22   : > { %p5109_p2 = scmp.lt.s32.totalorder %s5353_s12, 2  ;;  %p8354_p0 = scmp.eq.s32.totalorder %s5444_s13, 1 }
  0x23   : > { %s5494_s29 = scalar_select %p31_p9, %s5349_s11, %s33_s22  }
  0x24   : > { %p42_p13 = por %p41_p10, %p40_p12  ;;  %p5498_p3 = por %p8354_p0, %p40_p12 }
  0x25   : > { %s298_s18 = sand.u32 1, %s5349_s11   ;;  %s4798_s24 = sshll.u32 %s5353_s12, 11 }
  0x26   : > { %5099 = dma.hbm_to_vmem [thread:$0]  (!%p5472_p11), %s8353_s5, 768, %s276_s19, [#allocation7], %s5356_s25, %s5356_s25, %s5357_s26  }
  0x27   : > { %s8355_s14 = scalar_select %p5498_p3, 1, 0 }
  0x28   : > { %s4465_s21 = sshll.u32 %s298_s18, 7  ;;  %s5507_s27 = scalar_lea.hbm %s8229_s0, %s4798_s24 }
  0x29   : > { %s302_s19 = scalar_lea.vmem [#allocation3], %s4465_s21  ;;  %p5509_p11 = pnand %p5109_p2, %p42_p13 }
  0x2a   : > { %s309_s22 = sshll.u32 %s302_s19, 4  ;;  %s5515_s25 = scalar_lea.sflag [#allocation4], %s298_s18  ;;  %s5513_s22 = int_to_ptr.vmem [resolvable:$true] %s309_s22 }
  0x2b   : > { %s5257_s26 = scalar_lea.hbm %s5507_s27, 2048  ;;  %p5259_p7 = pneg %p5509_p11 }
  0x2c   : > { %p5258_p5 = scmp.ne.s32.totalorder %s5507_s27, %s5257_s26  ;;  %s5262_s21 = scalar_lea.hbm %s8229_s0, 4096 }
  0x2d   : > { %p5263_p10 = scmp.lt.s32.totalorder %s5507_s27, %s8229_s0  ;;  %p5264_p2 = scmp.lt.s32.totalorder %s5262_s21, %s5257_s26 }
  0x2e   : > { %p5260_p9 = pnand %p5259_p7, %p5258_p5 }
  0x2f   : > { %p5265_p13 = por %p5264_p2, %p5263_p10 }
  0x30   : > { %p5261_p12 = pneg %p5260_p9 }
  0x32   : > { %p5266_p0 = pnand %p5265_p13, %p5261_p12 }
  0x34   : > { %5269 = shalt.err (!%p5266_p0)
}
  0x35   : > { %s5270_s18 = scalar_lea.vmem %s5513_s22, 2048  ;;  %s5358_s19 = smov [#allocation3]  }
  0x36   : > { %p5271_p1 = scmp.ne.s32.totalorder %s5513_s22, %s5270_s18  ;;  %s5275_s5 = sshll.u32 %s5358_s19, 4  ;;  %s5276_s5 = int_to_ptr.vmem [resolvable:$false] %s5275_s5 }
  0x37   : > { %s5277_s16 = scalar_lea.vmem %s5276_s5, 4096  ;;  %p5278_p9 = scmp.lt.s32.totalorder %s5513_s22, %s5276_s5 }
  0x38   : > { %p5273_p6 = pnand %p5271_p1, %p5259_p7  ;;  %p5279_p3 = scmp.lt.s32.totalorder %s5277_s16, %s5270_s18 }
  0x3a   : > { %p5274_p5 = pneg %p5273_p6  ;;  %p5280_p4 = por %p5279_p3, %p5278_p9 }
  0x3c   : > { %p5281_p8 = pnand %p5280_p4, %p5274_p5 }
  0x3e   : > { %5284 = shalt.err (!%p5281_p8)
}
  0x3f   : > { %s5359_s26 = smov 512   ;;  %s5360_s28 = smov 32  }
  0x40   : > { %5103 = dma.hbm_to_vmem [thread:$0]  (!%p5509_p11), %s5507_s27, 2048, %s5513_s22, %s5515_s25, %s5359_s26, %s5359_s26, %s5360_s28  }
  0x41   : > { %p8357_p1 = scmp.ne.s32.totalorder %s8350_s17, 0 }
  0x43   : > { %321 = sbr.rel (%p8357_p1) target bundleno = 1610 (0x64a), region = 56 }
  0x48   : > { %s5539_s21 = sand.u32 1, %s5345_s10   ;;  %p8358_p4 = scmp.ne.s32.totalorder %s8347_s15, 0 }
  0x49   : > { %s4469_s5 = sshll.u32 %s5539_s21, 7  ;;  %s324_s24 = scalar_lea.sflag [#allocation4], %s5539_s21 }
  0x4a   : > { %s5545_s20 = scalar_lea.vmem [#allocation3], %s4469_s5 }
  0x4b   : > { %5328 = dma.done.wait (%p8358_p4), %s324_s24, 2048  }
  0x4c   : > { %5330 = vsyncadd (%p8358_p4), %s324_s24, 4294965248  ;;  %p8359_p6 = scmp.eq.s32.totalorder %s5444_s13, 0 }
  0x4e   : > { %5332 = dma.done.wait (%p8359_p6), [#allocation7], 768   ;;  %p8360_p8 = pmov %p8359_p6 }
  0x4f   : > { %v5556_v0 = vld [vmem:[%s5545_s20 + $0x48] sm:$0xff]  ;;  %v5559_v1 = vld [vmem:[%s5545_s20 + $0x40] sm:$0xff]  ;;  %s5361_s15 = smov 1   ;;  %v5576_v4 = vld [vmem:[%s5545_s20 + $0x78] sm:$0xff]  ;;  %s5362_s17 = smov 111   ;;  %v8246_v16 = vmov 0   ;;  %v423_v17 = vlaneseq }
  0x50   : > { %5334 = vsyncadd (%p8360_p8), [#allocation7], 4294966528  ;;  %816 = vrot.lane.b32.xlu1 %v5556_v0, %s5361_s15  ;;  %808 = vrot.lane.b32.xlu0 %v5559_v1, %s5361_s15  ;;  %v5566_v2 = vld [vmem:[%s5545_s20 + $0x68] sm:$0xff]  ;;  %v5569_v3 = vld [vmem:[%s5545_s20 + $0x60] sm:$0xff]  ;;  %s5363_s27 = smov 15   ;;  %s5365_s22 = smov 16  }
  0x51   : > { %v5579_v5 = vld [vmem:[%s5545_s20 + $0x58] sm:$0xff]  ;;  %v5582_v6 = vld [vmem:[%s5545_s20 + $0x20] sm:$0xff]  ;;  %v5596_v8 = vld [vmem:[%s5545_s20 + $0x28] sm:$0xff]  ;;  %2131 = vmatprep.mubr.bf16.mxu1 %v8246_v16  ;;  %5161 = vset.pattern.permute.xlu1 %v8246_v16  ;;  %s5366_s23 = smov 17   ;;  %v5718_v18 = vshrl.u32 %v423_v17, 7  ;;  %v5720_v19 = vand.u32 127, %v423_v17 }
  0x52   : > { %v5585_v7 = vld [vmem:[%s5545_s20] sm:$0xff]  ;;  %v5599_v9 = vld [vmem:[%s5545_s20 + $0x8] sm:$0xff]  ;;  %v5606_v10 = vld [vmem:[%s5545_s20 + $0x38] sm:$0xff]  ;;  %5160 = vset.pattern.permute.xlu0 %v8246_v16  ;;  %s5367_s26 = smov 112   ;;  %s5368_s19 = smov 113   ;;  %vm2039_vm3 = vcmask 261120  }
  0x53   : > { %v5609_v11 = vld [vmem:[%s5545_s20 + $0x18] sm:$0xff]  ;;  %v5620_v12 = vld [vmem:[%s5545_s20 + $0x70] sm:$0xff]  ;;  %v5727_v20 = vsub.s32 3, %v5718_v18  ;;  %v5732_v21 = vld [vmem:[%s8230_s1 + $0x8] sm:$0xff]  ;;  %vm836_vm0 = vcmp.lt.s32.totalorder %v5720_v19, 1  ;;  %vm1440_vm1 = vcmp.lt.s32.totalorder %v5720_v19, 111 }
  0x54   : > { %818 = vrot.lane.b32.xlu1 %v5566_v2, %s5361_s15  ;;  %810 = vrot.lane.b32.xlu0 %v5569_v3, %s5361_s15  ;;  %v5623_v13 = vld [vmem:[%s5545_s20 + $0x50] sm:$0xff]  ;;  %v5751_v26 = vld [vmem:[%s8230_s1] sm:$0xff]  ;;  %vm699_vm2 = vcmp.lt.s32.totalorder %v5720_v19, 15  ;;  %vm562_vm4 = vcmp.lt.s32.totalorder %v5720_v19, 16  ;;  %s5369_s28 = smov 127   ;;  %vm425_vm5 = vcmp.lt.s32.totalorder %v5720_v19, 17 }
  0x55   : > { %v5650_v14 = vld [vmem:[%s5545_s20 + $0x30] sm:$0xff]  ;;  %8361 = vst [vmem:[#allocation14_spill] sm:$0xff] %v5727_v20  ;;  %v5743_v24 = vrot.slane %v5732_v21, %v5727_v20  ;;  %v5766_v32 = vrot.slane %v5751_v26, %v5727_v20  ;;  %v4537_v59 = vld [vmem:[%s8230_s1 + $0x28] ss:$0 sm:$0xff]  ;;  %vm1303_vm6 = vcmp.lt.s32.totalorder %v5720_v19, 112  ;;  %vm1166_vm7 = vcmp.lt.s32.totalorder %v5720_v19, 113 }
  0x56   : > { %v5653_v15 = vld [vmem:[%s5545_s20 + $0x10] sm:$0xff]  ;;  %vm1029_vm8 = vcmp.lt.s32.totalorder %v5720_v19, 127  ;;  %vm4072_vm9 = vcmask 15360   ;;  %p8507_p11 = scmp.ne.s32.totalorder %s8355_s14, 0 }
  0x57   : > { %8362 = vst [vmem:[#allocation15_spill] sm:$0xff] %v5766_v32 }
  0x58   : > { %834 = vrot.lane.b32.xlu1 %v5576_v4, %s5361_s15  ;;  %832 = vrot.lane.b32.xlu0 %v5579_v5, %s5361_s15 }
  0x5c   : > { %806 = vrot.lane.b32.xlu1 %v5582_v6, %s5361_s15  ;;  %804 = vrot.lane.b32.xlu0 %v5585_v7, %s5361_s15 }
  0x60   : > { %814 = vrot.lane.b32.xlu1 %v5596_v8, %s5361_s15  ;;  %812 = vrot.lane.b32.xlu0 %v5599_v9, %s5361_s15 }
  0x64   : > { %830 = vrot.lane.b32.xlu1 %v5606_v10, %s5361_s15  ;;  %828 = vrot.lane.b32.xlu0 %v5609_v11, %s5361_s15 }
  0x68   : > { %1422 = vrot.lane.b32.xlu1 %v5566_v2, %s5362_s17  ;;  %1420 = vrot.lane.b32.xlu0 %v5556_v0, %s5362_s17 }
  0x6c   : > { %1430 = vrot.lane.b32.xlu1 %v5620_v12, %s5362_s17  ;;  %1428 = vrot.lane.b32.xlu0 %v5623_v13, %s5362_s17 }
  0x70   : > { %1414 = vrot.lane.b32.xlu1 %v5569_v3, %s5362_s17  ;;  %1412 = vrot.lane.b32.xlu0 %v5559_v1, %s5362_s17 }
  0x74   : > { %673 = vrot.lane.b32.xlu1 %v5569_v3, %s5363_s27  ;;  %671 = vrot.lane.b32.xlu0 %v5559_v1, %s5363_s27 }
  0x78   : > { %681 = vrot.lane.b32.xlu1 %v5566_v2, %s5363_s27  ;;  %679 = vrot.lane.b32.xlu0 %v5556_v0, %s5363_s27 }
  0x7c   : > { %697 = vrot.lane.b32.xlu1 %v5576_v4, %s5363_s27  ;;  %695 = vrot.lane.b32.xlu0 %v5579_v5, %s5363_s27 }
  0x80   : > { %1418 = vrot.lane.b32.xlu1 %v5596_v8, %s5362_s17  ;;  %1416 = vrot.lane.b32.xlu0 %v5599_v9, %s5362_s17 }
  0x84   : > { %1426 = vrot.lane.b32.xlu1 %v5650_v14, %s5362_s17  ;;  %1424 = vrot.lane.b32.xlu0 %v5653_v15, %s5362_s17 }
  0x88   : > { %1410 = vrot.lane.b32.xlu1 %v5582_v6, %s5362_s17  ;;  %1408 = vrot.lane.b32.xlu0 %v5585_v7, %s5362_s17 }
  0x8c   : > { %669 = vrot.lane.b32.xlu1 %v5582_v6, %s5363_s27  ;;  %667 = vrot.lane.b32.xlu0 %v5585_v7, %s5363_s27 }
  0x90   : > { %677 = vrot.lane.b32.xlu1 %v5596_v8, %s5363_s27  ;;  %675 = vrot.lane.b32.xlu0 %v5599_v9, %s5363_s27 }
  0x94   : > { %693 = vrot.lane.b32.xlu1 %v5606_v10, %s5363_s27  ;;  %691 = vrot.lane.b32.xlu0 %v5609_v11, %s5363_s27 }
  0x98   : > { %826 = vrot.lane.b32.xlu1 %v5620_v12, %s5361_s15  ;;  %824 = vrot.lane.b32.xlu0 %v5623_v13, %s5361_s15 }
  0x9c   : > { %536 = vrot.lane.b32.xlu1 %v5569_v3, %s5365_s22  ;;  %534 = vrot.lane.b32.xlu0 %v5559_v1, %s5365_s22 }
  0xa0   : > { %544 = vrot.lane.b32.xlu1 %v5566_v2, %s5365_s22  ;;  %542 = vrot.lane.b32.xlu0 %v5556_v0, %s5365_s22 }
  0xa4   : > { %560 = vrot.lane.b32.xlu1 %v5576_v4, %s5365_s22  ;;  %558 = vrot.lane.b32.xlu0 %v5579_v5, %s5365_s22 }
  0xa8   : > { %822 = vrot.lane.b32.xlu1 %v5650_v14, %s5361_s15  ;;  %820 = vrot.lane.b32.xlu0 %v5653_v15, %s5361_s15 }
  0xac   : > { %532 = vrot.lane.b32.xlu1 %v5582_v6, %s5365_s22  ;;  %530 = vrot.lane.b32.xlu0 %v5585_v7, %s5365_s22 }
  0xb0   : > { %540 = vrot.lane.b32.xlu1 %v5596_v8, %s5365_s22  ;;  %538 = vrot.lane.b32.xlu0 %v5599_v9, %s5365_s22 }
  0xb4   : > { %556 = vrot.lane.b32.xlu1 %v5606_v10, %s5365_s22  ;;  %554 = vrot.lane.b32.xlu0 %v5609_v11, %s5365_s22 }
  0xb8   : > { %689 = vrot.lane.b32.xlu1 %v5620_v12, %s5363_s27  ;;  %687 = vrot.lane.b32.xlu0 %v5623_v13, %s5363_s27 }
  0xbc   : > { %397 = vrot.lane.b32.xlu1 %v5569_v3, %s5366_s23  ;;  %395 = vrot.lane.b32.xlu0 %v5559_v1, %s5366_s23 }
  0xc0   : > { %405 = vrot.lane.b32.xlu1 %v5566_v2, %s5366_s23  ;;  %403 = vrot.lane.b32.xlu0 %v5556_v0, %s5366_s23 }
  0xc2   : > { %v5734_v22 = vpop.permute.xlu1 %816  ;;  %v809_v23 = vpop.permute.xlu0 %808 }
  0xc3   : > { %v847_v25 = vsel %vm836_vm0, %v809_v23, %v5734_v22 }
  0xc4   : > { %421 = vrot.lane.b32.xlu1 %v5576_v4, %s5366_s23  ;;  %419 = vrot.lane.b32.xlu0 %v5579_v5, %s5366_s23  ;;  %v878_v30 = vmul.f32 %v5743_v24, %v847_v25  ;;  %v4536_v25 = vld [vmem:[%s8230_s1 + $0x20] ss:$0 sm:$0xff] }
  0xc6   : > { %v5753_v27 = vpop.permute.xlu1 %818  ;;  %v811_v28 = vpop.permute.xlu0 %810 }
  0xc7   : > { %v848_v29 = vsel %vm836_vm0, %v811_v28, %v5753_v27 }
  0xc8   : > { %685 = vrot.lane.b32.xlu1 %v5650_v14, %s5363_s27  ;;  %683 = vrot.lane.b32.xlu0 %v5653_v15, %s5363_s27  ;;  %v882_v31 = vmul.f32 %v5743_v24, %v848_v29 }
  0xca   : > { %v5768_v33 = vpop.permute.xlu1 %834  ;;  %v5770_v34 = vpop.permute.xlu0 %832  ;;  %v4973_v35 = vpack.c.bf16 %v882_v31, %v878_v30 }
  0xcb   : > { %v852_v36 = vsel %vm836_vm0, %v5768_v33, %v811_v28  ;;  %v851_v37 = vsel %vm836_vm0, %v5770_v34, %v809_v23 }
  0xcc   : > { %393 = vrot.lane.b32.xlu1 %v5582_v6, %s5366_s23  ;;  %391 = vrot.lane.b32.xlu0 %v5585_v7, %s5366_s23  ;;  %v877_v38 = vmul.f32 %v5766_v32, %v851_v37  ;;  %v881_v39 = vmul.f32 %v5766_v32, %v852_v36 }
  0xcd   : > { %2046 = vmatprep.subr.bf16.mxu0 %v4973_v35 }
  0xce   : > { %v807_v40 = vpop.permute.xlu1 %806  ;;  %v805_v41 = vpop.permute.xlu0 %804  ;;  %v4972_v42 = vpack.c.bf16 %v881_v39, %v877_v38  ;;  %v5860_v38 = vsub.s32 2, %v5718_v18 }
  0xd0   : > { %401 = vrot.lane.b32.xlu1 %v5596_v8, %s5366_s23  ;;  %399 = vrot.lane.b32.xlu0 %v5599_v9, %s5366_s23  ;;  %8363 = vst [vmem:[#allocation16_spill] sm:$0xff] %v5860_v38 }
  0xd1   : > { %2047 = vmatpush1.bf16.msra.mxu0 %v4972_v42  ;;  %v5869_v42 = vrot.slane %v5732_v21, %v5860_v38 }
  0xd2   : > { %v5788_v43 = vpop.permute.xlu1 %814  ;;  %v5790_v44 = vpop.permute.xlu0 %812 }
  0xd3   : > { %v846_v45 = vsel %vm836_vm0, %v807_v40, %v5788_v43  ;;  %v845_v46 = vsel %vm836_vm0, %v805_v41, %v5790_v44 }
  0xd4   : > { %v874_v47 = vmul.f32 %v5743_v24, %v846_v45  ;;  %v870_v48 = vmul.f32 %v5743_v24, %v845_v46  ;;  %417 = vrot.lane.b32.xlu1 %v5606_v10, %s5366_s23  ;;  %415 = vrot.lane.b32.xlu0 %v5609_v11, %s5366_s23 }
  0xd6   : > { %v5804_v49 = vpop.permute.xlu1 %830  ;;  %v5806_v50 = vpop.permute.xlu0 %828  ;;  %v4969_v51 = vpack.c.bf16 %v874_v47, %v870_v48 }
  0xd7   : > { %v850_v52 = vsel %vm836_vm0, %v5804_v49, %v807_v40  ;;  %v849_v53 = vsel %vm836_vm0, %v5806_v50, %v805_v41 }
  0xd8   : > { %v873_v54 = vmul.f32 %v5766_v32, %v850_v52  ;;  %v869_v55 = vmul.f32 %v5766_v32, %v849_v53  ;;  %552 = vrot.lane.b32.xlu1 %v5620_v12, %s5365_s22  ;;  %550 = vrot.lane.b32.xlu0 %v5623_v13, %s5365_s22  ;;  %v5889_v53 = vrot.slane %v5751_v26, %v5860_v38 }
  0xd9   : > { %2048 = vmatprep.subr.bf16.mxu0 %v4969_v51 }
  0xda   : > { %v1423_v56 = vpop.permute.xlu1 %1422  ;;  %v1421_v57 = vpop.permute.xlu0 %1420  ;;  %v4968_v58 = vpack.c.bf16 %v873_v54, %v869_v55  ;;  %8364 = vst [vmem:[#allocation17_spill] sm:$0xff] %v5889_v53 }
  0xdc   : > { %1285 = vrot.lane.b32.xlu1 %v5566_v2, %s5367_s26  ;;  %1283 = vrot.lane.b32.xlu0 %v5556_v0, %s5367_s26 }
  0xdd   : > { %2049 = vmatpush1.bf16.msra.mxu0 %v4968_v58 }
  0xde   : > { %v5828_v60 = vpop.permute.xlu1 %1430  ;;  %v5830_v61 = vpop.permute.xlu0 %1428 }
  0xdf   : > { %v1447_v62 = vsel %vm1440_vm1, %v1421_v57, %v5830_v61  ;;  %v1448_v63 = vsel %vm1440_vm1, %v1423_v56, %v5828_v60 }
  0xe0   : > { %1293 = vrot.lane.b32.xlu1 %v5620_v12, %s5367_s26  ;;  %1291 = vrot.lane.b32.xlu0 %v5623_v13, %s5367_s26  ;;  %v1482_v17 = vmul.f32 %v4537_v59, %v1447_v62  ;;  %v1486_v23 = vmul.f32 %v4537_v59, %v1448_v63 }
  0xe2   : > { %v5845_v28 = vpop.permute.xlu1 %1414  ;;  %v5847_v29 = vpop.permute.xlu0 %1412  ;;  %v5013_v30 = vpack.c.bf16 %v1486_v23, %v1482_v17 }
  0xe3   : > { %v1452_v31 = vsel %vm1440_vm1, %v5845_v28, %v1423_v56  ;;  %v1451_v35 = vsel %vm1440_vm1, %v5847_v29, %v1421_v57 }
  0xe4   : > { %1277 = vrot.lane.b32.xlu1 %v5569_v3, %s5367_s26  ;;  %1275 = vrot.lane.b32.xlu0 %v5559_v1, %s5367_s26  ;;  %v1481_v36 = vmul.f32 %v4536_v25, %v1451_v35  ;;  %v1485_v37 = vmul.f32 %v4536_v25, %v1452_v31 }
  0xe5   : > { %2111 = vmatprep.subr.bf16.mxu1 %v5013_v30 }
  0xe6   : > { %v674_v39 = vpop.permute.xlu1 %673  ;;  %v672_v40 = vpop.permute.xlu0 %671  ;;  %v5012_v41 = vpack.c.bf16 %v1485_v37, %v1481_v36 }
  0xe8   : > { %548 = vrot.lane.b32.xlu1 %v5650_v14, %s5365_s22  ;;  %546 = vrot.lane.b32.xlu0 %v5653_v15, %s5365_s22 }
  0xe9   : > { %2112 = vmatpush1.bf16.msra.mxu1 %v5012_v41 }
  0xea   : > { %v5871_v45 = vpop.permute.xlu1 %681  ;;  %v5873_v46 = vpop.permute.xlu0 %679 }
  0xeb   : > { %v711_v47 = vsel %vm699_vm2, %v674_v39, %v5871_v45  ;;  %v710_v48 = vsel %vm699_vm2, %v672_v40, %v5873_v46 }
  0xec   : > { %v745_v51 = vmul.f32 %v5869_v42, %v711_v47  ;;  %v741_v52 = vmul.f32 %v5869_v42, %v710_v48  ;;  %1281 = vrot.lane.b32.xlu1 %v5596_v8, %s5367_s26  ;;  %1279 = vrot.lane.b32.xlu0 %v5599_v9, %s5367_s26 }
  0xee   : > { %v5891_v54 = vpop.permute.xlu1 %697  ;;  %v5893_v55 = vpop.permute.xlu0 %695  ;;  %v4965_v56 = vpack.c.bf16 %v745_v51, %v741_v52 }
  0xef   : > { %v715_v57 = vsel %vm699_vm2, %v5891_v54, %v674_v39  ;;  %v714_v58 = vsel %vm699_vm2, %v5893_v55, %v672_v40 }
  0xf0   : > { %v744_v62 = vmul.f32 %v5889_v53, %v715_v57  ;;  %v740_v63 = vmul.f32 %v5889_v53, %v714_v58  ;;  %1289 = vrot.lane.b32.xlu1 %v5650_v14, %s5367_s26  ;;  %1287 = vrot.lane.b32.xlu0 %v5653_v15, %s5367_s26 }
  0xf1   : > { %2050 = vmatprep.subr.bf16.mxu0 %v4965_v56 }
  0xf2   : > { %v1419_v17 = vpop.permute.xlu1 %1418  ;;  %v1417_v23 = vpop.permute.xlu0 %1416  ;;  %v4964_v30 = vpack.c.bf16 %v744_v62, %v740_v63 }
  0xf4   : > { %1273 = vrot.lane.b32.xlu1 %v5582_v6, %s5367_s26  ;;  %1271 = vrot.lane.b32.xlu0 %v5585_v7, %s5367_s26 }
  0xf5   : > { %2051 = vmatpush1.bf16.msra.mxu0 %v4964_v30 }
  0xf6   : > { %v5911_v31 = vpop.permute.xlu1 %1426  ;;  %v5913_v35 = vpop.permute.xlu0 %1424 }
  0xf7   : > { %v1446_v36 = vsel %vm1440_vm1, %v1419_v17, %v5911_v31  ;;  %v1445_v37 = vsel %vm1440_vm1, %v1417_v23, %v5913_v35 }
  0xf8   : > { %v1478_v39 = vmul.f32 %v4537_v59, %v1446_v36  ;;  %v1474_v40 = vmul.f32 %v4537_v59, %v1445_v37  ;;  %413 = vrot.lane.b32.xlu1 %v5620_v12, %s5366_s23  ;;  %411 = vrot.lane.b32.xlu0 %v5623_v13, %s5366_s23 }
  0xfa   : > { %v5925_v41 = vpop.permute.xlu1 %1410  ;;  %v5927_v47 = vpop.permute.xlu0 %1408  ;;  %v5009_v48 = vpack.c.bf16 %v1478_v39, %v1474_v40  ;;  %v5965_v39 = vld [vmem:[%s8230_s1 + $0x10] sm:$0xff]  ;;  %v5970_v40 = vld [vmem:[%s8230_s1 + $0x18] sm:$0xff] }
  0xfb   : > { %v1450_v51 = vsel %vm1440_vm1, %v5925_v41, %v1419_v17  ;;  %v1449_v52 = vsel %vm1440_vm1, %v5927_v47, %v1417_v23 }
  0xfc   : > { %v1477_v59 = vmul.f32 %v4536_v25, %v1450_v51  ;;  %v1473_v56 = vmul.f32 %v4536_v25, %v1449_v52  ;;  %1148 = vrot.lane.b32.xlu1 %v5566_v2, %s5368_s19  ;;  %1146 = vrot.lane.b32.xlu0 %v5556_v0, %s5368_s19  ;;  %v5162_v25 = vld [vmem:[%s8232_s3 + $0x8] ss:$12 sps:$4 sm:$0xff]  }
  0xfd   : > { %2113 = vmatprep.subr.bf16.mxu1 %v5009_v48 }
  0xfe   : > { %v670_v57 = vpop.permute.xlu1 %669  ;;  %v668_v58 = vpop.permute.xlu0 %667  ;;  %v5008_v62 = vpack.c.bf16 %v1477_v59, %v1473_v56 }
 0x100   : > { %1156 = vrot.lane.b32.xlu1 %v5620_v12, %s5368_s19  ;;  %1154 = vrot.lane.b32.xlu0 %v5623_v13, %s5368_s19 }
 0x101   : > { %2114 = vmatpush1.bf16.msra.mxu1 %v5008_v62  ;;  %v5986_v62 = vrot.slane %v5965_v39, %v5727_v20 }
 0x102   : > { %v5946_v63 = vpop.permute.xlu1 %677  ;;  %v5948_v17 = vpop.permute.xlu0 %675 }
 0x103   : > { %v709_v23 = vsel %vm699_vm2, %v670_v57, %v5946_v63  ;;  %v708_v30 = vsel %vm699_vm2, %v668_v58, %v5948_v17 }
 0x104   : > { %v737_v36 = vmul.f32 %v5869_v42, %v709_v23  ;;  %v733_v37 = vmul.f32 %v5869_v42, %v708_v30  ;;  %1140 = vrot.lane.b32.xlu1 %v5569_v3, %s5368_s19  ;;  %1138 = vrot.lane.b32.xlu0 %v5559_v1, %s5368_s19 }
 0x105   : > { %4626 = vmatmul.mubr.msk.bf16.vlgmr.msra.gmra.mxu1 %vm2039_vm3, %v5162_v25 }
 0x106   : > { %v5973_v48 = vpop.permute.xlu1 %693  ;;  %v5975_v51 = vpop.permute.xlu0 %691  ;;  %v4961_v52 = vpack.c.bf16 %v737_v36, %v733_v37  ;;  %2141 = vmatprep.mubr.bf16.mxu1 %v8246_v16  ;;  %v5999_v37 = vsub.s32 1, %v5718_v18 }
 0x107   : > { %v713_v59 = vsel %vm699_vm2, %v5973_v48, %v670_v57  ;;  %v712_v56 = vsel %vm699_vm2, %v5975_v51, %v668_v58  ;;  %v5996_v57 = vrot.slane %v5970_v40, %v5727_v20 }
 0x108   : > { %v736_v25 = vmul.f32 %v5889_v53, %v713_v59  ;;  %v732_v23 = vmul.f32 %v5889_v53, %v712_v56  ;;  %409 = vrot.lane.b32.xlu1 %v5650_v14, %s5366_s23  ;;  %407 = vrot.lane.b32.xlu0 %v5653_v15, %s5366_s23  ;;  %8365 = vst [vmem:[#allocation18_spill] sm:$0xff] %v5999_v37 }
 0x109   : > { %2052 = vmatprep.subr.bf16.mxu0 %v4961_v52 }
 0x10a   : > { %v827_v58 = vpop.permute.xlu1 %826  ;;  %v825_v30 = vpop.permute.xlu0 %824  ;;  %v4960_v36 = vpack.c.bf16 %v736_v25, %v732_v23 }
 0x10b   : > { %v840_v59 = vsel %vm836_vm0, %v827_v58, %v5768_v33  ;;  %v844_v56 = vsel %vm836_vm0, %v5753_v27, %v827_v58  ;;  %v839_v16 = vsel %vm836_vm0, %v825_v30, %v5770_v34  ;;  %v843_v52 = vsel %vm836_vm0, %v5734_v22, %v825_v30 }
 0x10c   : > { %v883_v25 = vmul.f32 %v5986_v62, %v844_v56  ;;  %v884_v23 = vmul.f32 %v5996_v57, %v840_v59  ;;  %v879_v20 = vmul.f32 %v5986_v62, %v843_v52  ;;  %v880_v33 = vmul.f32 %v5996_v57, %v839_v16  ;;  %1144 = vrot.lane.b32.xlu1 %v5596_v8, %s5368_s19 }
 0x10d   : > { %1142 = vrot.lane.b32.xlu0 %v5599_v9, %s5368_s19  ;;  %2053 = vmatpush1.bf16.msra.mxu0 %v4960_v36  ;;  %v6026_v16 = vrot.slane %v5732_v21, %v5999_v37  ;;  %v6046_v56 = vrot.slane %v5751_v26, %v5999_v37 }
 0x10e   : > { %v4974_v27 = vpack.c.bf16 %v883_v25, %v879_v20  ;;  %v537_v34 = vpop.permute.xlu1 %536  ;;  %v535_v58 = vpop.permute.xlu0 %534  ;;  %v4975_v53 = vpack.c.bf16 %v884_v23, %v880_v33 }
 0x10f   : > { %8366 = vst [vmem:[#allocation19_spill] sm:$0xff] %v6046_v56 }
 0x110   : > { %1152 = vrot.lane.b32.xlu1 %v5650_v14, %s5368_s19  ;;  %2152 = vmatprep.subr.bf16.mxu1 %v4975_v53 }
 0x111   : > { %1150 = vrot.lane.b32.xlu0 %v5653_v15, %s5368_s19  ;;  %2153 = vmatpush1.bf16.msra.mxu1 %v4974_v27 }
 0x112   : > { %v6030_v22 = vpop.permute.xlu1 %544  ;;  %v6032_v20 = vpop.permute.xlu0 %542 }
 0x113   : > { %v574_v30 = vsel %vm562_vm4, %v537_v34, %v6030_v22  ;;  %v573_v53 = vsel %vm562_vm4, %v535_v58, %v6032_v20 }
 0x114   : > { %v608_v36 = vmul.f32 %v6026_v16, %v574_v30  ;;  %v604_v59 = vmul.f32 %v6026_v16, %v573_v53  ;;  %1136 = vrot.lane.b32.xlu1 %v5582_v6, %s5368_s19 }
 0x115   : > { %1134 = vrot.lane.b32.xlu0 %v5585_v7, %s5368_s19 }
 0x116   : > { %v6050_v52 = vpop.permute.xlu1 %560  ;;  %v6052_v25 = vpop.permute.xlu0 %558  ;;  %v4957_v23 = vpack.c.bf16 %v608_v36, %v604_v59 }
 0x117   : > { %v578_v33 = vsel %vm562_vm4, %v6050_v52, %v537_v34  ;;  %v577_v27 = vsel %vm562_vm4, %v6052_v25, %v535_v58 }
 0x118   : > { %v607_v30 = vmul.f32 %v6046_v56, %v578_v33  ;;  %v603_v53 = vmul.f32 %v6046_v56, %v577_v27  ;;  %1301 = vrot.lane.b32.xlu1 %v5576_v4, %s5367_s26  ;;  %2054 = vmatprep.subr.bf16.mxu0 %v4957_v23 }
 0x119   : > { %1299 = vrot.lane.b32.xlu0 %v5579_v5, %s5367_s26 }
 0x11a   : > { %v823_v36 = vpop.permute.xlu1 %822  ;;  %v821_v59 = vpop.permute.xlu0 %820  ;;  %v4956_v32 = vpack.c.bf16 %v607_v30, %v603_v53 }
 0x11b   : > { %v838_v34 = vsel %vm836_vm0, %v823_v36, %v5804_v49  ;;  %v842_v58 = vsel %vm836_vm0, %v5788_v43, %v823_v36  ;;  %v837_v33 = vsel %vm836_vm0, %v821_v59, %v5806_v50  ;;  %v841_v23 = vsel %vm836_vm0, %v5790_v44, %v821_v59 }
 0x11c   : > { %v875_v27 = vmul.f32 %v5986_v62, %v842_v58  ;;  %v876_v30 = vmul.f32 %v5996_v57, %v838_v34  ;;  %v871_v53 = vmul.f32 %v5986_v62, %v841_v23  ;;  %v872_v49 = vmul.f32 %v5996_v57, %v837_v33  ;;  %1011 = vrot.lane.b32.xlu1 %v5566_v2, %s5369_s28 }
 0x11d   : > { %1009 = vrot.lane.b32.xlu0 %v5556_v0, %s5369_s28  ;;  %2055 = vmatpush1.bf16.msra.mxu0 %v4956_v32 }
 0x11e   : > { %v4970_v43 = vpack.c.bf16 %v875_v27, %v871_v53  ;;  %v533_v50 = vpop.permute.xlu1 %532  ;;  %v531_v36 = vpop.permute.xlu0 %530  ;;  %v4971_v44 = vpack.c.bf16 %v876_v30, %v872_v49  ;;  %v6118_v30 = vrot.slane %v5965_v39, %v5860_v38  ;;  %v6126_v53 = vrot.slane %v5970_v40, %v5860_v38 }
 0x120   : > { %1019 = vrot.lane.b32.xlu1 %v5620_v12, %s5369_s28  ;;  %2154 = vmatprep.subr.bf16.mxu1 %v4971_v44  ;;  %8367 = vst [vmem:[#allocation20_spill] sm:$0xff] %v6118_v30 }
 0x121   : > { %1017 = vrot.lane.b32.xlu0 %v5623_v13, %s5369_s28  ;;  %2155 = vmatpush1.bf16.msra.mxu1 %v4970_v43 }
 0x122   : > { %v6090_v59 = vpop.permute.xlu1 %540  ;;  %v6092_v34 = vpop.permute.xlu0 %538 }
 0x123   : > { %v572_v0 = vsel %vm562_vm4, %v533_v50, %v6090_v59  ;;  %v571_v2 = vsel %vm562_vm4, %v531_v36, %v6092_v34 }
 0x124   : > { %v600_v32 = vmul.f32 %v6026_v16, %v572_v0  ;;  %v596_v12 = vmul.f32 %v6026_v16, %v571_v2  ;;  %1003 = vrot.lane.b32.xlu1 %v5569_v3, %s5369_s28 }
 0x125   : > { %1001 = vrot.lane.b32.xlu0 %v5559_v1, %s5369_s28 }
 0x126   : > { %v6106_v13 = vpop.permute.xlu1 %556  ;;  %v6108_v58 = vpop.permute.xlu0 %554  ;;  %v4953_v33 = vpack.c.bf16 %v600_v32, %v596_v12 }
 0x127   : > { %v576_v23 = vsel %vm562_vm4, %v6106_v13, %v533_v50  ;;  %v575_v27 = vsel %vm562_vm4, %v6108_v58, %v531_v36  ;;  %v6131_v36 = vsub.s32 0, %v5718_v18 }
 0x128   : > { %v599_v3 = vmul.f32 %v6046_v56, %v576_v23  ;;  %v595_v1 = vmul.f32 %v6046_v56, %v575_v27  ;;  %1297 = vrot.lane.b32.xlu1 %v5606_v10, %s5367_s26  ;;  %2056 = vmatprep.subr.bf16.mxu0 %v4953_v33 }
 0x129   : > { %1295 = vrot.lane.b32.xlu0 %v5609_v11, %s5367_s26  ;;  %8368 = vst [vmem:[#allocation21_spill] sm:$0xff] %v6131_v36 }
 0x12a   : > { %v690_v49 = vpop.permute.xlu1 %689  ;;  %v688_v43 = vpop.permute.xlu0 %687  ;;  %v4952_v50 = vpack.c.bf16 %v599_v3, %v595_v1 }
 0x12b   : > { %v703_v44 = vsel %vm699_vm2, %v690_v49, %v5891_v54  ;;  %v707_v0 = vsel %vm699_vm2, %v5871_v45, %v690_v49  ;;  %v702_v2 = vsel %vm699_vm2, %v688_v43, %v5893_v55  ;;  %v706_v32 = vsel %vm699_vm2, %v5873_v46, %v688_v43 }
 0x12c   : > { %v746_v12 = vmul.f32 %v6118_v30, %v707_v0  ;;  %v747_v33 = vmul.f32 %v6126_v53, %v703_v44  ;;  %v742_v23 = vmul.f32 %v6118_v30, %v706_v32  ;;  %v743_v54 = vmul.f32 %v6126_v53, %v702_v2  ;;  %1007 = vrot.lane.b32.xlu1 %v5596_v8, %s5369_s28 }
 0x12d   : > { %1005 = vrot.lane.b32.xlu0 %v5599_v9, %s5369_s28  ;;  %2057 = vmatpush1.bf16.msra.mxu0 %v4952_v50  ;;  %v6158_v46 = vrot.slane %v5732_v21, %v6131_v36  ;;  %v5165_v50 = vld [vmem:[%s8232_s3 + $0x4] ss:$12 sps:$4 sm:$0xff]  }
 0x12e   : > { %v4966_v45 = vpack.c.bf16 %v746_v12, %v742_v23  ;;  %v398_v55 = vpop.permute.xlu1 %397  ;;  %v396_v27 = vpop.permute.xlu0 %395  ;;  %v4967_v3 = vpack.c.bf16 %v747_v33, %v743_v54  ;;  %2078 = vmatprep.mubr.bf16.mxu0 %v5165_v50 }
 0x12f   : > { %8369 = vst [vmem:[#allocation22_spill] sm:$0xff] %v6158_v46 }
 0x130   : > { %1015 = vrot.lane.b32.xlu1 %v5650_v14, %s5369_s28  ;;  %2156 = vmatprep.subr.bf16.mxu1 %v4967_v3 }
 0x131   : > { %1013 = vrot.lane.b32.xlu0 %v5653_v15, %s5369_s28  ;;  %2157 = vmatpush1.bf16.msra.mxu1 %v4966_v45  ;;  %v6178_v15 = vrot.slane %v5751_v26, %v6131_v36 }
 0x132   : > { %v6162_v8 = vpop.permute.xlu1 %405  ;;  %v6164_v9 = vpop.permute.xlu0 %403 }
 0x133   : > { %v437_v1 = vsel %vm425_vm5, %v398_v55, %v6162_v8  ;;  %v436_v14 = vsel %vm425_vm5, %v396_v27, %v6164_v9  ;;  %8370 = vst [vmem:[#allocation23_spill] sm:$0xff] %v6178_v15 }
 0x134   : > { %v471_v49 = vmul.f32 %v6158_v46, %v437_v1  ;;  %v467_v43 = vmul.f32 %v6158_v46, %v436_v14  ;;  %999 = vrot.lane.b32.xlu1 %v5582_v6, %s5369_s28 }
 0x135   : > { %997 = vrot.lane.b32.xlu0 %v5585_v7, %s5369_s28 }
 0x136   : > { %v6185_v44 = vpop.permute.xlu1 %421  ;;  %v6187_v0 = vpop.permute.xlu0 %419  ;;  %v4949_v2 = vpack.c.bf16 %v471_v49, %v467_v43 }
 0x137   : > { %v441_v6 = vsel %vm425_vm5, %v6185_v44, %v398_v55  ;;  %v440_v32 = vsel %vm425_vm5, %v6187_v0, %v396_v27 }
 0x138   : > { %v470_v7 = vmul.f32 %v6178_v15, %v441_v6  ;;  %v466_v12 = vmul.f32 %v6178_v15, %v440_v32  ;;  %1164 = vrot.lane.b32.xlu1 %v5576_v4, %s5368_s19  ;;  %2058 = vmatprep.subr.bf16.mxu0 %v4949_v2 }
 0x139   : > { %1162 = vrot.lane.b32.xlu0 %v5579_v5, %s5368_s19 }
 0x13a   : > { %v686_v33 = vpop.permute.xlu1 %685  ;;  %v684_v23 = vpop.permute.xlu0 %683  ;;  %v4948_v54 = vpack.c.bf16 %v470_v7, %v466_v12 }
 0x13b   : > { %v701_v45 = vsel %vm699_vm2, %v686_v33, %v5973_v48  ;;  %v705_v55 = vsel %vm699_vm2, %v5946_v63, %v686_v33  ;;  %v700_v27 = vsel %vm699_vm2, %v684_v23, %v5975_v51  ;;  %v704_v3 = vsel %vm699_vm2, %v5948_v17, %v684_v23  ;;  %v6224_v17 = vld [vmem:[%s8232_s3 + $0x20] ss:$12 sps:$4 sm:$0xff]  }
 0x13c   : > { %v738_v1 = vmul.f32 %v6118_v30, %v705_v55  ;;  %v739_v14 = vmul.f32 %v6126_v53, %v701_v45  ;;  %v734_v49 = vmul.f32 %v6118_v30, %v704_v3  ;;  %v735_v48 = vmul.f32 %v6126_v53, %v700_v27  ;;  %1160 = vrot.lane.b32.xlu1 %v5606_v10, %s5368_s19 }
 0x13d   : > { %1158 = vrot.lane.b32.xlu0 %v5609_v11, %s5368_s19  ;;  %2059 = vmatpush1.bf16.msra.mxu0 %v4948_v54  ;;  %v6260_v3 = vrot.slane %v5965_v39, %v5999_v37 }
 0x13e   : > { %v4962_v63 = vpack.c.bf16 %v738_v1, %v734_v49  ;;  %v394_v51 = vpop.permute.xlu1 %393  ;;  %v392_v43 = vpop.permute.xlu0 %391  ;;  %v4963_v2 = vpack.c.bf16 %v739_v14, %v735_v48  ;;  %4627 = vmatmul.mubr.msk.bf16.gmra.mxu1 %vm2039_vm3, %v6224_v17  ;;  %v6268_v49 = vrot.slane %v5970_v40, %v5999_v37 }
 0x13f   : > { %2184 = vmatprep.mubr.bf16.mxu1 %v5165_v50  ;;  %8371 = vst [vmem:[#allocation24_spill] sm:$0xff] %v6260_v3 }
 0x140   : > { %1027 = vrot.lane.b32.xlu1 %v5576_v4, %s5369_s28  ;;  %2158 = vmatprep.subr.bf16.mxu1 %v4963_v2  ;;  %8372 = vst [vmem:[#allocation25_spill] sm:$0xff] %v6268_v49 }
 0x141   : > { %1025 = vrot.lane.b32.xlu0 %v5579_v5, %s5369_s28  ;;  %2159 = vmatpush1.bf16.msra.mxu1 %v4962_v63 }
 0x142   : > { %v6230_v6 = vpop.permute.xlu1 %401  ;;  %v6232_v32 = vpop.permute.xlu0 %399 }
 0x143   : > { %v435_v7 = vsel %vm425_vm5, %v394_v51, %v6230_v6  ;;  %v434_v12 = vsel %vm425_vm5, %v392_v43, %v6232_v32 }
 0x144   : > { %v463_v33 = vmul.f32 %v6158_v46, %v435_v7  ;;  %v459_v23 = vmul.f32 %v6158_v46, %v434_v12  ;;  %1023 = vrot.lane.b32.xlu1 %v5606_v10, %s5369_s28 }
 0x145   : > { %1021 = vrot.lane.b32.xlu0 %v5609_v11, %s5369_s28 }
 0x146   : > { %v6248_v54 = vpop.permute.xlu1 %417  ;;  %v6250_v45 = vpop.permute.xlu0 %415  ;;  %v4945_v55 = vpack.c.bf16 %v463_v33, %v459_v23 }
 0x147   : > { %v439_v27 = vsel %vm425_vm5, %v6248_v54, %v394_v51  ;;  %v438_v50 = vsel %vm425_vm5, %v6250_v45, %v392_v43  ;;  %v6273_v43 = vsub.s32 7, %v5718_v18 }
 0x148   : > { %v462_v1 = vmul.f32 %v6178_v15, %v439_v27  ;;  %v458_v14 = vmul.f32 %v6178_v15, %v438_v50  ;;  %1438 = vrot.lane.b32.xlu1 %v5576_v4, %s5362_s17  ;;  %2060 = vmatprep.subr.bf16.mxu0 %v4945_v55 }
 0x149   : > { %1436 = vrot.lane.b32.xlu0 %v5579_v5, %s5362_s17 }
 0x14a   : > { %v553_v48 = vpop.permute.xlu1 %552  ;;  %v551_v63 = vpop.permute.xlu0 %550  ;;  %v4944_v51 = vpack.c.bf16 %v462_v1, %v458_v14 }
 0x14b   : > { %v566_v2 = vsel %vm562_vm4, %v553_v48, %v6050_v52  ;;  %v570_v4 = vsel %vm562_vm4, %v6030_v22, %v553_v48  ;;  %v565_v7 = vsel %vm562_vm4, %v551_v63, %v6052_v25  ;;  %v569_v5 = vsel %vm562_vm4, %v6032_v20, %v551_v63  ;;  %v1625_v63 = vld [vmem:[%s8233_s4] sm:$0xff] }
 0x14c   : > { %v609_v12 = vmul.f32 %v6260_v3, %v570_v4  ;;  %v610_v33 = vmul.f32 %v6268_v49, %v566_v2  ;;  %v605_v23 = vmul.f32 %v6260_v3, %v569_v5  ;;  %v606_v52 = vmul.f32 %v6268_v49, %v565_v7  ;;  %1434 = vrot.lane.b32.xlu1 %v5606_v10, %s5362_s17  ;;  %v1628_v10 = vld [vmem:[%s8233_s4 + $0x18] sm:$0xff] }
 0x14d   : > { %1432 = vrot.lane.b32.xlu0 %v5609_v11, %s5362_s17  ;;  %2061 = vmatpush1.bf16.msra.mxu0 %v4944_v51  ;;  %v6298_v20 = vrot.slane %v5732_v21, %v6273_v43  ;;  %v1627_v11 = vld [vmem:[%s8233_s4 + $0x10] sm:$0xff]  ;;  %v1626_v51 = vld [vmem:[%s8233_s4 + $0x8] sm:$0xff]  ;;  %v6326_v7 = vrot.slane %v5751_v26, %v6273_v43 }
 0x14e   : > { %v4958_v22 = vpack.c.bf16 %v609_v12, %v605_v23  ;;  %v1286_v25 = vpop.permute.xlu1 %1285  ;;  %v1284_v55 = vpop.permute.xlu0 %1283  ;;  %v4959_v27 = vpack.c.bf16 %v610_v33, %v606_v52 }
 0x14f   : > { %8373 = vst [vmem:[#allocation26_spill] sm:$0xff] %v6298_v20  ;;  %8374 = vst [vmem:[#allocation27_spill] sm:$0xff] %v6326_v7 }
 0x150   : > { %2160 = vmatprep.subr.bf16.mxu1 %v4959_v27  ;;  %1646 = vperm.xlu1 %5161, %v1628_v10  }
 0x151   : > { %2161 = vmatpush1.bf16.msra.mxu1 %v4958_v22  ;;  %1641 = vperm.xlu0 %5160, %v1627_v11  }
 0x152   : > { %v6306_v50 = vpop.permute.xlu1 %1293  ;;  %v6308_v1 = vpop.permute.xlu0 %1291 }
 0x153   : > { %v1311_v14 = vsel %vm1303_vm6, %v1286_v25, %v6306_v50  ;;  %v1310_v48 = vsel %vm1303_vm6, %v1284_v55, %v6308_v1 }
 0x154   : > { %v1349_v2 = vmul.f32 %v6298_v20, %v1311_v14  ;;  %v1345_v4 = vmul.f32 %v6298_v20, %v1310_v48  ;;  %1631 = vperm.xlu1 %5161, %v1625_v63  }
 0x155   : > { %1636 = vperm.xlu0 %5160, %v1626_v51  }
 0x156   : > { %v6328_v5 = vpop.permute.xlu1 %1277  ;;  %v6330_v12 = vpop.permute.xlu0 %1275  ;;  %v5005_v33 = vpack.c.bf16 %v1349_v2, %v1345_v4 }
 0x157   : > { %v1315_v23 = vsel %vm1303_vm6, %v6328_v5, %v1286_v25  ;;  %v1314_v52 = vsel %vm1303_vm6, %v6330_v12, %v1284_v55 }
 0x158   : > { %v1348_v22 = vmul.f32 %v6326_v7, %v1315_v23  ;;  %v1344_v27 = vmul.f32 %v6326_v7, %v1314_v52  ;;  %2062 = vmatprep.subr.bf16.mxu0 %v5005_v33 }
 0x15a   : > { %v549_v10 = vpop.permute.xlu1 %548  ;;  %v547_v11 = vpop.permute.xlu0 %546  ;;  %v5004_v14 = vpack.c.bf16 %v1348_v22, %v1344_v27 }
 0x15b   : > { %v564_v48 = vsel %vm562_vm4, %v549_v10, %v6106_v13  ;;  %v568_v25 = vsel %vm562_vm4, %v6090_v59, %v549_v10  ;;  %v563_v55 = vsel %vm562_vm4, %v547_v11, %v6108_v58  ;;  %v567_v63 = vsel %vm562_vm4, %v6092_v34, %v547_v11 }
 0x15c   : > { %v601_v51 = vmul.f32 %v6260_v3, %v568_v25  ;;  %v602_v2 = vmul.f32 %v6268_v49, %v564_v48  ;;  %v597_v4 = vmul.f32 %v6260_v3, %v567_v63  ;;  %v598_v13 = vmul.f32 %v6268_v49, %v563_v55  ;;  %2063 = vmatpush2.bf16.msra.mxu0 %v5004_v14 }
 0x15e   : > { %v4954_v33 = vpack.c.bf16 %v601_v51, %v597_v4  ;;  %v1282_v23 = vpop.permute.xlu1 %1281  ;;  %v1280_v59 = vpop.permute.xlu0 %1279  ;;  %v4955_v52 = vpack.c.bf16 %v602_v2, %v598_v13  ;;  %v6382_v4 = vrot.slane %v5965_v39, %v6131_v36  ;;  %v6386_v13 = vrot.slane %v5970_v40, %v6131_v36 }
 0x160   : > { %2162 = vmatprep.subr.bf16.mxu1 %v4955_v52  ;;  %8375 = vst [vmem:[#allocation28_spill] sm:$0xff] %v6382_v4  ;;  %8376 = vst [vmem:[#allocation29_spill] sm:$0xff] %v6386_v13 }
 0x161   : > { %2163 = vmatpush1.bf16.msra.mxu1 %v4954_v33 }
 0x162   : > { %v6356_v58 = vpop.permute.xlu1 %1289  ;;  %v6358_v22 = vpop.permute.xlu0 %1287 }
 0x163   : > { %v1309_v34 = vsel %vm1303_vm6, %v1282_v23, %v6356_v58  ;;  %v1308_v27 = vsel %vm1303_vm6, %v1280_v59, %v6358_v22 }
 0x164   : > { %v1341_v10 = vmul.f32 %v6298_v20, %v1309_v34  ;;  %v1337_v11 = vmul.f32 %v6298_v20, %v1308_v27  ;;  %v6389_v34 = vsub.s32 6, %v5718_v18 }
 0x166   : > { %v6368_v14 = vpop.permute.xlu1 %1273  ;;  %v6370_v48 = vpop.permute.xlu0 %1271  ;;  %v5001_v25 = vpack.c.bf16 %v1341_v10, %v1337_v11 }
 0x167   : > { %v1313_v55 = vsel %vm1303_vm6, %v6368_v14, %v1282_v23  ;;  %v1312_v63 = vsel %vm1303_vm6, %v6370_v48, %v1280_v59 }
 0x168   : > { %v1340_v51 = vmul.f32 %v6326_v7, %v1313_v55  ;;  %v1336_v2 = vmul.f32 %v6326_v7, %v1312_v63  ;;  %2064 = vmatprep.subr.bf16.mxu0 %v5001_v25 }
 0x16a   : > { %v414_v33 = vpop.permute.xlu1 %413  ;;  %v412_v52 = vpop.permute.xlu0 %411  ;;  %v5000_v23 = vpack.c.bf16 %v1340_v51, %v1336_v2 }
 0x16b   : > { %v429_v59 = vsel %vm425_vm5, %v414_v33, %v6185_v44  ;;  %v433_v27 = vsel %vm425_vm5, %v6162_v8, %v414_v33  ;;  %v428_v10 = vsel %vm425_vm5, %v412_v52, %v6187_v0  ;;  %v432_v11 = vsel %vm425_vm5, %v6164_v9, %v412_v52 }
 0x16c   : > { %v472_v25 = vmul.f32 %v6382_v4, %v433_v27  ;;  %v473_v55 = vmul.f32 %v6386_v13, %v429_v59  ;;  %v468_v63 = vmul.f32 %v6382_v4, %v432_v11  ;;  %v469_v44 = vmul.f32 %v6386_v13, %v428_v10  ;;  %2065 = vmatpush2.bf16.msra.mxu0 %v5000_v23 }
 0x16d   : > { %v6410_v0 = vrot.slane %v5732_v21, %v6389_v34  ;;  %v6426_v11 = vrot.slane %v5751_v26, %v6389_v34 }
 0x16e   : > { %v4950_v51 = vpack.c.bf16 %v472_v25, %v468_v63  ;;  %v1149_v2 = vpop.permute.xlu1 %1148  ;;  %v1147_v8 = vpop.permute.xlu0 %1146  ;;  %v4951_v33 = vpack.c.bf16 %v473_v55, %v469_v44 }
 0x16f   : > { %8377 = vst [vmem:[#allocation30_spill] sm:$0xff] %v6410_v0  ;;  %8378 = vst [vmem:[#allocation31_spill] sm:$0xff] %v6426_v11 }
 0x170   : > { %2164 = vmatprep.subr.bf16.mxu1 %v4951_v33 }
 0x171   : > { %2165 = vmatpush1.bf16.msra.mxu1 %v4950_v51 }
 0x172   : > { %v6412_v9 = vpop.permute.xlu1 %1156  ;;  %v6414_v52 = vpop.permute.xlu0 %1154 }
 0x173   : > { %v1174_v23 = vsel %vm1166_vm7, %v1149_v2, %v6412_v9  ;;  %v1173_v59 = vsel %vm1166_vm7, %v1147_v8, %v6414_v52 }
 0x174   : > { %v1212_v27 = vmul.f32 %v6410_v0, %v1174_v23  ;;  %v1208_v10 = vmul.f32 %v6410_v0, %v1173_v59 }
 0x176   : > { %v6428_v25 = vpop.permute.xlu1 %1140  ;;  %v6430_v55 = vpop.permute.xlu0 %1138  ;;  %v4997_v63 = vpack.c.bf16 %v1212_v27, %v1208_v10 }
 0x177   : > { %v1178_v44 = vsel %vm1166_vm7, %v6428_v25, %v1149_v2  ;;  %v1177_v51 = vsel %vm1166_vm7, %v6430_v55, %v1147_v8 }
 0x178   : > { %v1211_v33 = vmul.f32 %v6426_v11, %v1178_v44  ;;  %v1207_v23 = vmul.f32 %v6426_v11, %v1177_v51  ;;  %2066 = vmatprep.subr.bf16.mxu0 %v4997_v63 }
 0x17a   : > { %v410_v59 = vpop.permute.xlu1 %409  ;;  %v408_v38 = vpop.permute.xlu0 %407  ;;  %v4996_v36 = vpack.c.bf16 %v1211_v33, %v1207_v23 }
 0x17b   : > { %v427_v27 = vsel %vm425_vm5, %v410_v59, %v6248_v54  ;;  %v431_v2 = vsel %vm425_vm5, %v6230_v6, %v410_v59  ;;  %v426_v8 = vsel %vm425_vm5, %v408_v38, %v6250_v45  ;;  %v430_v10 = vsel %vm425_vm5, %v6232_v32, %v408_v38 }
 0x17c   : > { %v464_v63 = vmul.f32 %v6382_v4, %v431_v2  ;;  %v465_v44 = vmul.f32 %v6386_v13, %v427_v27  ;;  %v460_v51 = vmul.f32 %v6382_v4, %v430_v10  ;;  %v461_v54 = vmul.f32 %v6386_v13, %v426_v8  ;;  %2067 = vmatpush2.bf16.msra.mxu0 %v4996_v36 }
 0x17e   : > { %v4946_v33 = vpack.c.bf16 %v464_v63, %v460_v51  ;;  %v1145_v23 = vpop.permute.xlu1 %1144  ;;  %v4947_v6 = vpack.c.bf16 %v465_v44, %v461_v54 }
 0x17f   : > { %v1143_v59 = vpop.permute.xlu0 %1142 }
 0x180   : > { %2166 = vmatprep.subr.bf16.mxu1 %v4947_v6  ;;  %v6485_v6 = vrot.slane %v5970_v40, %v6273_v43 }
 0x181   : > { %2167 = vmatpush1.bf16.msra.mxu1 %v4946_v33  ;;  %v6481_v33 = vrot.slane %v5965_v39, %v6273_v43 }
 0x182   : > { %v6456_v45 = vpop.permute.xlu1 %1152  ;;  %8380 = vst [vmem:[#allocation33_spill] sm:$0xff] %v6485_v6 }
 0x183   : > { %v1172_v38 = vsel %vm1166_vm7, %v1145_v23, %v6456_v45  ;;  %v6461_v32 = vpop.permute.xlu0 %1150  ;;  %8379 = vst [vmem:[#allocation32_spill] sm:$0xff] %v6481_v33 }
 0x184   : > { %v1204_v27 = vmul.f32 %v6410_v0, %v1172_v38  ;;  %v1171_v36 = vsel %vm1166_vm7, %v1143_v59, %v6461_v32 }
 0x185   : > { %v1200_v2 = vmul.f32 %v6410_v0, %v1171_v36 }
 0x186   : > { %v6468_v8 = vpop.permute.xlu1 %1136 }
 0x187   : > { %v1176_v10 = vsel %vm1166_vm7, %v6468_v8, %v1145_v23  ;;  %v6473_v63 = vpop.permute.xlu0 %1134  ;;  %v4993_v44 = vpack.c.bf16 %v1204_v27, %v1200_v2 }
 0x188   : > { %v1203_v51 = vmul.f32 %v6426_v11, %v1176_v10  ;;  %v1175_v54 = vsel %vm1166_vm7, %v6473_v63, %v1143_v59  ;;  %v6495_v10 = vsub.s32 5, %v5718_v18 }
 0x189   : > { %v1199_v38 = vmul.f32 %v6426_v11, %v1175_v54  ;;  %2068 = vmatprep.subr.bf16.mxu0 %v4993_v44 }
 0x18a   : > { %v1302_v23 = vpop.permute.xlu1 %1301 }
 0x18b   : > { %v1307_v27 = vsel %vm1303_vm6, %v6306_v50, %v1302_v23  ;;  %v1319_v59 = vsel %vm1303_vm6, %v1302_v23, %v6328_v5  ;;  %v1300_v36 = vpop.permute.xlu0 %1299  ;;  %v4992_v2 = vpack.c.bf16 %v1203_v51, %v1199_v38 }
 0x18c   : > { %v1350_v43 = vmul.f32 %v6481_v33, %v1307_v27  ;;  %v1351_v37 = vmul.f32 %v6485_v6, %v1319_v59  ;;  %v1306_v44 = vsel %vm1303_vm6, %v6308_v1, %v1300_v36  ;;  %v1318_v50 = vsel %vm1303_vm6, %v1300_v36, %v6330_v12 }
 0x18d   : > { %v1346_v54 = vmul.f32 %v6481_v33, %v1306_v44  ;;  %v1347_v5 = vmul.f32 %v6485_v6, %v1318_v50  ;;  %2069 = vmatpush2.bf16.msra.mxu0 %v4992_v2  ;;  %v6510_v27 = vrot.slane %v5732_v21, %v6495_v10  ;;  %v6525_v21 = vrot.slane %v5751_v26, %v6495_v10 }
 0x18e   : > { %v1012_v51 = vpop.permute.xlu1 %1011 }
 0x18f   : > { %v5006_v18 = vpack.c.bf16 %v1350_v43, %v1346_v54  ;;  %v1010_v38 = vpop.permute.xlu0 %1009  ;;  %v5007_v23 = vpack.c.bf16 %v1351_v37, %v1347_v5  ;;  %8381 = vst [vmem:[#allocation34_spill] sm:$0xff] %v6510_v27  ;;  %8382 = vst [vmem:[#allocation35_spill] sm:$0xff] %v6525_v21 }
 0x191   : > { %2168 = vmatprep.subr.bf16.mxu1 %v5007_v23 }
 0x192   : > { %2169 = vmatpush2.bf16.msra.mxu1 %v5006_v18  ;;  %v6512_v1 = vpop.permute.xlu1 %1019 }
 0x193   : > { %v1037_v12 = vsel %vm1029_vm8, %v1012_v51, %v6512_v1  ;;  %v6517_v59 = vpop.permute.xlu0 %1017 }
 0x194   : > { %v1075_v36 = vmul.f32 %v6510_v27, %v1037_v12  ;;  %v1036_v37 = vsel %vm1029_vm8, %v1010_v38, %v6517_v59 }
 0x195   : > { %v1071_v2 = vmul.f32 %v6510_v27, %v1036_v37 }
 0x196   : > { %v6528_v43 = vpop.permute.xlu1 %1003 }
 0x197   : > { %v1041_v44 = vsel %vm1029_vm8, %v6528_v43, %v1012_v51  ;;  %v6533_v50 = vpop.permute.xlu0 %1001  ;;  %v4989_v54 = vpack.c.bf16 %v1075_v36, %v1071_v2 }
 0x198   : > { %v1074_v5 = vmul.f32 %v6525_v21, %v1041_v44  ;;  %v1040_v18 = vsel %vm1029_vm8, %v6533_v50, %v1010_v38 }
 0x199   : > { %v1070_v26 = vmul.f32 %v6525_v21, %v1040_v18  ;;  %2070 = vmatprep.subr.bf16.mxu0 %v4989_v54 }
 0x19a   : > { %v1298_v23 = vpop.permute.xlu1 %1297 }
 0x19b   : > { %v1305_v12 = vsel %vm1303_vm6, %v6356_v58, %v1298_v23  ;;  %v1317_v51 = vsel %vm1303_vm6, %v1298_v23, %v6368_v14  ;;  %v1296_v37 = vpop.permute.xlu0 %1295  ;;  %v4988_v36 = vpack.c.bf16 %v1074_v5, %v1070_v26 }
 0x19c   : > { %v1342_v2 = vmul.f32 %v6481_v33, %v1305_v12  ;;  %v1343_v44 = vmul.f32 %v6485_v6, %v1317_v51  ;;  %v1304_v38 = vsel %vm1303_vm6, %v6358_v22, %v1296_v37  ;;  %v1316_v54 = vsel %vm1303_vm6, %v1296_v37, %v6370_v48 }
 0x19d   : > { %v1338_v58 = vmul.f32 %v6481_v33, %v1304_v38  ;;  %v1339_v18 = vmul.f32 %v6485_v6, %v1316_v54  ;;  %2071 = vmatpush2.bf16.msra.mxu0 %v4988_v36 }
 0x19e   : > { %v1008_v14 = vpop.permute.xlu1 %1007 }
 0x19f   : > { %v5002_v23 = vpack.c.bf16 %v1342_v2, %v1338_v58  ;;  %v1006_v5 = vpop.permute.xlu0 %1005  ;;  %v5003_v26 = vpack.c.bf16 %v1343_v44, %v1339_v18 }
 0x1a1   : > { %2170 = vmatprep.subr.bf16.mxu1 %v5003_v26  ;;  %v6585_v26 = vrot.slane %v5970_v40, %v6389_v34 }
 0x1a2   : > { %2171 = vmatpush2.bf16.msra.mxu1 %v5002_v23  ;;  %v6556_v12 = vpop.permute.xlu1 %1015  ;;  %v6581_v23 = vrot.slane %v5965_v39, %v6389_v34 }
 0x1a3   : > { %v1035_v22 = vsel %vm1029_vm8, %v1008_v14, %v6556_v12  ;;  %v6561_v51 = vpop.permute.xlu0 %1013  ;;  %8384 = vst [vmem:[#allocation37_spill] sm:$0xff] %v6585_v26 }
 0x1a4   : > { %v1067_v48 = vmul.f32 %v6510_v27, %v1035_v22  ;;  %v1034_v37 = vsel %vm1029_vm8, %v1006_v5, %v6561_v51  ;;  %8383 = vst [vmem:[#allocation36_spill] sm:$0xff] %v6581_v23 }
 0x1a5   : > { %v1063_v36 = vmul.f32 %v6510_v27, %v1034_v37  ;;  %v5211_v37 = vld [vmem:[%s5545_s20 + $0x68] sm:$0xff] }
 0x1a6   : > { %v6568_v2 = vpop.permute.xlu1 %999 }
 0x1a7   : > { %v1039_v44 = vsel %vm1029_vm8, %v6568_v2, %v1008_v14  ;;  %v6573_v38 = vpop.permute.xlu0 %997  ;;  %v4985_v54 = vpack.c.bf16 %v1067_v48, %v1063_v36  ;;  %v5210_v48 = vld [vmem:[%s5545_s20 + $0x48] sm:$0xff] }
 0x1a8   : > { %v1066_v58 = vmul.f32 %v6525_v21, %v1039_v44  ;;  %v1038_v18 = vsel %vm1029_vm8, %v6573_v38, %v1006_v5  ;;  %v4981_v36 = vpack.c.bf16 %v5211_v37, %v5210_v48 }
 0x1a9   : > { %v1062_v22 = vmul.f32 %v6525_v21, %v1038_v18  ;;  %2072 = vmatprep.subr.bf16.mxu0 %v4985_v54 }
 0x1aa   : > { %v1165_v14 = vpop.permute.xlu1 %1164 }
 0x1ab   : > { %v1170_v5 = vsel %vm1166_vm7, %v6412_v9, %v1165_v14  ;;  %v1182_v44 = vsel %vm1166_vm7, %v1165_v14, %v6428_v25  ;;  %v1163_v27 = vpop.permute.xlu0 %1162  ;;  %v4984_v34 = vpack.c.bf16 %v1066_v58, %v1062_v22  ;;  %v5212_v14 = vld [vmem:[%s5545_s20 + $0x40] sm:$0xff] }
 0x1ac   : > { %v1213_v54 = vmul.f32 %v6581_v23, %v1170_v5  ;;  %v1214_v18 = vmul.f32 %v6585_v26, %v1182_v44  ;;  %v1169_v48 = vsel %vm1166_vm7, %v6414_v52, %v1163_v27  ;;  %v1181_v9 = vsel %vm1166_vm7, %v1163_v27, %v6430_v55  ;;  %v5213_v58 = vld [vmem:[%s5545_s20 + $0x60] sm:$0xff]  ;;  %v5214_v44 = vld [vmem:[%s5545_s20 + $0x28] sm:$0xff] }
 0x1ad   : > { %v1209_v37 = vmul.f32 %v6581_v23, %v1169_v48  ;;  %v1210_v25 = vmul.f32 %v6585_v26, %v1181_v9  ;;  %2073 = vmatpush2.bf16.msra.mxu0 %v4984_v34  ;;  %v4980_v22 = vpack.c.bf16 %v5213_v58, %v5212_v14  ;;  %v6610_v5 = vrot.slane %v5965_v39, %v6495_v10  ;;  %v5215_v55 = vld [vmem:[%s5545_s20 + $0x8] sm:$0xff] }
 0x1ae   : > { %v1161_v21 = vpop.permute.xlu1 %1160  ;;  %2074 = vmatprep.subr.bf16.mxu0 %v4981_v36  ;;  %v6614_v52 = vrot.slane %v5970_v40, %v6495_v10  ;;  %v4977_v27 = vpack.c.bf16 %v5214_v44, %v5215_v55 }
 0x1af   : > { %8385 = vst [vmem:[#allocation38_spill] sm:$0xff] %v6610_v5  ;;  %v4998_v48 = vpack.c.bf16 %v1213_v54, %v1209_v37  ;;  %v1168_v34 = vsel %vm1166_vm7, %v6456_v45, %v1161_v21  ;;  %v1180_v36 = vsel %vm1166_vm7, %v1161_v21, %v6468_v8  ;;  %v1159_v39 = vpop.permute.xlu0 %1158  ;;  %v4999_v9 = vpack.c.bf16 %v1214_v18, %v1210_v25  ;;  %v5216_v8 = vld [vmem:[%s5545_s20 + $0x20] sm:$0xff] }
 0x1b0   : > { %8386 = vst [vmem:[#allocation39_spill] sm:$0xff] %v6614_v52  ;;  %v1205_v14 = vmul.f32 %v6581_v23, %v1168_v34  ;;  %v1206_v40 = vmul.f32 %v6585_v26, %v1180_v36  ;;  %v1167_v10 = vsel %vm1166_vm7, %v6461_v32, %v1159_v39  ;;  %v1179_v54 = vsel %vm1166_vm7, %v1159_v39, %v6473_v63  ;;  %v5217_v21 = vld [vmem:[%s5545_s20] sm:$0xff]  ;;  %v6660_v39 = vld [vmem:[%s8232_s3 + $0x1c] ss:$12 sps:$4 sm:$0xff]  }
 0x1b1   : > { %v1201_v45 = vmul.f32 %v6581_v23, %v1167_v10  ;;  %v1202_v37 = vmul.f32 %v6585_v26, %v1179_v54  ;;  %2075 = vmatpush2.bf16.msra.mxu0 %v4980_v22  ;;  %2172 = vmatprep.subr.bf16.mxu1 %v4999_v9  ;;  %v4976_v18 = vpack.c.bf16 %v5216_v8, %v5217_v21  ;;  %v4538_v21 = vld [vmem:[%s8230_s1 + $0x30] ss:$0 sm:$0xff] }
 0x1b2   : > { %2173 = vmatpush2.bf16.msra.mxu1 %v4998_v48  ;;  %v1028_v25 = vpop.permute.xlu1 %1027  ;;  %2076 = vmatprep.subr.bf16.mxu0 %v4977_v27 }
 0x1b3   : > { %v4994_v58 = vpack.c.bf16 %v1205_v14, %v1201_v45  ;;  %v1033_v32 = vsel %vm1029_vm8, %v6512_v1, %v1028_v25  ;;  %v1045_v63 = vsel %vm1029_vm8, %v1028_v25, %v6528_v43  ;;  %v1026_v44 = vpop.permute.xlu0 %1025  ;;  %v4995_v55 = vpack.c.bf16 %v1206_v40, %v1202_v37  ;;  %v6653_v1 = vld [vmem:[%s8232_s3] ss:$12 sps:$4 sm:$0xff]   ;;  %v5219_v25 = vld [vmem:[%s5545_s20 + $0x58] sm:$0xff] }
 0x1b4   : > { %v1076_v22 = vmul.f32 %v6610_v5, %v1033_v32  ;;  %v1077_v34 = vmul.f32 %v6614_v52, %v1045_v63  ;;  %v1032_v48 = vsel %vm1029_vm8, %v6517_v59, %v1026_v44  ;;  %v1044_v27 = vsel %vm1029_vm8, %v1026_v44, %v6533_v50 }
 0x1b5   : > { %v1072_v43 = vmul.f32 %v6610_v5, %v1032_v48  ;;  %v1073_v36 = vmul.f32 %v6614_v52, %v1044_v27  ;;  %2077 = vmatpush2.bf16.msra.mxu0 %v4976_v18  ;;  %2174 = vmatprep.subr.bf16.mxu1 %v4995_v55  ;;  %v4539_v18 = vld [vmem:[%s8230_s1 + $0x38] ss:$0 sm:$0xff] }
 0x1b6   : > { %2175 = vmatpush2.bf16.msra.mxu1 %v4994_v58  ;;  %v1024_v59 = vpop.permute.xlu1 %1023 }
 0x1b7   : > { %v4990_v9 = vpack.c.bf16 %v1076_v22, %v1072_v43  ;;  %v1031_v50 = vsel %vm1029_vm8, %v6556_v12, %v1024_v59  ;;  %v1043_v14 = vsel %vm1029_vm8, %v1024_v59, %v6568_v2  ;;  %v1022_v40 = vpop.permute.xlu0 %1021  ;;  %v4991_v10 = vpack.c.bf16 %v1077_v34, %v1073_v36 }
 0x1b8   : > { %v1068_v54 = vmul.f32 %v6610_v5, %v1031_v50  ;;  %v1069_v45 = vmul.f32 %v6614_v52, %v1043_v14  ;;  %v1030_v37 = vsel %vm1029_vm8, %v6561_v51, %v1022_v40  ;;  %v1042_v12 = vsel %vm1029_vm8, %v1022_v40, %v6573_v38  ;;  %2079 = vmatmul.mubr.bf16.vlgmr.msra.gmra.mxu0 %v6653_v1  ;;  %v5218_v38 = vld [vmem:[%s5545_s20 + $0x78] sm:$0xff]  ;;  %v5221_v50 = vld [vmem:[%s5545_s20 + $0x50] sm:$0xff] }
 0x1b9   : > { %v1064_v2 = vmul.f32 %v6610_v5, %v1030_v37  ;;  %v1065_v8 = vmul.f32 %v6614_v52, %v1042_v12  ;;  %2176 = vmatprep.subr.bf16.mxu1 %v4991_v10  ;;  %2088 = vmatprep.mubr.bf16.mxu0 %v6660_v39  ;;  %v4983_v58 = vpack.c.bf16 %v5218_v38, %v5219_v25  ;;  %v5222_v40 = vld [vmem:[%s5545_s20 + $0x38] sm:$0xff] }
 0x1ba   : > { %2177 = vmatpush2.bf16.msra.mxu1 %v4990_v9  ;;  %v1439_v51 = vpop.permute.xlu1 %1438  ;;  %v5220_v9 = vld [vmem:[%s5545_s20 + $0x70] sm:$0xff]  ;;  %v5223_v10 = vld [vmem:[%s5545_s20 + $0x18] sm:$0xff] }
 0x1bb   : > { %v4986_v32 = vpack.c.bf16 %v1068_v54, %v1064_v2  ;;  %v1444_v63 = vsel %vm1440_vm1, %v5828_v60, %v1439_v51  ;;  %v1456_v44 = vsel %vm1440_vm1, %v1439_v51, %v5845_v28  ;;  %v1437_v55 = vpop.permute.xlu0 %1436  ;;  %v4987_v22 = vpack.c.bf16 %v1069_v45, %v1065_v8  ;;  %v5168_v60 = vld [vmem:[%s8232_s3 + $0x18] ss:$12 sps:$4 sm:$0xff]  }
 0x1bc   : > { %v1487_v34 = vmul.f32 %v4538_v21, %v1444_v63  ;;  %v1488_v48 = vmul.f32 %v4539_v18, %v1456_v44  ;;  %v1443_v27 = vsel %vm1440_vm1, %v5830_v61, %v1437_v55  ;;  %v1455_v43 = vsel %vm1440_vm1, %v1437_v55, %v5847_v29 }
 0x1bd   : > { %v1483_v36 = vmul.f32 %v4538_v21, %v1443_v27  ;;  %v1484_v28 = vmul.f32 %v4539_v18, %v1455_v43  ;;  %2178 = vmatprep.subr.bf16.mxu1 %v4987_v22  ;;  %v4982_v14 = vpack.c.bf16 %v5220_v9, %v5221_v50  ;;  %v4979_v54 = vpack.c.bf16 %v5222_v40, %v5223_v10 }
 0x1be   : > { %2179 = vmatpush2.bf16.msra.mxu1 %v4986_v32  ;;  %v1435_v59 = vpop.permute.xlu1 %1434  ;;  %v8387_v32 = vmov 0  }
 0x1bf   : > { %v5014_v61 = vpack.c.bf16 %v1487_v34, %v1483_v36  ;;  %v1442_v29 = vsel %vm1440_vm1, %v5911_v31, %v1435_v59  ;;  %v1454_v45 = vsel %vm1440_vm1, %v1435_v59, %v5925_v41  ;;  %v1433_v37 = vpop.permute.xlu0 %1432  ;;  %2180 = vmatprep.subr.bf16.mxu1 %v4983_v58  ;;  %v5015_v12 = vpack.c.bf16 %v1488_v48, %v1484_v28  ;;  %v5224_v41 = vld [vmem:[%s5545_s20 + $0x30] sm:$0xff] }
 0x1c0   : > { %v1479_v2 = vmul.f32 %v4538_v21, %v1442_v29  ;;  %v1480_v8 = vmul.f32 %v4539_v18, %v1454_v45  ;;  %v1441_v51 = vsel %vm1440_vm1, %v5913_v35, %v1433_v37  ;;  %v1453_v38 = vsel %vm1440_vm1, %v1433_v37, %v5927_v47  ;;  %2089 = vmatmul.mubr.bf16.gmra.mxu0 %v5168_v60  ;;  %v5225_v58 = vld [vmem:[%s5545_s20 + $0x10] sm:$0xff] }
 0x1c1   : > { %v1475_v31 = vmul.f32 %v4538_v21, %v1441_v51  ;;  %v1476_v25 = vmul.f32 %v4539_v18, %v1453_v38  ;;  %2217 = vmatprep.subr.bf16.mxu0 %v5015_v12  ;;  %2237 = vmatprep.mubr.bf16.mxu0 %v8387_v32  ;;  %v4978_v63 = vpack.c.bf16 %v5224_v41, %v5225_v58  ;;  %v5226_v35 = vld [vmem:[%s8232_s3 + $0x8] ss:$12 sps:$4 sm:$0xff]  }
 0x1c2   : > { %2181 = vmatpush2.bf16.msra.mxu1 %v4982_v14  ;;  %2218 = vmatpush1.bf16.msra.mxu0 %v5014_v61 }
 0x1c3   : > { %v5010_v44 = vpack.c.bf16 %v1479_v2, %v1475_v31  ;;  %2182 = vmatprep.subr.bf16.mxu1 %v4979_v54  ;;  %v5011_v55 = vpack.c.bf16 %v1480_v8, %v1476_v25 }
 0x1c5   : > { %2219 = vmatprep.subr.bf16.mxu0 %v5011_v55  ;;  %v2133_v21 = vpop.f32.mrf.mxu1 }
 0x1c6   : > { %2183 = vmatpush2.bf16.msra.mxu1 %v4978_v63  ;;  %2220 = vmatpush1.bf16.msra.mxu0 %v5010_v44 }
 0x1c7   : > { %v2135_v48 = vpop.f32.mrf.mxu1 }
 0x1c9   : > { %2185 = vmatmul.mubr.bf16.vlgmr.msra.gmra.mxu1 %v6653_v1  ;;  %4628 = vmatmul.mubr.msk.bf16.vlgmr.msra.gmra.mxu0 %vm2039_vm3, %v5226_v35  ;;  %v2137_v28 = vpop.f32.mrf.mxu1 }
 0x1ca   : > { %2194 = vmatprep.mubr.bf16.mxu1 %v6660_v39  ;;  %2247 = vmatprep.mubr.bf16.mxu0 %v8387_v32 }
 0x1cb   : > { %v6732_v47 = vpop.permute.xlu1 %1646  ;;  %v2139_v54 = vpop.f32.mrf.mxu1 }
 0x1cc   : > { %v6734_v1 = vpop.permute.xlu0 %1641 }
 0x1cf   : > { %v6736_v18 = vpop.permute.xlu1 %1631 }
 0x1d0   : > { %v6739_v43 = vpop.permute.xlu0 %1636 }
 0x1d1   : > { %2195 = vmatmul.mubr.bf16.gmra.mxu1 %v5168_v60  ;;  %4629 = vmatmul.mubr.msk.bf16.gmra.mxu0 %vm2039_vm3, %v6224_v17 }
 0x1d2   : > { %3875 = vmatprep.mubr.bf16.mxu0 %v8387_v32 }
 0x1fe   : > { %v2143_v12 = vpop.f32.mrf.mxu1 }
 0x200   : > { %v2145_v51 = vpop.f32.mrf.mxu1 }
 0x202   : > { %v2147_v41 = vpop.f32.mrf.mxu1 }
 0x278   : > { %v2080_v22 = vpop.f32.mrf.mxu0 }
 0x279   : > { %v2081_v34 = vadd.f32 %v2080_v22, %v6736_v18 }
 0x27a   : > { %v2082_v39 = vpop.f32.mrf.mxu0 }
 0x27b   : > { %v2134_v27 = vadd.f32 %v2133_v21, %v2081_v34  ;;  %v2083_v50 = vadd.f32 %v2082_v39, %v6736_v18  ;;  %v2149_v34 = vpop.f32.mrf.mxu1 }
 0x27c   : > { %v2084_v60 = vpop.f32.mrf.mxu0 }
 0x27d   : > { %v6741_v36 = vmax.f32 %v2134_v27, 0.0  ;;  %v2085_v17 = vadd.f32 %v2084_v60, %v6739_v43  ;;  %v2136_v40 = vadd.f32 %v2135_v48, %v2083_v50 }
 0x27e   : > { %v2086_v14 = vpop.f32.mrf.mxu0 }
 0x27f   : > { %8388 = vst [vmem:[#allocation40_spill] sm:$0xff] %v6741_v36  ;;  %v2138_v59 = vadd.f32 %v2137_v28, %v2085_v17  ;;  %2634 = vrot.lane.b32.xlu1 %v6741_v36, %s5361_s15  ;;  %v2087_v10 = vadd.f32 %v2086_v14, %v6739_v43  ;;  %v6766_v61 = vmax.f32 %v2136_v40, 0.0 }
 0x280   : > { %v2090_v37 = vpop.f32.mrf.mxu0 }
 0x281   : > { %v6746_v9 = vmax.f32 %v2138_v59, 0.0  ;;  %8390 = vst [vmem:[#allocation42_spill] sm:$0xff] %v6766_v61  ;;  %v2140_v29 = vadd.f32 %v2139_v54, %v2087_v10  ;;  %v2091_v8 = vadd.f32 %v2090_v37, %v6734_v1 }
 0x282   : > { %v2092_v2 = vpop.f32.mrf.mxu0 }
 0x283   : > { %8389 = vst [vmem:[#allocation41_spill] sm:$0xff] %v6746_v9  ;;  %2636 = vrot.lane.b32.xlu0 %v6746_v9, %s5361_s15  ;;  %3170 = vrot.lane.b32.xlu1 %v6741_v36, %s5362_s17  ;;  %v6772_v45 = vmax.f32 %v2140_v29, 0.0  ;;  %v2144_v31 = vadd.f32 %v2143_v12, %v2091_v8  ;;  %v2093_v55 = vadd.f32 %v2092_v2, %v6734_v1 }
 0x284   : > { %v2094_v38 = vpop.f32.mrf.mxu0 }
 0x285   : > { %8391 = vst [vmem:[#allocation43_spill] sm:$0xff] %v6772_v45  ;;  %v2095_v25 = vadd.f32 %v2094_v38, %v6732_v47  ;;  %v6792_v58 = vmax.f32 %v2144_v31, 0.0  ;;  %v2146_v21 = vadd.f32 %v2145_v51, %v2093_v55 }
 0x286   : > { %v2096_v35 = vpop.f32.mrf.mxu0 }
 0x287   : > { %3172 = vrot.lane.b32.xlu0 %v6746_v9, %s5362_s17  ;;  %2514 = vrot.lane.b32.xlu1 %v6741_v36, %s5363_s27  ;;  %8392 = vst [vmem:[#allocation44_spill] sm:$0xff] %v6792_v58  ;;  %v2148_v63 = vadd.f32 %v2147_v41, %v2095_v25  ;;  %v2097_v22 = vadd.f32 %v2096_v35, %v6732_v47  ;;  %v6822_v48 = vmax.f32 %v2146_v21, 0.0 }
 0x289   : > { %v6798_v44 = vmax.f32 %v2148_v63, 0.0  ;;  %8394 = vst [vmem:[#allocation46_spill] sm:$0xff] %v6822_v48  ;;  %v2150_v39 = vadd.f32 %v2149_v34, %v2097_v22  ;;  %v2186_v60 = vpop.f32.mrf.mxu1  ;;  %v2239_v28 = vpop.f32.mrf.mxu0 }
 0x28a   : > { %v2187_v59 = vadd.f32 %v2186_v60, %v6736_v18 }
 0x28b   : > { %2516 = vrot.lane.b32.xlu0 %v6746_v9, %s5363_s27  ;;  %2394 = vrot.lane.b32.xlu1 %v6741_v36, %s5365_s22  ;;  %8393 = vst [vmem:[#allocation45_spill] sm:$0xff] %v6798_v44  ;;  %v6828_v27 = vmax.f32 %v2150_v39, 0.0  ;;  %v2188_v17 = vpop.f32.mrf.mxu1  ;;  %v2241_v14 = vpop.f32.mrf.mxu0 }
 0x28c   : > { %v2240_v40 = vadd.f32 %v2239_v28, %v2187_v59  ;;  %v2189_v12 = vadd.f32 %v2188_v17, %v6736_v18 }
 0x28d   : > { %8395 = vst [vmem:[#allocation47_spill] sm:$0xff] %v6828_v27  ;;  %v2190_v50 = vpop.f32.mrf.mxu1  ;;  %v2243_v54 = vpop.f32.mrf.mxu0 }
 0x28e   : > { %v2191_v10 = vadd.f32 %v2190_v50, %v6739_v43  ;;  %v6852_v29 = vmax.f32 %v2240_v40, 0.0  ;;  %v2242_v51 = vadd.f32 %v2241_v14, %v2189_v12 }
 0x28f   : > { %2396 = vrot.lane.b32.xlu0 %v6746_v9, %s5365_s22  ;;  %2274 = vrot.lane.b32.xlu1 %v6741_v36, %s5366_s23  ;;  %v2192_v8 = vpop.f32.mrf.mxu1  ;;  %v2245_v31 = vpop.f32.mrf.mxu0 }
 0x290   : > { %8396 = vst [vmem:[#allocation48_spill] sm:$0xff] %v6852_v29  ;;  %v2244_v37 = vadd.f32 %v2243_v54, %v2191_v10  ;;  %v2193_v38 = vadd.f32 %v2192_v8, %v6739_v43  ;;  %v6870_v18 = vmax.f32 %v2242_v51, 0.0 }
 0x291   : > { %v2196_v41 = vpop.f32.mrf.mxu1  ;;  %v2249_v55 = vpop.f32.mrf.mxu0 }
 0x292   : > { %v6859_v2 = vmax.f32 %v2244_v37, 0.0  ;;  %8398 = vst [vmem:[#allocation50_spill] sm:$0xff] %v6870_v18  ;;  %v2246_v25 = vadd.f32 %v2245_v31, %v2193_v38  ;;  %v2197_v35 = vadd.f32 %v2196_v41, %v6734_v1 }
 0x293   : > { %2276 = vrot.lane.b32.xlu0 %v6746_v9, %s5366_s23  ;;  %2642 = vrot.lane.b32.xlu1 %v6766_v61, %s5361_s15  ;;  %v2198_v43 = vpop.f32.mrf.mxu1  ;;  %v2251_v22 = vpop.f32.mrf.mxu0 }
 0x294   : > { %8397 = vst [vmem:[#allocation49_spill] sm:$0xff] %v6859_v2  ;;  %v6876_v63 = vmax.f32 %v2246_v25, 0.0  ;;  %v2250_v34 = vadd.f32 %v2249_v55, %v2197_v35  ;;  %v2199_v37 = vadd.f32 %v2198_v43, %v6734_v1 }
 0x295   : > { %v2200_v21 = vpop.f32.mrf.mxu1  ;;  %v2253_v60 = vpop.f32.mrf.mxu0 }
 0x296   : > { %v2201_v39 = vadd.f32 %v2200_v21, %v6732_v47  ;;  %v6892_v17 = vmax.f32 %v2250_v34, 0.0  ;;  %v2252_v38 = vadd.f32 %v2251_v22, %v2199_v37 }
 0x297   : > { %2644 = vrot.lane.b32.xlu0 %v6772_v45, %s5361_s15  ;;  %3178 = vrot.lane.b32.xlu1 %v6766_v61, %s5362_s17  ;;  %v2202_v51 = vpop.f32.mrf.mxu1  ;;  %v2255_v55 = vpop.f32.mrf.mxu0 }
 0x298   : > { %8399 = vst [vmem:[#allocation51_spill] sm:$0xff] %v6892_v17  ;;  %v2254_v28 = vadd.f32 %v2253_v60, %v2201_v39  ;;  %v2203_v31 = vadd.f32 %v2202_v51, %v6732_v47  ;;  %v6936_v1 = vmax.f32 %v2252_v38, 0.0 }
 0x29a   : > { %v6900_v50 = vmax.f32 %v2254_v28, 0.0  ;;  %8404 = vst [vmem:[#allocation56_spill] sm:$0xff] %v6936_v1  ;;  %v2256_v43 = vadd.f32 %v2255_v55, %v2203_v31 }
 0x29b   : > { %3180 = vrot.lane.b32.xlu0 %v6772_v45, %s5362_s17  ;;  %2522 = vrot.lane.b32.xlu1 %v6766_v61, %s5363_s27  ;;  %v8501_v19 = vld [vmem:[#allocation49_spill] sm:$0xff] }
 0x29c   : > { %8400 = vst [vmem:[#allocation52_spill] sm:$0xff] %v6900_v50  ;;  %v6946_v47 = vmax.f32 %v2256_v43, 0.0 }
 0x29e   : > { %8406 = vst [vmem:[#allocation58_spill] sm:$0xff] %v6946_v47 }
 0x29f   : > { %2524 = vrot.lane.b32.xlu0 %v6772_v45, %s5363_s27  ;;  %2402 = vrot.lane.b32.xlu1 %v6766_v61, %s5365_s22 }
 0x2a3   : > { %2404 = vrot.lane.b32.xlu0 %v6772_v45, %s5365_s22  ;;  %2282 = vrot.lane.b32.xlu1 %v6766_v61, %s5366_s23 }
 0x2a7   : > { %2284 = vrot.lane.b32.xlu0 %v6772_v45, %s5366_s23  ;;  %2638 = vrot.lane.b32.xlu1 %v6792_v58, %s5361_s15 }
 0x2ab   : > { %2640 = vrot.lane.b32.xlu0 %v6798_v44, %s5361_s15  ;;  %3174 = vrot.lane.b32.xlu1 %v6792_v58, %s5362_s17 }
 0x2af   : > { %3176 = vrot.lane.b32.xlu0 %v6798_v44, %s5362_s17  ;;  %2518 = vrot.lane.b32.xlu1 %v6792_v58, %s5363_s27 }
 0x2b3   : > { %2520 = vrot.lane.b32.xlu0 %v6798_v44, %s5363_s27  ;;  %2398 = vrot.lane.b32.xlu1 %v6792_v58, %s5365_s22 }
 0x2b7   : > { %2400 = vrot.lane.b32.xlu0 %v6798_v44, %s5365_s22  ;;  %2278 = vrot.lane.b32.xlu1 %v6792_v58, %s5366_s23 }
 0x2bb   : > { %2280 = vrot.lane.b32.xlu0 %v6798_v44, %s5366_s23  ;;  %3054 = vrot.lane.b32.xlu1 %v6792_v58, %s5367_s26 }
 0x2bf   : > { %3056 = vrot.lane.b32.xlu0 %v6798_v44, %s5367_s26  ;;  %2646 = vrot.lane.b32.xlu1 %v6822_v48, %s5361_s15 }
 0x2c3   : > { %2648 = vrot.lane.b32.xlu0 %v6828_v27, %s5361_s15  ;;  %3182 = vrot.lane.b32.xlu1 %v6822_v48, %s5362_s17 }
 0x2c7   : > { %3184 = vrot.lane.b32.xlu0 %v6828_v27, %s5362_s17  ;;  %2526 = vrot.lane.b32.xlu1 %v6822_v48, %s5363_s27 }
 0x2cb   : > { %2528 = vrot.lane.b32.xlu0 %v6828_v27, %s5363_s27  ;;  %2406 = vrot.lane.b32.xlu1 %v6822_v48, %s5365_s22 }
 0x2cf   : > { %2408 = vrot.lane.b32.xlu0 %v6828_v27, %s5365_s22  ;;  %2286 = vrot.lane.b32.xlu1 %v6822_v48, %s5366_s23 }
 0x2d3   : > { %2288 = vrot.lane.b32.xlu0 %v6828_v27, %s5366_s23  ;;  %3062 = vrot.lane.b32.xlu1 %v6822_v48, %s5367_s26 }
 0x2d7   : > { %3064 = vrot.lane.b32.xlu0 %v6828_v27, %s5367_s26  ;;  %3186 = vrot.lane.b32.xlu1 %v6852_v29, %s5362_s17 }
 0x2db   : > { %3188 = vrot.lane.b32.xlu0 %v6859_v2, %s5362_s17  ;;  %2650 = vrot.lane.b32.xlu1 %v6852_v29, %s5361_s15 }
 0x2df   : > { %2652 = vrot.lane.b32.xlu0 %v6859_v2, %s5361_s15  ;;  %2530 = vrot.lane.b32.xlu1 %v6852_v29, %s5363_s27 }
 0x2e3   : > { %2532 = vrot.lane.b32.xlu0 %v6859_v2, %s5363_s27  ;;  %2658 = vrot.lane.b32.xlu1 %v6870_v18, %s5361_s15 }
 0x2e7   : > { %2660 = vrot.lane.b32.xlu0 %v6876_v63, %s5361_s15  ;;  %2538 = vrot.lane.b32.xlu1 %v6870_v18, %s5363_s27 }
 0x2eb   : > { %2540 = vrot.lane.b32.xlu0 %v6876_v63, %s5363_s27  ;;  %2418 = vrot.lane.b32.xlu1 %v6870_v18, %s5365_s22 }
 0x2ef   : > { %2420 = vrot.lane.b32.xlu0 %v6876_v63, %s5365_s22  ;;  %2298 = vrot.lane.b32.xlu1 %v6870_v18, %s5366_s23 }
 0x2f1   : > { %v6894_v59 = vpop.permute.xlu1 %2634 }
 0x2f3   : > { %2300 = vrot.lane.b32.xlu0 %v6876_v63, %s5366_s23  ;;  %3190 = vrot.lane.b32.xlu1 %v6892_v17, %s5362_s17 }
 0x2f5   : > { %v6902_v14 = vpop.permute.xlu0 %2636  ;;  %v6904_v40 = vpop.permute.xlu1 %3170 }
 0x2f6   : > { %8401 = vst [vmem:[#allocation53_spill] sm:$0xff] %v6904_v40 }
 0x2f7   : > { %3192 = vrot.lane.b32.xlu0 %v6900_v50, %s5362_s17  ;;  %2654 = vrot.lane.b32.xlu1 %v6892_v17, %s5361_s15 }
 0x2f9   : > { %v6910_v10 = vpop.permute.xlu0 %3172  ;;  %v6912_v54 = vpop.permute.xlu1 %2514 }
 0x2fa   : > { %8402 = vst [vmem:[#allocation54_spill] sm:$0xff] %v6910_v10 }
 0x2fb   : > { %2656 = vrot.lane.b32.xlu0 %v6900_v50, %s5361_s15  ;;  %2534 = vrot.lane.b32.xlu1 %v6892_v17, %s5363_s27 }
 0x2fd   : > { %v6919_v12 = vpop.permute.xlu0 %2516  ;;  %v6921_v8 = vpop.permute.xlu1 %2394 }
 0x2ff   : > { %2536 = vrot.lane.b32.xlu0 %v6900_v50, %s5363_s27  ;;  %2414 = vrot.lane.b32.xlu1 %v6892_v17, %s5365_s22 }
 0x301   : > { %v6928_v25 = vpop.permute.xlu0 %2396  ;;  %v6930_v41 = vpop.permute.xlu1 %2274 }
 0x302   : > { %8403 = vst [vmem:[#allocation55_spill] sm:$0xff] %v6930_v41 }
 0x303   : > { %2416 = vrot.lane.b32.xlu0 %v6900_v50, %s5365_s22  ;;  %3070 = vrot.lane.b32.xlu1 %v6892_v17, %s5367_s26 }
 0x305   : > { %v6938_v35 = vpop.permute.xlu0 %2276  ;;  %v6940_v21 = vpop.permute.xlu1 %2642 }
 0x306   : > { %8405 = vst [vmem:[#allocation57_spill] sm:$0xff] %v6938_v35 }
 0x307   : > { %3072 = vrot.lane.b32.xlu0 %v6900_v50, %s5367_s26  ;;  %2662 = vrot.lane.b32.xlu1 %v6936_v1, %s5361_s15 }
 0x309   : > { %v6948_v22 = vpop.permute.xlu0 %2644  ;;  %v6950_v34 = vpop.permute.xlu1 %3178 }
 0x30b   : > { %2664 = vrot.lane.b32.xlu0 %v6946_v47, %s5361_s15  ;;  %2542 = vrot.lane.b32.xlu1 %v6936_v1, %s5363_s27  ;;  %s8137_s15 = scalar_lea.vmem [#allocation8], %s4469_s5  ;;  %s4943_s5 = sshll.u32 %s5444_s13, 11 }
 0x30d   : > { %v6956_v39 = vpop.permute.xlu0 %3180  ;;  %v6958_v60 = vpop.permute.xlu1 %2522 }
 0x30f   : > { %2544 = vrot.lane.b32.xlu0 %v6946_v47, %s5363_s27  ;;  %2422 = vrot.lane.b32.xlu1 %v6936_v1, %s5365_s22  ;;  %s4378_s27 = sshll.u32 %s8137_s15, 4  ;;  %s8178_s27 = int_to_ptr.vmem [resolvable:$true] %s4378_s27 }
 0x311   : > { %v6964_v28 = vpop.permute.xlu0 %2524  ;;  %v6966_v37 = vpop.permute.xlu1 %2402 }
 0x313   : > { %2424 = vrot.lane.b32.xlu0 %v6946_v47, %s5365_s22  ;;  %2302 = vrot.lane.b32.xlu1 %v6936_v1, %s5366_s23 }
 0x315   : > { %v6972_v51 = vpop.permute.xlu0 %2404  ;;  %v6974_v38 = vpop.permute.xlu1 %2282 }
 0x316   : > { %8407 = vst [vmem:[#allocation59_spill] sm:$0xff] %v6974_v38 }
 0x317   : > { %2304 = vrot.lane.b32.xlu0 %v6946_v47, %s5366_s23  ;;  %2410 = vrot.lane.b32.xlu1 %v6852_v29, %s5365_s22 }
 0x319   : > { %v6980_v31 = vpop.permute.xlu0 %2284  ;;  %v6982_v55 = vpop.permute.xlu1 %2638 }
 0x31a   : > { %8408 = vst [vmem:[#allocation60_spill] sm:$0xff] %v6980_v31 }
 0x31b   : > { %2412 = vrot.lane.b32.xlu0 %v6859_v2, %s5365_s22  ;;  %3058 = vrot.lane.b32.xlu1 %v6766_v61, %s5367_s26  ;;  %s8176_s22 = scalar_lea.hbm %s8238_s9, %s4943_s5 }
 0x31d   : > { %v6988_v43 = vpop.permute.xlu0 %2640  ;;  %v6990_v52 = vpop.permute.xlu1 %3174 }
 0x31e   : > { %8409 = vst [vmem:[#allocation61_spill] sm:$0xff] %v6990_v52 }
 0x31f   : > { %3060 = vrot.lane.b32.xlu0 %v6772_v45, %s5367_s26  ;;  %3066 = vrot.lane.b32.xlu1 %v6852_v29, %s5367_s26 }
 0x321   : > { %v6996_v5 = vpop.permute.xlu0 %3176  ;;  %v6998_v26 = vpop.permute.xlu1 %2518 }
 0x322   : > { %8410 = vst [vmem:[#allocation62_spill] sm:$0xff] %v6996_v5 }
 0x323   : > { %3068 = vrot.lane.b32.xlu0 %v6859_v2, %s5367_s26  ;;  %3050 = vrot.lane.b32.xlu1 %v6741_v36, %s5367_s26 }
 0x325   : > { %v7004_v23 = vpop.permute.xlu0 %2520  ;;  %v7006_v6 = vpop.permute.xlu1 %2398 }
 0x327   : > { %3052 = vrot.lane.b32.xlu0 %v6746_v9, %s5367_s26  ;;  %2294 = vrot.lane.b32.xlu1 %v6892_v17, %s5366_s23 }
 0x329   : > { %v7012_v33 = vpop.permute.xlu0 %2400  ;;  %v7014_v11 = vpop.permute.xlu1 %2278 }
 0x32a   : > { %8411 = vst [vmem:[#allocation63_spill] sm:$0xff] %v7014_v11 }
 0x32b   : > { %2296 = vrot.lane.b32.xlu0 %v6900_v50, %s5366_s23  ;;  %2942 = vrot.lane.b32.xlu1 %v6822_v48, %s5368_s19 }
 0x32d   : > { %v7020_v0 = vpop.permute.xlu0 %2280  ;;  %v7022_v13 = vpop.permute.xlu1 %3054 }
 0x32e   : > { %8412 = vst [vmem:[#allocation64_spill] sm:$0xff] %v7020_v0  ;;  %8413 = vst [vmem:[#allocation65_spill] sm:$0xff] %v7022_v13 }
 0x32f   : > { %2944 = vrot.lane.b32.xlu0 %v6828_v27, %s5368_s19  ;;  %2950 = vrot.lane.b32.xlu1 %v6892_v17, %s5368_s19 }
 0x331   : > { %v7028_v4 = vpop.permute.xlu0 %3056  ;;  %v7030_v7 = vpop.permute.xlu1 %2646 }
 0x332   : > { %8414 = vst [vmem:[#allocation66_spill] sm:$0xff] %v7028_v4  ;;  %v2676_v13 = vsel %vm836_vm0, %v6982_v55, %v7030_v7 }
 0x333   : > { %2952 = vrot.lane.b32.xlu0 %v6900_v50, %s5368_s19  ;;  %2934 = vrot.lane.b32.xlu1 %v6792_v58, %s5368_s19  ;;  %v2691_v35 = vmul.f32 %v2676_v13, %v5743_v24 }
 0x335   : > { %v7040_v20 = vpop.permute.xlu0 %2648  ;;  %v3183_v15 = vpop.permute.xlu1 %3182 }
 0x336   : > { %v2677_v4 = vsel %vm836_vm0, %v6988_v43, %v7040_v20 }
 0x337   : > { %v2695_v31 = vmul.f32 %v2677_v4, %v5743_v24  ;;  %2936 = vrot.lane.b32.xlu0 %v6798_v44, %s5368_s19  ;;  %2290 = vrot.lane.b32.xlu1 %v6852_v29, %s5366_s23 }
 0x339   : > { %v3185_v41 = vpop.permute.xlu0 %3184  ;;  %v7052_v38 = vpop.permute.xlu1 %2526  ;;  %v5045_v46 = vpack.c.bf16 %v2695_v31, %v2691_v35 }
 0x33b   : > { %2292 = vrot.lane.b32.xlu0 %v6859_v2, %s5366_s23  ;;  %2938 = vrot.lane.b32.xlu1 %v6766_v61, %s5368_s19  ;;  %s4365_s23 = scalar_lea.sflag [#allocation5], %s5539_s21 }
 0x33c   : > { %3790 = vmatprep.subr.bf16.mxu1 %v5045_v46 }
 0x33d   : > { %v7058_v13 = vpop.permute.xlu0 %2528  ;;  %v7060_v4 = vpop.permute.xlu1 %2406 }
 0x33f   : > { %2940 = vrot.lane.b32.xlu0 %v6772_v45, %s5368_s19  ;;  %2946 = vrot.lane.b32.xlu1 %v6852_v29, %s5368_s19 }
 0x341   : > { %v7066_v11 = vpop.permute.xlu0 %2408  ;;  %v7068_v35 = vpop.permute.xlu1 %2286 }
 0x342   : > { %8415 = vst [vmem:[#allocation67_spill] sm:$0xff] %v7068_v35 }
 0x343   : > { %2948 = vrot.lane.b32.xlu0 %v6859_v2, %s5368_s19  ;;  %2930 = vrot.lane.b32.xlu1 %v6741_v36, %s5368_s19 }
 0x345   : > { %v7074_v46 = vpop.permute.xlu0 %2288  ;;  %v7076_v31 = vpop.permute.xlu1 %3062 }
 0x346   : > { %8416 = vst [vmem:[#allocation68_spill] sm:$0xff] %v7074_v46  ;;  %8417 = vst [vmem:[#allocation69_spill] sm:$0xff] %v7076_v31 }
 0x347   : > { %2932 = vrot.lane.b32.xlu0 %v6746_v9, %s5368_s19  ;;  %3078 = vrot.lane.b32.xlu1 %v6936_v1, %s5367_s26 }
 0x349   : > { %v7082_v3 = vpop.permute.xlu0 %3064  ;;  %v7084_v0 = vpop.permute.xlu1 %3186 }
 0x34a   : > { %8418 = vst [vmem:[#allocation70_spill] sm:$0xff] %v7082_v3  ;;  %8419 = vst [vmem:[#allocation71_spill] sm:$0xff] %v7084_v0 }
 0x34b   : > { %3080 = vrot.lane.b32.xlu0 %v6946_v47, %s5367_s26  ;;  %2822 = vrot.lane.b32.xlu1 %v6822_v48, %s5369_s28 }
 0x34d   : > { %v7090_v35 = vpop.permute.xlu0 %3188  ;;  %v7092_v46 = vpop.permute.xlu1 %2650 }
 0x34e   : > { %8420 = vst [vmem:[#allocation72_spill] sm:$0xff] %v7090_v35 }
 0x34f   : > { %2824 = vrot.lane.b32.xlu0 %v6828_v27, %s5369_s28  ;;  %2830 = vrot.lane.b32.xlu1 %v6892_v17, %s5369_s28 }
 0x351   : > { %v7098_v31 = vpop.permute.xlu0 %2652  ;;  %v7100_v3 = vpop.permute.xlu1 %2530 }
 0x352   : > { %8421 = vst [vmem:[#allocation73_spill] sm:$0xff] %v7100_v3 }
 0x353   : > { %2832 = vrot.lane.b32.xlu0 %v6900_v50, %s5369_s28  ;;  %2814 = vrot.lane.b32.xlu1 %v6792_v58, %s5369_s28 }
 0x355   : > { %v7106_v48 = vpop.permute.xlu0 %2532  ;;  %v7108_v56 = vpop.permute.xlu1 %2658 }
 0x356   : > { %8422 = vst [vmem:[#allocation74_spill] sm:$0xff] %v7106_v48 }
 0x357   : > { %2816 = vrot.lane.b32.xlu0 %v6798_v44, %s5369_s28  ;;  %3074 = vrot.lane.b32.xlu1 %v6870_v18, %s5367_s26 }
 0x359   : > { %v7114_v17 = vpop.permute.xlu0 %2660  ;;  %v7116_v27 = vpop.permute.xlu1 %2538 }
 0x35a   : > { %8423 = vst [vmem:[#allocation75_spill] sm:$0xff] %v7116_v27 }
 0x35b   : > { %3076 = vrot.lane.b32.xlu0 %v6876_v63, %s5367_s26  ;;  %2818 = vrot.lane.b32.xlu1 %v6766_v61, %s5369_s28  ;;  %s5285_s26 = scalar_lea.vmem %s8178_s27, 2048 }
 0x35c   : > { %p5286_p3 = scmp.ne.s32.totalorder %s8178_s27, %s5285_s26 }
 0x35d   : > { %v7122_v50 = vpop.permute.xlu0 %2540  ;;  %v7124_v58 = vpop.permute.xlu1 %2418 }
 0x35e   : > { %8424 = vst [vmem:[#allocation76_spill] sm:$0xff] %v7124_v58  ;;  %v5228_v58 = vld [vmem:[%s8230_s1 + $0x28] ss:$0 sm:$0xff]  ;;  %p5287_p7 = pnand %p5286_p3, %p8507_p11 }
 0x35f   : > { %2820 = vrot.lane.b32.xlu0 %v6772_v45, %s5369_s28  ;;  %2826 = vrot.lane.b32.xlu1 %v6852_v29, %s5369_s28  ;;  %v3213_v45 = vsel %vm1440_vm1, %v6996_v5, %v3185_v41  ;;  %v3207_v29 = vsel %vm1440_vm1, %v6956_v39, %v7090_v35  ;;  %v3211_v35 = vsel %vm1440_vm1, %v6910_v10, %v6956_v39 }
 0x360   : > { %p5288_p12 = pneg %p5287_p7 }
 0x361   : > { %v7130_v44 = vpop.permute.xlu0 %2420  ;;  %v7132_v49 = vpop.permute.xlu1 %2298 }
 0x362   : > { %8425 = vst [vmem:[#allocation77_spill] sm:$0xff] %v7130_v44  ;;  %8426 = vst [vmem:[#allocation78_spill] sm:$0xff] %v7132_v49  ;;  %v3223_v44 = vmul.f32 %v5228_v58, %v3207_v29 }
 0x363   : > { %2828 = vrot.lane.b32.xlu0 %v6859_v2, %s5369_s28  ;;  %2810 = vrot.lane.b32.xlu1 %v6741_v36, %s5369_s28  ;;  %v3212_v36 = vsel %vm1440_vm1, %v6990_v52, %v3183_v15 }
 0x365   : > { %v7138_v61 = vpop.permute.xlu0 %2300  ;;  %v7140_v30 = vpop.permute.xlu1 %3190 }
 0x366   : > { %8427 = vst [vmem:[#allocation79_spill] sm:$0xff] %v7138_v61  ;;  %8428 = vst [vmem:[#allocation80_spill] sm:$0xff] %v7140_v30  ;;  %v3208_v2 = vsel %vm1440_vm1, %v3183_v15, %v7140_v30  ;;  %v5227_v30 = vld [vmem:[%s8230_s1 + $0x20] ss:$0 sm:$0xff]  ;;  %v3206_v15 = vsel %vm1440_vm1, %v6950_v34, %v7084_v0 }
 0x367   : > { %2812 = vrot.lane.b32.xlu0 %v6746_v9, %s5369_s28  ;;  %2958 = vrot.lane.b32.xlu1 %v6936_v1, %s5368_s19  ;;  %v7163_v9 = vld [vmem:[#allocation6 + $0x4] ss:$12 sps:$4 sm:$0xff]   ;;  %v3230_v61 = vmul.f32 %v5227_v30, %v3213_v45  ;;  %v3227_v39 = vmul.f32 %v5228_v58, %v3208_v2  ;;  %v3226_v45 = vmul.f32 %v5227_v30, %v3212_v36 }
 0x368   : > { %3822 = vmatprep.mubr.bf16.mxu1 %v7163_v9  ;;  %v3219_v0 = vmul.f32 %v5228_v58, %v3206_v15  ;;  %v3222_v2 = vmul.f32 %v5227_v30, %v3211_v35 }
 0x369   : > { %v7159_v5 = vpop.permute.xlu0 %3192  ;;  %v7161_v49 = vpop.permute.xlu1 %2654  ;;  %v5084_v3 = vpack.c.bf16 %v3230_v61, %v3226_v45  ;;  %v2675_v61 = vsel %vm836_vm0, %v6902_v14, %v6948_v22  ;;  %v2434_v45 = vsel %vm562_vm4, %v6921_v8, %v6966_v37 }
 0x36a   : > { %8429 = vst [vmem:[#allocation81_spill] sm:$0xff] %v7159_v5  ;;  %v3209_v52 = vsel %vm1440_vm1, %v3185_v41, %v7159_v5  ;;  %v3210_v41 = vsel %vm1440_vm1, %v6904_v40, %v6950_v34  ;;  %v5081_v36 = vpack.c.bf16 %v3223_v44, %v3219_v0  ;;  %v2674_v0 = vsel %vm836_vm0, %v6894_v59, %v6940_v21 }
 0x36b   : > { %v3231_v10 = vmul.f32 %v5228_v58, %v3209_v52  ;;  %2960 = vrot.lane.b32.xlu0 %v6946_v47, %s5368_s19  ;;  %2954 = vrot.lane.b32.xlu1 %v6870_v18, %s5368_s19  ;;  %v3218_v27 = vmul.f32 %v5227_v30, %v3210_v41  ;;  %v2555_v30 = vsel %vm699_vm2, %v6919_v12, %v6964_v28 }
 0x36c   : > { %v2554_v44 = vsel %vm699_vm2, %v6912_v54, %v6958_v60  ;;  %v7234_v15 = vmul.f32 %v2675_v61, %v5743_v24  ;;  %v7244_v41 = vmul.f32 %v2674_v0, %v5743_v24  ;;  %v2557_v24 = vsel %vm699_vm2, %v7004_v23, %v7058_v13 }
 0x36d   : > { %v7191_v5 = vpop.permute.xlu0 %2656  ;;  %v7193_v29 = vpop.permute.xlu1 %2534  ;;  %v5085_v52 = vpack.c.bf16 %v3231_v10, %v3227_v39  ;;  %v5080_v34 = vpack.c.bf16 %v3222_v2, %v3218_v27  ;;  %v2435_v27 = vsel %vm562_vm4, %v6928_v25, %v6972_v51  ;;  %v7237_v39 = vmul.f32 %v2555_v30, %v5869_v42 }
 0x36e   : > { %v7250_v2 = vmul.f32 %v2435_v27, %v6026_v16  ;;  %v7272_v61 = vmul.f32 %v2434_v45, %v6026_v16  ;;  %v7284_v40 = vmul.f32 %v2557_v24, %v5869_v42  ;;  %v7309_v24 = vld [vmem:[#allocation6 + $0x20] ss:$12 sps:$4 sm:$0xff]  }
 0x36f   : > { %2956 = vrot.lane.b32.xlu0 %v6876_v63, %s5368_s19  ;;  %3855 = vmatprep.subr.bf16.mxu0 %v5085_v52  ;;  %v7247_v52 = vmul.f32 %v2554_v44, %v5869_v42  ;;  %v5041_v44 = vpack.c.bf16 %v7234_v15, %v7244_v41  ;;  %v2437_v15 = vsel %vm562_vm4, %v7012_v33, %v7066_v11  ;;  %s5370_s19 = smov [#allocation8]  }
 0x370   : > { %2838 = vrot.lane.b32.xlu1 %v6936_v1, %s5369_s28  ;;  %3856 = vmatpush1.bf16.msra.mxu0 %v5084_v3  ;;  %v7213_v3 = vld [vmem:[#allocation6 + $0x8] ss:$12 sps:$4 sm:$0xff]  }
 0x371   : > { %v7199_v48 = vpop.permute.xlu0 %2536  ;;  %3857 = vmatprep.subr.bf16.mxu0 %v5081_v36  ;;  %v7201_v58 = vpop.permute.xlu1 %2414  ;;  %8430 = vst [vmem:[#allocation82_spill] sm:$0xff] %v7213_v3  ;;  %v2556_v36 = vsel %vm699_vm2, %v6998_v26, %v7052_v38 }
 0x373   : > { %2840 = vrot.lane.b32.xlu0 %v6946_v47, %s5369_s28 }
 0x374   : > { %2834 = vrot.lane.b32.xlu1 %v6870_v18, %s5369_s28  ;;  %3858 = vmatpush1.bf16.msra.mxu0 %v5080_v34  ;;  %v2436_v34 = vsel %vm562_vm4, %v7006_v6, %v7060_v4 }
 0x375   : > { %v7229_v10 = vpop.permute.xlu0 %2416  ;;  %v7231_v35 = vpop.permute.xlu1 %3070 }
 0x376   : > { %8431 = vst [vmem:[#allocation83_spill] sm:$0xff] %v7231_v35 }
 0x377   : > { %2836 = vrot.lane.b32.xlu0 %v6876_v63, %s5369_s28  ;;  %4780 = vmatmul.mubr.msk.bf16.vlgmr.msra.gmra.mxu0 %vm2039_vm3, %v7213_v3  ;;  %v7281_v3 = vmul.f32 %v2556_v36, %v5869_v42  ;;  %v2670_v42 = vsel %vm836_vm0, %v6940_v21, %v7092_v46  ;;  %v2666_v21 = vsel %vm836_vm0, %v7092_v46, %v7108_v56  ;;  %s5289_s28 = sshll.u32 %s5370_s19, 4  ;;  %s5290_s28 = int_to_ptr.vmem [resolvable:$false] %s5289_s28 }
 0x378   : > { %3198 = vrot.lane.b32.xlu1 %v6936_v1, %s5362_s17  ;;  %3885 = vmatprep.mubr.bf16.mxu0 %v8387_v32  ;;  %v7287_v32 = vmul.f32 %v2436_v34, %v6026_v16  ;;  %v2671_v34 = vsel %vm836_vm0, %v6948_v22, %v7098_v31  ;;  %v3370_v22 = vld [vmem:[%s8235_s6] sm:$0xff]  ;;  %v2679_v46 = vsel %vm836_vm0, %v7114_v17, %v6902_v14  ;;  %v3371_v14 = vld [vmem:[%s8235_s6 + $0x8] sm:$0xff]  ;;  %s5291_s24 = scalar_lea.vmem %s5290_s28, 4096  ;;  %p5292_p10 = scmp.lt.s32.totalorder %s8178_s27, %s5290_s28 }
 0x379   : > { %v7274_v30 = vpop.permute.xlu0 %3072  ;;  %v2663_v0 = vpop.permute.xlu1 %2662  ;;  %p5293_p2 = scmp.lt.s32.totalorder %s5291_s24, %s5285_s26 }
 0x37a   : > { %8432 = vst [vmem:[#allocation84_spill] sm:$0xff] %v7274_v30  ;;  %v2668_v41 = vsel %vm836_vm0, %v7161_v49, %v2663_v0  ;;  %v2680_v36 = vsel %vm836_vm0, %v2663_v0, %v6982_v55  ;;  %v2667_v55 = vsel %vm836_vm0, %v7098_v31, %v7114_v17  ;;  %v2673_v0 = vsel %vm836_vm0, %v7040_v20, %v7191_v5 }
 0x37b   : > { %3200 = vrot.lane.b32.xlu0 %v6946_v47, %s5362_s17  ;;  %v2672_v31 = vsel %vm836_vm0, %v7030_v7, %v7161_v49  ;;  %v8433_v47 = vld [vmem:[#allocation15_spill] sm:$0xff]  ;;  %v2693_v35 = vmul.f32 %v2668_v41, %v5996_v57  ;;  %v2678_v49 = vsel %vm836_vm0, %v7108_v56, %v6894_v59  ;;  %v2689_v7 = vmul.f32 %v2667_v55, %v5996_v57  ;;  %v3372_v56 = vld [vmem:[%s8235_s6 + $0x10] sm:$0xff]  ;;  %p5294_p13 = por %p5293_p2, %p5292_p10 }
 0x37c   : > { %3194 = vrot.lane.b32.xlu1 %v6870_v18, %s5362_s17  ;;  %v2690_v1 = vmul.f32 %v2680_v36, %v8433_v47  ;;  %v5037_v36 = vpack.c.bf16 %v7284_v40, %v7281_v3  ;;  %v2685_v55 = vmul.f32 %v2666_v21, %v5996_v57 }
 0x37d   : > { %v2665_v45 = vpop.permute.xlu0 %2664  ;;  %v2543_v27 = vpop.permute.xlu1 %2542  ;;  %p5295_p0 = pnand %p5294_p13, %p5288_p12 }
 0x37e   : > { %v2669_v20 = vsel %vm836_vm0, %v7191_v5, %v2665_v45  ;;  %v2681_v18 = vsel %vm836_vm0, %v2665_v45, %v6988_v43  ;;  %v2696_v5 = vmul.f32 %v2673_v0, %v5986_v62  ;;  %v2686_v0 = vmul.f32 %v2679_v46, %v8433_v47 }
 0x37f   : > { %v2694_v30 = vmul.f32 %v2681_v18, %v8433_v47  ;;  %v2697_v17 = vmul.f32 %v2669_v20, %v5996_v57  ;;  %3196 = vrot.lane.b32.xlu0 %v6876_v63, %s5362_s17  ;;  %4781 = vmatmul.mubr.msk.bf16.gmra.mxu0 %vm2039_vm3, %v7309_v24  ;;  %v2688_v18 = vmul.f32 %v2671_v34, %v5986_v62 }
 0x380   : > { %3376 = vperm.xlu1 %5161, %v3370_v22   ;;  %3928 = vmatprep.mubr.bf16.mxu0 %v7163_v9  ;;  %v2692_v34 = vmul.f32 %v2672_v31, %v5986_v62  ;;  %v2682_v22 = vmul.f32 %v2678_v49, %v8433_v47  ;;  %v2548_v40 = vsel %vm699_vm2, %v7193_v29, %v2543_v27  ;;  %v8434_v31 = vld [vmem:[#allocation74_spill] sm:$0xff]  ;;  %v8436_v49 = vld [vmem:[#allocation75_spill] sm:$0xff] }
 0x381   : > { %v5044_v43 = vpack.c.bf16 %v2694_v30, %v2690_v1  ;;  %v2545_v45 = vpop.permute.xlu0 %2544  ;;  %v7362_v41 = vpop.permute.xlu1 %2422  ;;  %v5047_v59 = vpack.c.bf16 %v2697_v17, %v2693_v35  ;;  %v7377_v30 = vmul.f32 %v2437_v15, %v6026_v16  ;;  %v2684_v35 = vmul.f32 %v2670_v42, %v5986_v62  ;;  %v3373_v16 = vld [vmem:[%s8235_s6 + $0x18] sm:$0xff]  ;;  %v8435_v17 = vld [vmem:[#allocation17_spill] sm:$0xff] }
 0x382   : > { %v2549_v1 = vsel %vm699_vm2, %v7199_v48, %v2545_v45  ;;  %v2561_v9 = vsel %vm699_vm2, %v2545_v45, %v7004_v23  ;;  %v5046_v57 = vpack.c.bf16 %v2696_v5, %v2692_v34  ;;  %v5043_v3 = vpack.c.bf16 %v2689_v7, %v2685_v55  ;;  %v8437_v7 = vld [vmem:[#allocation73_spill] sm:$0xff] }
 0x383   : > { %3381 = vperm.xlu0 %5160, %v3371_v14   ;;  %3791 = vmatpush1.bf16.msra.mxu1 %v5044_v43  ;;  %v2553_v62 = vsel %vm699_vm2, %v7058_v13, %v7199_v48  ;;  %v2560_v23 = vsel %vm699_vm2, %v2543_v27, %v6998_v26  ;;  %v2577_v47 = vmul.f32 %v2549_v1, %v6126_v53 }
 0x384   : > { %3386 = vperm.xlu1 %5161, %v3372_v56   ;;  %3896 = vmatprep.subr.bf16.mxu0 %v5047_v59  ;;  %v5042_v21 = vpack.c.bf16 %v2688_v18, %v2684_v35  ;;  %v5040_v46 = vpack.c.bf16 %v2686_v0, %v2682_v22  ;;  %v2547_v20 = vsel %vm699_vm2, %v8434_v31, %v7122_v50 }
 0x385   : > { %3792 = vmatprep.subr.bf16.mxu1 %v5041_v44  ;;  %v2425_v15 = vpop.permute.xlu0 %2424  ;;  %v7398_v42 = vpop.permute.xlu1 %2302  ;;  %v2574_v48 = vmul.f32 %v2561_v9, %v8435_v17  ;;  %3897 = vmatpush1.bf16.msra.mxu0 %v5046_v57  ;;  %v2559_v26 = vsel %vm699_vm2, %v7122_v50, %v6919_v12  ;;  %v2552_v13 = vsel %vm699_vm2, %v7052_v38, %v7193_v29  ;;  %v8438_v50 = vld [vmem:[#allocation20_spill] sm:$0xff] }
 0x386   : > { %v2573_v44 = vmul.f32 %v2548_v40, %v6126_v53  ;;  %3898 = vmatprep.subr.bf16.mxu0 %v5043_v3  ;;  %v2551_v27 = vsel %vm699_vm2, %v6964_v28, %v8434_v31  ;;  %v2546_v5 = vsel %vm699_vm2, %v8437_v7, %v8436_v49  ;;  %v2576_v12 = vmul.f32 %v2553_v62, %v8438_v50 }
 0x387   : > { %3391 = vperm.xlu0 %5160, %v3373_v16   ;;  %v2570_v14 = vmul.f32 %v2560_v23, %v8435_v17  ;;  %3793 = vmatpush1.bf16.msra.mxu1 %v5040_v46  ;;  %v2550_v38 = vsel %vm699_vm2, %v6958_v60, %v8437_v7  ;;  %v2558_v28 = vsel %vm699_vm2, %v8436_v49, %v6912_v54  ;;  %v8441_v23 = vld [vmem:[#allocation77_spill] sm:$0xff]  ;;  %v8445_v46 = vld [vmem:[#allocation76_spill] sm:$0xff]  ;;  %v8447_v49 = vld [vmem:[#allocation67_spill] sm:$0xff] }
 0x388   : > { %v2569_v29 = vmul.f32 %v2547_v20, %v6126_v53  ;;  %3794 = vmatprep.subr.bf16.mxu1 %v5037_v36  ;;  %v5039_v43 = vpack.c.bf16 %v2577_v47, %v2573_v44  ;;  %v2566_v56 = vmul.f32 %v2559_v26, %v8435_v17  ;;  %v2572_v59 = vmul.f32 %v2552_v13, %v8438_v50  ;;  %v8446_v20 = vld [vmem:[#allocation24_spill] sm:$0xff]  ;;  %v8448_v7 = vld [vmem:[#allocation63_spill] sm:$0xff] }
 0x389   : > { %v7433_v18 = vpop.permute.xlu0 %2304  ;;  %v2411_v45 = vpop.permute.xlu1 %2410  ;;  %v5036_v55 = vpack.c.bf16 %v2574_v48, %v2570_v14  ;;  %v2429_v60 = vsel %vm562_vm4, %v7229_v10, %v2425_v15  ;;  %3899 = vmatpush1.bf16.msra.mxu0 %v5042_v21  ;;  %v2568_v0 = vmul.f32 %v2551_v27, %v8438_v50  ;;  %v2565_v54 = vmul.f32 %v2546_v5, %v6126_v53 }
 0x38a   : > { %v2441_v36 = vsel %vm562_vm4, %v2425_v15, %v7012_v33  ;;  %3900 = vmatprep.subr.bf16.mxu0 %v5039_v43  ;;  %v5029_v34 = vpack.c.bf16 %v7377_v30, %v7287_v32  ;;  %v2564_v1 = vmul.f32 %v2550_v38, %v8438_v50  ;;  %v2562_v35 = vmul.f32 %v2558_v28, %v8435_v17  ;;  %v8439_v32 = vld [vmem:[#allocation25_spill] sm:$0xff]  ;;  %v8449_v50 = vld [vmem:[#allocation22_spill] sm:$0xff] }
 0x38b   : > { %v5038_v22 = vpack.c.bf16 %v2576_v12, %v2572_v59  ;;  %v2428_v9 = vsel %vm562_vm4, %v7201_v58, %v7362_v41  ;;  %3795 = vmatpush1.bf16.msra.mxu1 %v5036_v55  ;;  %v2433_v53 = vsel %vm562_vm4, %v7066_v11, %v7229_v10  ;;  %v2440_v33 = vsel %vm562_vm4, %v7362_v41, %v7006_v6  ;;  %v8442_v10 = vld [vmem:[#allocation19_spill] sm:$0xff]  ;;  %v8443_v41 = vld [vmem:[#allocation68_spill] sm:$0xff] }
 0x38c   : > { %v2457_v30 = vmul.f32 %v2429_v60, %v8439_v32  ;;  %v8440_v57 = vpack.c.bf16 %v7237_v39, %v7247_v52  ;;  %v5035_v3 = vpack.c.bf16 %v2569_v29, %v2565_v54  ;;  %v5032_v62 = vpack.c.bf16 %v2566_v56, %v2562_v35  ;;  %v8444_v39 = vld [vmem:[#allocation64_spill] sm:$0xff]  ;;  %v8450_v56 = vld [vmem:[#allocation59_spill] sm:$0xff] }
 0x38d   : > { %v2413_v40 = vpop.permute.xlu0 %2412  ;;  %v7465_v16 = vpop.permute.xlu1 %3058  ;;  %v2439_v11 = vsel %vm562_vm4, %v8441_v23, %v6928_v25  ;;  %v2454_v47 = vmul.f32 %v2441_v36, %v8442_v10  ;;  %3901 = vmatpush1.bf16.msra.mxu0 %v5038_v22  ;;  %v2317_v52 = vsel %vm425_vm5, %v8444_v39, %v8443_v41  ;;  %v5034_v15 = vpack.c.bf16 %v2568_v0, %v2564_v1  ;;  %v8451_v59 = vld [vmem:[#allocation55_spill] sm:$0xff]  ;;  %v8452_v60 = vld [vmem:[#allocation60_spill] sm:$0xff]  ;;  %v8453_v0 = vld [vmem:[#allocation57_spill] sm:$0xff] }
 0x38e   : > { %3796 = vmatprep.subr.bf16.mxu1 %v8440_v57  ;;  %v2427_v6 = vsel %vm562_vm4, %v2413_v40, %v8441_v23  ;;  %v2432_v21 = vsel %vm562_vm4, %v7060_v4, %v7201_v58  ;;  %v2453_v25 = vmul.f32 %v2428_v9, %v8439_v32  ;;  %3902 = vmatprep.subr.bf16.mxu0 %v5035_v3  ;;  %v8457_v57 = vld [vmem:[#allocation70_spill] sm:$0xff]  ;;  %v8458_v3 = vld [vmem:[#allocation23_spill] sm:$0xff] }
 0x38f   : > { %v2438_v31 = vsel %vm562_vm4, %v8445_v46, %v6921_v8  ;;  %v2456_v17 = vmul.f32 %v2433_v53, %v8446_v20  ;;  %v2450_v48 = vmul.f32 %v2440_v33, %v8442_v10  ;;  %v2426_v26 = vsel %vm562_vm4, %v2411_v45, %v8445_v46  ;;  %3797 = vmatpush1.bf16.msra.mxu1 %v5032_v62  ;;  %v8455_v33 = vld [vmem:[#allocation79_spill] sm:$0xff]  ;;  %v8462_v46 = vld [vmem:[#allocation26_spill] sm:$0xff] }
 0x390   : > { %v2446_v13 = vmul.f32 %v2439_v11, %v8442_v10  ;;  %v2431_v4 = vsel %vm562_vm4, %v6972_v51, %v2413_v40  ;;  %v2449_v58 = vmul.f32 %v2427_v6, %v8439_v32  ;;  %3798 = vmatprep.subr.bf16.mxu1 %v5029_v34  ;;  %v5031_v8 = vpack.c.bf16 %v2457_v30, %v2453_v25  ;;  %v8456_v30 = vld [vmem:[#allocation84_spill] sm:$0xff]  ;;  %v8459_v11 = vld [vmem:[#allocation78_spill] sm:$0xff]  ;;  %v8461_v6 = vld [vmem:[#allocation69_spill] sm:$0xff] }
 0x391   : > { %v7498_v44 = vpop.permute.xlu0 %3060  ;;  %v7500_v27 = vpop.permute.xlu1 %3066  ;;  %v2316_v5 = vsel %vm425_vm5, %v8448_v7, %v8447_v49  ;;  %v2335_v12 = vmul.f32 %v2317_v52, %v8449_v50  ;;  %v2452_v14 = vmul.f32 %v2432_v21, %v8446_v20  ;;  %v5028_v38 = vpack.c.bf16 %v2454_v47, %v2450_v48  ;;  %3903 = vmatpush1.bf16.msra.mxu0 %v5034_v15  ;;  %v8460_v47 = vld [vmem:[#allocation83_spill] sm:$0xff]  ;;  %v8463_v48 = vld [vmem:[#allocation66_spill] sm:$0xff] }
 0x392   : > { %v2442_v51 = vmul.f32 %v2438_v31, %v8442_v10  ;;  %v2321_v28 = vsel %vm425_vm5, %v7433_v18, %v8444_v39  ;;  %v2430_v29 = vsel %vm562_vm4, %v6966_v37, %v2411_v45  ;;  %v2445_v43 = vmul.f32 %v2426_v26, %v8439_v32  ;;  %3904 = vmatprep.subr.bf16.mxu0 %v5031_v8 }
 0x393   : > { %v2314_v55 = vsel %vm425_vm5, %v8451_v59, %v8450_v56  ;;  %v2315_v54 = vsel %vm425_vm5, %v8453_v0, %v8452_v60  ;;  %v5030_v36 = vpack.c.bf16 %v2456_v17, %v2452_v14  ;;  %v2448_v34 = vmul.f32 %v2431_v4, %v8446_v20  ;;  %3799 = vmatpush1.bf16.msra.mxu1 %v5028_v38  ;;  %v8465_v38 = vld [vmem:[#allocation27_spill] sm:$0xff] }
 0x394   : > { %v2331_v1 = vmul.f32 %v2316_v5, %v8449_v50  ;;  %v5024_v37 = vpack.c.bf16 %v2446_v13, %v2442_v51  ;;  %v2320_v45 = vsel %vm425_vm5, %v7398_v42, %v8448_v7  ;;  %v8454_v35 = vpack.c.bf16 %v7250_v2, %v7272_v61  ;;  %v8464_v5 = vld [vmem:[#allocation65_spill] sm:$0xff] }
 0x395   : > { %v7534_v22 = vpop.permute.xlu0 %3068  ;;  %v5027_v9 = vpack.c.bf16 %v2449_v58, %v2445_v43  ;;  %v7536_v53 = vpop.permute.xlu1 %3050  ;;  %v2319_v32 = vsel %vm425_vm5, %v8455_v33, %v8453_v0  ;;  %v3089_v40 = vsel %vm1303_vm6, %v8457_v57, %v8456_v30  ;;  %v2334_v62 = vmul.f32 %v2321_v28, %v8458_v3  ;;  %3905 = vmatpush1.bf16.msra.mxu0 %v5030_v36  ;;  %v8466_v36 = vld [vmem:[#allocation28_spill] sm:$0xff] }
 0x396   : > { %3800 = vmatprep.subr.bf16.mxu1 %v8454_v35  ;;  %v2444_v2 = vmul.f32 %v2430_v29, %v8446_v20  ;;  %v2327_v61 = vmul.f32 %v2315_v54, %v8449_v50  ;;  %v5021_v23 = vpack.c.bf16 %v2335_v12, %v2331_v1  ;;  %v2318_v10 = vsel %vm425_vm5, %v8459_v11, %v8451_v59  ;;  %v8467_v1 = vld [vmem:[#allocation29_spill] sm:$0xff] }
 0x397   : > { %3906 = vmatprep.subr.bf16.mxu0 %v5027_v9  ;;  %v3088_v39 = vsel %vm1303_vm6, %v8461_v6, %v8460_v47  ;;  %v2330_v52 = vmul.f32 %v2320_v45, %v8458_v3  ;;  %3801 = vmatpush1.bf16.msra.mxu1 %v5024_v37  ;;  %v2323_v21 = vmul.f32 %v2314_v55, %v8449_v50 }
 0x398   : > { %v5026_v15 = vpack.c.bf16 %v2448_v34, %v2444_v2  ;;  %v2326_v25 = vmul.f32 %v2319_v32, %v8458_v3  ;;  %v3111_v31 = vmul.f32 %v3089_v40, %v8462_v46  ;;  %3802 = vmatprep.subr.bf16.mxu1 %v5021_v23  ;;  %v3093_v26 = vsel %vm1303_vm6, %v8463_v48, %v8457_v57 }
 0x399   : > { %v7561_v20 = vpop.permute.xlu0 %3052  ;;  %v2295_v17 = vpop.permute.xlu1 %2294  ;;  %v5020_v13 = vpack.c.bf16 %v2334_v62, %v2330_v52  ;;  %v2322_v4 = vmul.f32 %v2318_v10, %v8458_v3  ;;  %v3107_v58 = vmul.f32 %v3088_v39, %v8462_v46  ;;  %v3087_v8 = vsel %vm1303_vm6, %v7498_v44, %v7534_v22  ;;  %v8468_v52 = vld [vmem:[#allocation30_spill] sm:$0xff] }
 0x39a   : > { %3907 = vmatpush1.bf16.msra.mxu0 %v5026_v15  ;;  %v5017_v7 = vpack.c.bf16 %v2327_v61, %v2323_v21  ;;  %v3092_v50 = vsel %vm1303_vm6, %v8464_v5, %v8461_v6  ;;  %v2308_v12 = vsel %vm425_vm5, %v2295_v17, %v7398_v42  ;;  %v2312_v14 = vsel %vm425_vm5, %v8447_v49, %v2295_v17 }
 0x39b   : > { %3803 = vmatpush1.bf16.msra.mxu1 %v5020_v13  ;;  %v3110_v51 = vmul.f32 %v3093_v26, %v8465_v38  ;;  %v5016_v28 = vpack.c.bf16 %v2326_v25, %v2322_v4  ;;  %v3086_v29 = vsel %vm1303_vm6, %v7465_v16, %v7500_v27  ;;  %v5077_v55 = vpack.c.bf16 %v3111_v31, %v3107_v58  ;;  %v8469_v13 = vld [vmem:[#allocation31_spill] sm:$0xff] }
 0x39c   : > { %3804 = vmatprep.subr.bf16.mxu1 %v5017_v7  ;;  %v3103_v0 = vmul.f32 %v3087_v8, %v8462_v46  ;;  %v3091_v42 = vsel %vm1303_vm6, %v7561_v20, %v7498_v44  ;;  %v2332_v34 = vmul.f32 %v2312_v14, %v8466_v36  ;;  %v2333_v37 = vmul.f32 %v2308_v12, %v8467_v1 }
 0x39d   : > { %v2297_v43 = vpop.permute.xlu0 %2296  ;;  %v2943_v59 = vpop.permute.xlu1 %2942  ;;  %v3106_v9 = vmul.f32 %v3092_v50, %v8465_v38  ;;  %v3099_v44 = vmul.f32 %v3086_v29, %v8462_v46  ;;  %v3102_v62 = vmul.f32 %v3091_v42, %v8465_v38 }
 0x39e   : > { %v2309_v49 = vsel %vm425_vm5, %v2297_v43, %v7433_v18  ;;  %v2313_v54 = vsel %vm425_vm5, %v8443_v41, %v2297_v43  ;;  %v3090_v18 = vsel %vm1303_vm6, %v7536_v53, %v7465_v16 }
 0x39f   : > { %v2336_v45 = vmul.f32 %v2313_v54, %v8466_v36  ;;  %v2337_v35 = vmul.f32 %v2309_v49, %v8467_v1  ;;  %3805 = vmatpush1.bf16.msra.mxu1 %v5016_v28  ;;  %v5076_v3 = vpack.c.bf16 %v3110_v51, %v3106_v9  ;;  %v5073_v2 = vpack.c.bf16 %v3103_v0, %v3099_v44 }
 0x3a0   : > { %3806 = vmatprep.subr.bf16.mxu1 %v5077_v55  ;;  %v3098_v61 = vmul.f32 %v3090_v18, %v8465_v38 }
 0x3a1   : > { %v5022_v32 = vpack.c.bf16 %v2336_v45, %v2332_v34  ;;  %v2945_v41 = vpop.permute.xlu0 %2944  ;;  %v7609_v57 = vpop.permute.xlu1 %2950  ;;  %v5023_v40 = vpack.c.bf16 %v2337_v35, %v2333_v37 }
 0x3a2   : > { %v2968_v23 = vsel %vm1166_vm7, %v2943_v59, %v7609_v57  ;;  %v5072_v6 = vpack.c.bf16 %v3102_v62, %v3098_v61  ;;  %v8470_v61 = vld [vmem:[#allocation32_spill] sm:$0xff] }
 0x3a3   : > { %3908 = vmatprep.subr.bf16.mxu0 %v5023_v40  ;;  %3807 = vmatpush2.bf16.msra.mxu1 %v5076_v3  ;;  %v2987_v15 = vmul.f32 %v2968_v23, %v8468_v52 }
 0x3a4   : > { %3909 = vmatpush1.bf16.msra.mxu0 %v5022_v32  ;;  %3808 = vmatprep.subr.bf16.mxu1 %v5073_v2 }
 0x3a5   : > { %v7616_v16 = vpop.permute.xlu0 %2952  ;;  %v7618_v10 = vpop.permute.xlu1 %2934 }
 0x3a6   : > { %v2969_v39 = vsel %vm1166_vm7, %v2945_v41, %v7616_v16  ;;  %v2972_v25 = vsel %vm1166_vm7, %v7618_v10, %v2943_v59 }
 0x3a7   : > { %v2991_v21 = vmul.f32 %v2969_v39, %v8468_v52  ;;  %3809 = vmatpush2.bf16.msra.mxu1 %v5072_v6  ;;  %v2986_v4 = vmul.f32 %v2972_v25, %v8469_v13  ;;  %v8471_v6 = vld [vmem:[#allocation33_spill] sm:$0xff] }
 0x3a9   : > { %v7628_v46 = vpop.permute.xlu0 %2936  ;;  %v2291_v31 = vpop.permute.xlu1 %2290  ;;  %v5069_v17 = vpack.c.bf16 %v2991_v21, %v2987_v15 }
 0x3aa   : > { %v2973_v26 = vsel %vm1166_vm7, %v7628_v46, %v2945_v41  ;;  %v2306_v8 = vsel %vm425_vm5, %v2291_v31, %v8459_v11  ;;  %v2310_v7 = vsel %vm425_vm5, %v8450_v56, %v2291_v31 }
 0x3ab   : > { %v2990_v58 = vmul.f32 %v2973_v26, %v8469_v13  ;;  %3810 = vmatprep.subr.bf16.mxu1 %v5069_v17  ;;  %v2324_v28 = vmul.f32 %v2310_v7, %v8466_v36  ;;  %v2325_v29 = vmul.f32 %v2306_v8, %v8467_v1  ;;  %v8472_v26 = vld [vmem:[#allocation34_spill] sm:$0xff] }
 0x3ad   : > { %v5068_v50 = vpack.c.bf16 %v2990_v58, %v2986_v4  ;;  %v2293_v12 = vpop.permute.xlu0 %2292  ;;  %v2939_v14 = vpop.permute.xlu1 %2938 }
 0x3ae   : > { %v2307_v38 = vsel %vm425_vm5, %v2293_v12, %v8455_v33  ;;  %v2311_v51 = vsel %vm425_vm5, %v8452_v60, %v2293_v12 }
 0x3af   : > { %v2328_v11 = vmul.f32 %v2311_v51, %v8466_v36  ;;  %v2329_v43 = vmul.f32 %v2307_v38, %v8467_v1  ;;  %3811 = vmatpush2.bf16.msra.mxu1 %v5068_v50 }
 0x3b1   : > { %v5018_v56 = vpack.c.bf16 %v2328_v11, %v2324_v28  ;;  %v2941_v59 = vpop.permute.xlu0 %2940  ;;  %v7651_v55 = vpop.permute.xlu1 %2946  ;;  %v5019_v0 = vpack.c.bf16 %v2329_v43, %v2325_v29 }
 0x3b2   : > { %v2966_v33 = vsel %vm1166_vm7, %v2939_v14, %v7651_v55 }
 0x3b3   : > { %3910 = vmatprep.subr.bf16.mxu0 %v5019_v0  ;;  %v2979_v54 = vmul.f32 %v2966_v33, %v8468_v52 }
 0x3b4   : > { %3911 = vmatpush1.bf16.msra.mxu0 %v5018_v56 }
 0x3b5   : > { %v7656_v60 = vpop.permute.xlu0 %2948  ;;  %v7658_v42 = vpop.permute.xlu1 %2930 }
 0x3b6   : > { %v2967_v49 = vsel %vm1166_vm7, %v2941_v59, %v7656_v60  ;;  %v2970_v34 = vsel %vm1166_vm7, %v7658_v42, %v2939_v14  ;;  %v8473_v14 = vld [vmem:[#allocation35_spill] sm:$0xff] }
 0x3b7   : > { %v2983_v36 = vmul.f32 %v2967_v49, %v8468_v52  ;;  %v2978_v9 = vmul.f32 %v2970_v34, %v8469_v13 }
 0x3b9   : > { %v7668_v1 = vpop.permute.xlu0 %2932  ;;  %v3079_v37 = vpop.permute.xlu1 %3078  ;;  %v5065_v45 = vpack.c.bf16 %v2983_v36, %v2979_v54 }
 0x3ba   : > { %v2971_v35 = vsel %vm1166_vm7, %v7668_v1, %v2941_v59  ;;  %v3084_v18 = vsel %vm1303_vm6, %v8460_v47, %v3079_v37  ;;  %v3096_v32 = vsel %vm1303_vm6, %v3079_v37, %v8464_v5 }
 0x3bb   : > { %v2982_v44 = vmul.f32 %v2971_v35, %v8469_v13  ;;  %3812 = vmatprep.subr.bf16.mxu1 %v5065_v45  ;;  %v3108_v23 = vmul.f32 %v3084_v18, %v8470_v61  ;;  %v3109_v39 = vmul.f32 %v3096_v32, %v8471_v6 }
 0x3bd   : > { %v5064_v41 = vpack.c.bf16 %v2982_v44, %v2978_v9  ;;  %v3081_v40 = vpop.permute.xlu0 %3080  ;;  %v2823_v3 = vpop.permute.xlu1 %2822 }
 0x3be   : > { %v3085_v62 = vsel %vm1303_vm6, %v8456_v30, %v3081_v40  ;;  %v3097_v2 = vsel %vm1303_vm6, %v3081_v40, %v8463_v48 }
 0x3bf   : > { %v3112_v47 = vmul.f32 %v3085_v62, %v8470_v61  ;;  %v3113_v52 = vmul.f32 %v3097_v2, %v8471_v6  ;;  %3813 = vmatpush2.bf16.msra.mxu1 %v5064_v41 }
 0x3c1   : > { %v5078_v5 = vpack.c.bf16 %v3112_v47, %v3108_v23  ;;  %v2825_v15 = vpop.permute.xlu0 %2824  ;;  %v7691_v21 = vpop.permute.xlu1 %2830  ;;  %v5079_v25 = vpack.c.bf16 %v3113_v52, %v3109_v39  ;;  %v8474_v47 = vld [vmem:[#allocation36_spill] sm:$0xff] }
 0x3c2   : > { %v2848_v30 = vsel %vm1029_vm8, %v2823_v3, %v7691_v21 }
 0x3c3   : > { %3912 = vmatprep.subr.bf16.mxu0 %v5079_v25  ;;  %v2867_v13 = vmul.f32 %v2848_v30, %v8472_v26  ;;  %v8475_v30 = vld [vmem:[#allocation46_spill] sm:$0xff] }
 0x3c4   : > { %3913 = vmatpush2.bf16.msra.mxu0 %v5078_v5 }
 0x3c5   : > { %v7696_v48 = vpop.permute.xlu0 %2832  ;;  %v7698_v31 = vpop.permute.xlu1 %2814 }
 0x3c6   : > { %v2849_v17 = vsel %vm1029_vm8, %v2825_v15, %v7696_v48  ;;  %v2852_v58 = vsel %vm1029_vm8, %v7698_v31, %v2823_v3 }
 0x3c7   : > { %v2871_v4 = vmul.f32 %v2849_v17, %v8472_v26  ;;  %v2866_v38 = vmul.f32 %v2852_v58, %v8473_v14 }
 0x3c9   : > { %v7708_v8 = vpop.permute.xlu0 %2816  ;;  %v3075_v7 = vpop.permute.xlu1 %3074  ;;  %v5061_v50 = vpack.c.bf16 %v2871_v4, %v2867_v13 }
 0x3ca   : > { %v2853_v12 = vsel %vm1029_vm8, %v7708_v8, %v2825_v15  ;;  %v3082_v28 = vsel %vm1303_vm6, %v7500_v27, %v3075_v7  ;;  %v3094_v29 = vsel %vm1303_vm6, %v3075_v7, %v7536_v53 }
 0x3cb   : > { %v2870_v51 = vmul.f32 %v2853_v12, %v8473_v14  ;;  %3814 = vmatprep.subr.bf16.mxu1 %v5061_v50  ;;  %v3100_v33 = vmul.f32 %v3082_v28, %v8470_v61  ;;  %v3101_v49 = vmul.f32 %v3094_v29, %v8471_v6  ;;  %v8478_v50 = vld [vmem:[#allocation44_spill] sm:$0xff]  ;;  %v8479_v12 = vld [vmem:[#allocation45_spill] sm:$0xff] }
 0x3cd   : > { %v5060_v11 = vpack.c.bf16 %v2870_v51, %v2866_v38  ;;  %v3077_v43 = vpop.permute.xlu0 %3076  ;;  %v2819_v0 = vpop.permute.xlu1 %2818 }
 0x3ce   : > { %v3083_v56 = vsel %vm1303_vm6, %v7534_v22, %v3077_v43  ;;  %v3095_v59 = vsel %vm1303_vm6, %v3077_v43, %v7561_v20 }
 0x3cf   : > { %v3104_v27 = vmul.f32 %v3083_v56, %v8470_v61  ;;  %v3105_v54 = vmul.f32 %v3095_v59, %v8471_v6  ;;  %3815 = vmatpush2.bf16.msra.mxu1 %v5060_v11  ;;  %v8480_v11 = vld [vmem:[#allocation42_spill] sm:$0xff] }
 0x3d1   : > { %v5074_v53 = vpack.c.bf16 %v3104_v27, %v3100_v33  ;;  %v2821_v36 = vpop.permute.xlu0 %2820  ;;  %v5075_v34 = vpack.c.bf16 %v3105_v54, %v3101_v49  ;;  %v7731_v37 = vpop.permute.xlu1 %2826  ;;  %v8482_v27 = vld [vmem:[#allocation40_spill] sm:$0xff]  ;;  %v8483_v54 = vld [vmem:[#allocation41_spill] sm:$0xff] }
 0x3d2   : > { %v2846_v22 = vsel %vm1029_vm8, %v2819_v0, %v7731_v37 }
 0x3d3   : > { %3914 = vmatprep.subr.bf16.mxu0 %v5075_v34  ;;  %v2859_v9 = vmul.f32 %v2846_v22, %v8472_v26  ;;  %v8484_v34 = vld [vmem:[#allocation38_spill] sm:$0xff] }
 0x3d4   : > { %3915 = vmatpush2.bf16.msra.mxu0 %v5074_v53  ;;  %v5048_v53 = vpack.c.bf16 %v8483_v54, %v8482_v27  ;;  %v8497_v54 = vld [vmem:[#allocation54_spill] sm:$0xff] }
 0x3d5   : > { %v7736_v20 = vpop.permute.xlu0 %2828  ;;  %v2811_v35 = vpop.permute.xlu1 %2810 }
 0x3d6   : > { %v2847_v45 = vsel %vm1029_vm8, %v2821_v36, %v7736_v20  ;;  %v2850_v18 = vsel %vm1029_vm8, %v2811_v35, %v2819_v0 }
 0x3d7   : > { %v2863_v44 = vmul.f32 %v2847_v45, %v8472_v26  ;;  %v2858_v62 = vmul.f32 %v2850_v18, %v8473_v14  ;;  %v8477_v26 = vld [vmem:[#allocation37_spill] sm:$0xff] }
 0x3d9   : > { %v7745_v32 = vpop.permute.xlu0 %2812  ;;  %v5057_v41 = vpack.c.bf16 %v2863_v44, %v2859_v9  ;;  %v2959_v3 = vpop.permute.xlu1 %2958  ;;  %v7805_v9 = vld [vmem:[#allocation6] ss:$12 sps:$4 sm:$0xff]   ;;  %v8485_v44 = vld [vmem:[#allocation39_spill] sm:$0xff] }
 0x3da   : > { %v2851_v40 = vsel %vm1029_vm8, %v7745_v32, %v2821_v36  ;;  %v2964_v61 = vsel %vm1166_vm7, %v7609_v57, %v2959_v3  ;;  %v2976_v23 = vsel %vm1166_vm7, %v2959_v3, %v7618_v10  ;;  %v8476_v57 = vld [vmem:[#allocation47_spill] sm:$0xff] }
 0x3db   : > { %v2862_v2 = vmul.f32 %v2851_v40, %v8473_v14  ;;  %3816 = vmatprep.subr.bf16.mxu1 %v5057_v41  ;;  %v2988_v52 = vmul.f32 %v2964_v61, %v8474_v47  ;;  %v5053_v17 = vpack.c.bf16 %v8476_v57, %v8475_v30  ;;  %v2989_v13 = vmul.f32 %v2976_v23, %v8477_v26 }
 0x3dc   : > { %v5052_v14 = vpack.c.bf16 %v8479_v12, %v8478_v50 }
 0x3dd   : > { %v5056_v6 = vpack.c.bf16 %v2862_v2, %v2858_v62  ;;  %v2961_v39 = vpop.permute.xlu0 %2960  ;;  %v2955_v25 = vpop.permute.xlu1 %2954  ;;  %v5174_v62 = vld [vmem:[#allocation6 + $0x1c] ss:$12 sps:$4 sm:$0xff]  }
 0x3de   : > { %v2965_v5 = vsel %vm1166_vm7, %v7616_v16, %v2961_v39  ;;  %v2977_v15 = vsel %vm1166_vm7, %v2961_v39, %v7628_v46  ;;  %v2962_v58 = vsel %vm1166_vm7, %v7651_v55, %v2955_v25  ;;  %v2974_v16 = vsel %vm1166_vm7, %v2955_v25, %v7658_v42  ;;  %v8481_v42 = vld [vmem:[#allocation43_spill] sm:$0xff]  ;;  %v8487_v25 = vld [vmem:[#allocation61_spill] sm:$0xff] }
 0x3df   : > { %v2992_v10 = vmul.f32 %v2965_v5, %v8474_v47  ;;  %v2993_v4 = vmul.f32 %v2977_v15, %v8477_v26  ;;  %3817 = vmatpush2.bf16.msra.mxu1 %v5056_v6  ;;  %v2980_v51 = vmul.f32 %v2962_v58, %v8474_v47  ;;  %v5049_v43 = vpack.c.bf16 %v8481_v42, %v8480_v11  ;;  %v8486_v5 = vld [vmem:[#allocation80_spill] sm:$0xff]  ;;  %v8493_v11 = vld [vmem:[#allocation58_spill] sm:$0xff] }
 0x3e0   : > { %3818 = vmatprep.subr.bf16.mxu1 %v5053_v17  ;;  %v2981_v56 = vmul.f32 %v2974_v16, %v8477_v26  ;;  %v5229_v17 = vld [vmem:[%s8230_s1 + $0x30] ss:$0 sm:$0xff] }
 0x3e1   : > { %v5070_v46 = vpack.c.bf16 %v2992_v10, %v2988_v52  ;;  %v2957_v7 = vpop.permute.xlu0 %2956  ;;  %v5071_v38 = vpack.c.bf16 %v2993_v4, %v2989_v13  ;;  %v8488_v13 = vld [vmem:[#allocation81_spill] sm:$0xff]  ;;  %v8489_v4 = vld [vmem:[#allocation62_spill] sm:$0xff] }
 0x3e2   : > { %v2963_v28 = vsel %vm1166_vm7, %v7656_v60, %v2957_v7  ;;  %v2975_v55 = vsel %vm1166_vm7, %v2957_v7, %v7668_v1  ;;  %v2839_v29 = vpop.permute.xlu1 %2838  ;;  %v5230_v7 = vld [vmem:[%s8230_s1 + $0x38] ss:$0 sm:$0xff] }
 0x3e3   : > { %v2984_v59 = vmul.f32 %v2963_v28, %v8474_v47  ;;  %v2985_v0 = vmul.f32 %v2975_v55, %v8477_v26  ;;  %v2844_v33 = vsel %vm1029_vm8, %v7691_v21, %v2839_v29  ;;  %3819 = vmatpush2.bf16.msra.mxu1 %v5052_v14  ;;  %v2856_v60 = vsel %vm1029_vm8, %v2839_v29, %v7698_v31  ;;  %v8491_v28 = vld [vmem:[#allocation53_spill] sm:$0xff]  ;;  %v8492_v29 = vld [vmem:[#allocation56_spill] sm:$0xff] }
 0x3e4   : > { %3916 = vmatprep.subr.bf16.mxu0 %v5071_v38  ;;  %3820 = vmatprep.subr.bf16.mxu1 %v5049_v43  ;;  %v2868_v22 = vmul.f32 %v2844_v33, %v8484_v34  ;;  %v2869_v18 = vmul.f32 %v2856_v60, %v8485_v44  ;;  %v8490_v38 = vld [vmem:[#allocation71_spill] sm:$0xff]  ;;  %v5055_v42 = vpack.c.bf16 %v8493_v11, %v8492_v29  ;;  %v8495_v33 = vld [vmem:[#allocation52_spill] sm:$0xff] }
 0x3e5   : > { %v5066_v1 = vpack.c.bf16 %v2984_v59, %v2980_v51  ;;  %3917 = vmatpush2.bf16.msra.mxu0 %v5070_v46  ;;  %v2841_v49 = vpop.permute.xlu0 %2840  ;;  %v5067_v36 = vpack.c.bf16 %v2985_v0, %v2981_v56  ;;  %v5176_v46 = vld [vmem:[#allocation6 + $0x18] ss:$12 sps:$4 sm:$0xff]  }
 0x3e6   : > { %v2845_v21 = vsel %vm1029_vm8, %v7696_v48, %v2841_v49  ;;  %v2857_v45 = vsel %vm1029_vm8, %v2841_v49, %v7708_v8  ;;  %v2835_v31 = vpop.permute.xlu1 %2834  ;;  %v8494_v0 = vld [vmem:[#allocation51_spill] sm:$0xff]  ;;  %v8496_v49 = vld [vmem:[#allocation72_spill] sm:$0xff] }
 0x3e7   : > { %v2872_v41 = vmul.f32 %v2845_v21, %v8484_v34  ;;  %v2873_v40 = vmul.f32 %v2857_v45, %v8485_v44  ;;  %v2842_v3 = vsel %vm1029_vm8, %v7731_v37, %v2835_v31  ;;  %3821 = vmatpush2.bf16.msra.mxu1 %v5048_v53  ;;  %v2854_v48 = vsel %vm1029_vm8, %v2835_v31, %v2811_v35  ;;  %v8499_v45 = vld [vmem:[#allocation50_spill] sm:$0xff] }
 0x3e8   : > { %3918 = vmatprep.subr.bf16.mxu0 %v5067_v36  ;;  %v2860_v23 = vmul.f32 %v2842_v3, %v8484_v34  ;;  %v2861_v35 = vmul.f32 %v2854_v48, %v8485_v44  ;;  %v5054_v60 = vpack.c.bf16 %v8495_v33, %v8494_v0  ;;  %v8498_v21 = vmov 0   ;;  %v8502_v3 = vld [vmem:[#allocation82_spill] sm:$0xff] }
 0x3e9   : > { %v5062_v8 = vpack.c.bf16 %v2872_v41, %v2868_v22  ;;  %3919 = vmatpush2.bf16.msra.mxu0 %v5066_v1  ;;  %v2837_v2 = vpop.permute.xlu0 %2836  ;;  %v5063_v61 = vpack.c.bf16 %v2873_v40, %v2869_v18  ;;  %v5051_v31 = vpack.c.bf16 %v6876_v63, %v8499_v45  ;;  %v8500_v41 = vld [vmem:[#allocation48_spill] sm:$0xff] }
 0x3ea   : > { %v2843_v6 = vsel %vm1029_vm8, %v7736_v20, %v2837_v2  ;;  %v2855_v37 = vsel %vm1029_vm8, %v2837_v2, %v7745_v32  ;;  %v3199_v39 = vpop.permute.xlu1 %3198  ;;  %3823 = vmatmul.mubr.bf16.vlgmr.msra.gmra.mxu1 %v7805_v9  ;;  %v5050_v40 = vpack.c.bf16 %v8501_v19, %v8500_v41 }
 0x3eb   : > { %v2864_v47 = vmul.f32 %v2843_v6, %v8484_v34  ;;  %v2865_v52 = vmul.f32 %v2855_v37, %v8485_v44  ;;  %v3204_v15 = vsel %vm1440_vm1, %v8486_v5, %v3199_v39  ;;  %3920 = vmatprep.subr.bf16.mxu0 %v5063_v61  ;;  %v3216_v20 = vsel %vm1440_vm1, %v3199_v39, %v8487_v25  ;;  %v4788_v25 = vld [vmem:[%s8231_s2 + $0x1] ss:$2 sm:$0xf] }
 0x3ec   : > { %3832 = vmatprep.mubr.bf16.mxu1 %v5174_v62  ;;  %v3228_v26 = vmul.f32 %v5229_v17, %v3204_v15  ;;  %v3229_v50 = vmul.f32 %v5230_v7, %v3216_v20 }
 0x3ed   : > { %v5058_v32 = vpack.c.bf16 %v2864_v47, %v2860_v23  ;;  %3921 = vmatpush2.bf16.msra.mxu0 %v5062_v8  ;;  %v3201_v30 = vpop.permute.xlu0 %3200  ;;  %v5059_v57 = vpack.c.bf16 %v2865_v52, %v2861_v35 }
 0x3ee   : > { %v3205_v10 = vsel %vm1440_vm1, %v8488_v13, %v3201_v30  ;;  %v3217_v58 = vsel %vm1440_vm1, %v3201_v30, %v8489_v4  ;;  %v3195_v16 = vpop.permute.xlu1 %3194  ;;  %v8503_v13 = vld [vmem:[#allocation18_spill] sm:$0xff] }
 0x3ef   : > { %v3232_v12 = vmul.f32 %v5229_v17, %v3205_v10  ;;  %v3233_v14 = vmul.f32 %v5230_v7, %v3217_v58  ;;  %v3202_v51 = vsel %vm1440_vm1, %v8490_v38, %v3195_v16  ;;  %3922 = vmatprep.subr.bf16.mxu0 %v5059_v57  ;;  %v3214_v55 = vsel %vm1440_vm1, %v3195_v16, %v8491_v28 }
 0x3f0   : > { %v3220_v1 = vmul.f32 %v5229_v17, %v3202_v51  ;;  %v3221_v36 = vmul.f32 %v5230_v7, %v3214_v55  ;;  %v7887_v4 = vrot.slane %v4788_v25, %v8503_v13 }
 0x3f1   : > { %v5086_v43 = vpack.c.bf16 %v3232_v12, %v3228_v26  ;;  %3923 = vmatpush2.bf16.msra.mxu0 %v5058_v32  ;;  %v3197_v56 = vpop.permute.xlu0 %3196  ;;  %v5087_v59 = vpack.c.bf16 %v3233_v14, %v3229_v50  ;;  %v8504_v50 = vld [vmem:[#allocation21_spill] sm:$0xff] }
 0x3f2   : > { %v3203_v27 = vsel %vm1440_vm1, %v8496_v49, %v3197_v56  ;;  %v3215_v53 = vsel %vm1440_vm1, %v3197_v56, %v8497_v54  ;;  %3924 = vmatprep.subr.bf16.mxu0 %v5055_v42  ;;  %3833 = vmatmul.mubr.bf16.gmra.mxu1 %v5176_v46  ;;  %v7895_v14 = vrot.slane %v4788_v25, %v8504_v50  ;;  %v8505_v42 = vld [vmem:[#allocation16_spill] sm:$0xff] }
 0x3f3   : > { %v3224_v34 = vmul.f32 %v5229_v17, %v3203_v27  ;;  %v3225_v22 = vmul.f32 %v5230_v7, %v3215_v53  ;;  %3961 = vmatprep.subr.bf16.mxu1 %v5087_v59  ;;  %3981 = vmatprep.mubr.bf16.mxu1 %v8498_v21  ;;  %v7907_v33 = vrot.slane %v4788_v25, %v8505_v42 }
 0x3f4   : > { %3962 = vmatpush1.bf16.msra.mxu1 %v5086_v43 }
 0x3f5   : > { %v5082_v44 = vpack.c.bf16 %v3224_v34, %v3220_v1  ;;  %3925 = vmatpush2.bf16.msra.mxu0 %v5054_v60  ;;  %v5083_v18 = vpack.c.bf16 %v3225_v22, %v3221_v36  ;;  %v8506_v60 = vld [vmem:[#allocation14_spill] sm:$0xff] }
 0x3f6   : > { %3926 = vmatprep.subr.bf16.mxu0 %v5051_v31  ;;  %v7921_v34 = vrot.slane %v4788_v25, %v8506_v60 }
 0x3f7   : > { %3963 = vmatprep.subr.bf16.mxu1 %v5083_v18 }
 0x3f8   : > { %3964 = vmatpush1.bf16.msra.mxu1 %v5082_v44 }
 0x3f9   : > { %3927 = vmatpush2.bf16.msra.mxu0 %v5050_v40 }
 0x3fb   : > { %4782 = vmatmul.mubr.msk.bf16.vlgmr.msra.gmra.mxu1 %vm2039_vm3, %v8502_v3  ;;  %v3377_v35 = vpop.permute.xlu1 %3376 }
 0x3fc   : > { %3929 = vmatmul.mubr.bf16.vlgmr.msra.gmra.mxu0 %v7805_v9  ;;  %3991 = vmatprep.mubr.bf16.mxu1 %v8498_v21 }
 0x3fd   : > { %3938 = vmatprep.mubr.bf16.mxu0 %v5174_v62 }
 0x3fe   : > { %v7871_v15 = vpop.permute.xlu0 %3381 }
 0x3ff   : > { %v7881_v17 = vpop.permute.xlu1 %3386 }
 0x402   : > { %v7912_v49 = vpop.permute.xlu0 %3391 }
 0x403   : > { %4783 = vmatmul.mubr.msk.bf16.gmra.mxu1 %vm2039_vm3, %v7309_v24  ;;  %v4002_v24 = vld [vmem:[%s8231_s2] ss:$2 sm:$0xf] }
 0x404   : > { %3939 = vmatmul.mubr.bf16.gmra.mxu0 %v5176_v46  ;;  %v7884_v10 = vrot.slane %v4002_v24, %v8503_v13  ;;  %v7892_v12 = vrot.slane %v4002_v24, %v8504_v50  ;;  %v7904_v43 = vrot.slane %v4002_v24, %v8505_v42  ;;  %v7910_v1 = vrot.slane %v4002_v24, %v8506_v60 }
 0x437   : > { %v3877_v63 = vpop.f32.mrf.mxu0 }
 0x439   : > { %v3879_v48 = vpop.f32.mrf.mxu0 }
 0x43b   : > { %v3881_v8 = vpop.f32.mrf.mxu0 }
 0x43d   : > { %v3883_v61 = vpop.f32.mrf.mxu0 }
 0x43f   : > { %v3887_v37 = vpop.f32.mrf.mxu0 }
 0x441   : > { %v3889_v52 = vpop.f32.mrf.mxu0 }
 0x443   : > { %v3891_v57 = vpop.f32.mrf.mxu0 }
 0x445   : > { %v3893_v28 = vpop.f32.mrf.mxu0 }
 0x4aa   : > { %v3824_v2 = vpop.f32.mrf.mxu1 }
 0x4ab   : > { %v3825_v62 = vadd.f32 %v3824_v2, %v3377_v35 }
 0x4ac   : > { %v3826_v23 = vpop.f32.mrf.mxu1 }
 0x4ad   : > { %v3827_v9 = vadd.f32 %v3826_v23, %v3377_v35  ;;  %v3878_v7 = vadd.f32 %v3877_v63, %v3825_v62 }
 0x4ae   : > { %v3828_v6 = vpop.f32.mrf.mxu1 }
 0x4af   : > { %v3829_v20 = vadd.f32 %v3828_v6, %v7871_v15  ;;  %v3880_v26 = vadd.f32 %v3879_v48, %v3827_v9  ;;  %v7915_v27 = vmul.f32 %v7892_v12, %v3878_v7  ;;  %v7918_v54 = vmul.f32 %v7895_v14, %v3878_v7 }
 0x4b0   : > { %v3830_v39 = vpop.f32.mrf.mxu1 }
 0x4b1   : > { %v3831_v32 = vadd.f32 %v3830_v39, %v7871_v15  ;;  %v3882_v38 = vadd.f32 %v3881_v8, %v3829_v20  ;;  %v7898_v55 = vmul.f32 %v7884_v10, %v3880_v26  ;;  %v7901_v29 = vmul.f32 %v7887_v4, %v3880_v26 }
 0x4b2   : > { %v3834_v47 = vpop.f32.mrf.mxu1 }
 0x4b3   : > { %v3835_v58 = vadd.f32 %v3834_v47, %v7881_v17  ;;  %v3884_v51 = vadd.f32 %v3883_v61, %v3831_v32  ;;  %v7924_v22 = vmul.f32 %v7892_v12, %v3882_v38  ;;  %v7927_v21 = vmul.f32 %v7895_v14, %v3882_v38 }
 0x4b4   : > { %v3836_v5 = vpop.f32.mrf.mxu1  ;;  %v4040_v19 = vadd.f32 %v7898_v55, %v7915_v27  ;;  %v4186_v40 = vadd.f32 %v7901_v29, %v7918_v54 }
 0x4b5   : > { %v3837_v16 = vadd.f32 %v3836_v5, %v7881_v17  ;;  %v3888_v56 = vadd.f32 %v3887_v37, %v3835_v58  ;;  %v7930_v45 = vmul.f32 %v7884_v10, %v3884_v51  ;;  %v7938_v63 = vmul.f32 %v7887_v4, %v3884_v51 }
 0x4b6   : > { %v3838_v30 = vpop.f32.mrf.mxu1 }
 0x4b7   : > { %v3890_v59 = vadd.f32 %v3889_v52, %v3837_v16  ;;  %v7941_v48 = vmul.f32 %v7892_v12, %v3888_v56  ;;  %v3839_v2 = vadd.f32 %v3838_v30, %v7912_v49  ;;  %v7955_v47 = vmul.f32 %v7895_v14, %v3888_v56 }
 0x4b8   : > { %v3840_v46 = vpop.f32.mrf.mxu1  ;;  %v4045_v62 = vadd.f32 %v7930_v45, %v7924_v22  ;;  %v4191_v16 = vadd.f32 %v7938_v63, %v7927_v21 }
 0x4b9   : > { %v3841_v31 = vadd.f32 %v3840_v46, %v7912_v49  ;;  %v7944_v8 = vmul.f32 %v7884_v10, %v3890_v59  ;;  %v7958_v52 = vmul.f32 %v7887_v4, %v3890_v59  ;;  %v3892_v26 = vadd.f32 %v3891_v57, %v3839_v2 }
 0x4bb   : > { %v3983_v11 = vpop.f32.mrf.mxu1  ;;  %v3894_v9 = vadd.f32 %v3893_v28, %v3841_v31  ;;  %v4050_v7 = vadd.f32 %v7944_v8, %v7941_v48  ;;  %v4196_v57 = vadd.f32 %v7958_v52, %v7955_v47 }
 0x4bc   : > { %v3930_v0 = vpop.f32.mrf.mxu0 }
 0x4bd   : > { %v3931_v53 = vadd.f32 %v3930_v0, %v3377_v35  ;;  %v3985_v36 = vpop.f32.mrf.mxu1  ;;  %v7987_v59 = vmul.f32 %v7884_v10, %v3894_v9  ;;  %v8009_v2 = vmul.f32 %v7887_v4, %v3894_v9 }
 0x4be   : > { %v3932_v44 = vpop.f32.mrf.mxu0 }
 0x4bf   : > { %v3933_v18 = vadd.f32 %v3932_v44, %v3377_v35  ;;  %v3984_v41 = vadd.f32 %v3983_v11, %v3931_v53  ;;  %v3987_v3 = vpop.f32.mrf.mxu1 }
 0x4c0   : > { %v3934_v61 = vpop.f32.mrf.mxu0 }
 0x4c1   : > { %v7948_v23 = vmul.f32 %v7904_v43, %v3984_v41  ;;  %v7951_v6 = vmul.f32 %v7907_v33, %v3984_v41  ;;  %v3935_v37 = vadd.f32 %v3934_v61, %v7871_v15  ;;  %v3986_v39 = vadd.f32 %v3985_v36, %v3933_v18  ;;  %v3989_v35 = vpop.f32.mrf.mxu1 }
 0x4c2   : > { %v3936_v5 = vpop.f32.mrf.mxu0 }
 0x4c3   : > { %v4041_v24 = vadd.f32 %v4040_v19, %v7948_v23  ;;  %v4187_v25 = vadd.f32 %v4186_v40, %v7951_v6  ;;  %v7965_v20 = vmul.f32 %v7910_v1, %v3986_v39  ;;  %v7968_v32 = vmul.f32 %v7921_v34, %v3986_v39  ;;  %v3993_v30 = vpop.f32.mrf.mxu1 }
 0x4c4   : > { %v3937_v13 = vadd.f32 %v3936_v5, %v7871_v15  ;;  %v3988_v58 = vadd.f32 %v3987_v3, %v3935_v37  ;;  %v3940_v46 = vpop.f32.mrf.mxu0  ;;  %v8006_v3 = vmul.f32 %v7892_v12, %v3892_v26  ;;  %v8022_v12 = vmul.f32 %v7895_v14, %v3892_v26 }
 0x4c5   : > { %v3941_v50 = vadd.f32 %v3940_v46, %v7881_v17  ;;  %v4188_v38 = vadd.f32 %v4187_v25, %v7968_v32  ;;  %v4042_v51 = vadd.f32 %v4041_v24, %v7965_v20  ;;  %v3995_v28 = vpop.f32.mrf.mxu1 }
 0x4c6   : > { %v7981_v15 = vmul.f32 %v7904_v43, %v3988_v58  ;;  %v7984_v11 = vmul.f32 %v7907_v33, %v3988_v58  ;;  %v3990_v42 = vadd.f32 %v3989_v35, %v3937_v13  ;;  %v3942_v56 = vpop.f32.mrf.mxu0  ;;  %v4055_v25 = vadd.f32 %v7987_v59, %v8006_v3 }
 0x4c7   : > { %v3943_v0 = vadd.f32 %v3942_v56, %v7881_v17  ;;  %v3994_v60 = vadd.f32 %v3993_v30, %v3941_v50  ;;  %4189 = vadd.xlane.f32.xlu0 %v4188_v38  ;;  %4043 = vadd.xlane.f32.xlu1 %v4042_v51  ;;  %v3997_v40 = vpop.f32.mrf.mxu1 }
 0x4c8   : > { %v4046_v53 = vadd.f32 %v4045_v62, %v7981_v15  ;;  %v4192_v36 = vadd.f32 %v4191_v16, %v7984_v11  ;;  %v7993_v31 = vmul.f32 %v7910_v1, %v3990_v42  ;;  %v7996_v44 = vmul.f32 %v7921_v34, %v3990_v42  ;;  %v3944_v18 = vpop.f32.mrf.mxu0 }
 0x4c9   : > { %v7999_v41 = vmul.f32 %v7904_v43, %v3994_v60  ;;  %v8002_v10 = vmul.f32 %v7907_v33, %v3994_v60  ;;  %v3945_v17 = vadd.f32 %v3944_v18, %v7912_v49  ;;  %v3996_v19 = vadd.f32 %v3995_v28, %v3943_v0  ;;  %v3999_v30 = vpop.f32.mrf.mxu1  ;;  %v4064_v60 = vld [vmem:[%s8236_s7] sm:$0xff] }
 0x4ca   : > { %v3946_v61 = vpop.f32.mrf.mxu0  ;;  %v4047_v37 = vadd.f32 %v4046_v53, %v7993_v31  ;;  %v4193_v39 = vadd.f32 %v4192_v36, %v7996_v44  ;;  %v4201_v16 = vadd.f32 %v8009_v2, %v8022_v12 }
 0x4cb   : > { %v4051_v35 = vadd.f32 %v4050_v7, %v7999_v41  ;;  %v4197_v5 = vadd.f32 %v4196_v57, %v8002_v10  ;;  %v8016_v62 = vmul.f32 %v7910_v1, %v3996_v19  ;;  %v8019_v24 = vmul.f32 %v7921_v34, %v3996_v19  ;;  %v4065_v57 = vld [vmem:[%s8236_s7 + $0x8] sm:$0xff] }
 0x4cc   : > { %v3947_v4 = vadd.f32 %v3946_v61, %v7912_v49  ;;  %v3998_v9 = vadd.f32 %v3997_v40, %v3945_v17  ;;  %4048 = vadd.xlane.f32.xlu0 %v4047_v37  ;;  %4194 = vadd.xlane.f32.xlu1 %v4193_v39  ;;  %v4066_v17 = vld [vmem:[%s8236_s7 + $0x10] sm:$0xff] }
 0x4cd   : > { %v4052_v13 = vadd.f32 %v4051_v35, %v8016_v62  ;;  %v4198_v58 = vadd.f32 %v4197_v5, %v8019_v24 }
 0x4ce   : > { %v8032_v46 = vmul.f32 %v7904_v43, %v3998_v9  ;;  %v8035_v14 = vmul.f32 %v7907_v33, %v3998_v9  ;;  %v4000_v49 = vadd.f32 %v3999_v30, %v3947_v4  ;;  %v4067_v30 = vld [vmem:[%s8236_s7 + $0x18] sm:$0xff] }
 0x4d0   : > { %v4056_v26 = vadd.f32 %v4055_v25, %v8032_v46  ;;  %v4202_v7 = vadd.f32 %v4201_v16, %v8035_v14  ;;  %v8040_v50 = vmul.f32 %v7910_v1, %v4000_v49  ;;  %v8043_v38 = vmul.f32 %v7921_v34, %v4000_v49  ;;  %4053 = vadd.xlane.f32.xlu0 %v4052_v13 }
 0x4d1   : > { %4199 = vadd.xlane.f32.xlu1 %v4198_v58 }
 0x4d2   : > { %v4057_v51 = vadd.f32 %v4056_v26, %v8040_v50  ;;  %v4203_v43 = vadd.f32 %v4202_v7, %v8043_v38 }
 0x4d4   : > { %4058 = vadd.xlane.f32.xlu0 %v4057_v51 }
 0x4d5   : > { %4204 = vadd.xlane.f32.xlu1 %v4203_v43 }
 0x550   : > { %v4190_v33 = vpop.xlane.xlu0 %4189  ;;  %v4044_v28 = vpop.xlane.xlu1 %4043 }
 0x551   : > { %v4060_v56 = vmul.f32 0.00390625, %v4044_v28  ;;  %v4206_v53 = vmul.f32 0.00390625, %v4190_v33 }
 0x553   : > { %v4068_v40 = vmul.f32 %v4064_v60, %v4060_v56  ;;  %v4210_v39 = vmul.f32 %v4206_v53, %v4064_v60 }
 0x555   : > { %v4049_v42 = vpop.xlane.xlu0 %4048  ;;  %v4195_v1 = vpop.xlane.xlu1 %4194  ;;  %v4073_v58 = vsel %vm4072_vm9, %v4068_v40, 0.0  ;;  %v4214_v7 = vsel %vm4072_vm9, %v4210_v39, 0.0 }
 0x556   : > { %v4061_v0 = vmul.f32 0.00390625, %v4049_v42  ;;  %v4207_v34 = vmul.f32 0.00390625, %v4195_v1 }
 0x558   : > { %v4069_v36 = vmul.f32 %v4065_v57, %v4061_v0  ;;  %v4211_v18 = vmul.f32 %v4207_v34, %v4065_v57 }
 0x559   : > { %v4054_v19 = vpop.xlane.xlu0 %4053 }
 0x55a   : > { %v4062_v61 = vmul.f32 0.00390625, %v4054_v19  ;;  %v4200_v37 = vpop.xlane.xlu1 %4199  ;;  %v4074_v5 = vsel %vm4072_vm9, %v4069_v36, 0.0  ;;  %v4215_v9 = vsel %vm4072_vm9, %v4211_v18, 0.0 }
 0x55b   : > { %v4208_v35 = vmul.f32 0.00390625, %v4200_v37  ;;  %v4075_v51 = vadd.f32 %v4074_v5, %v4073_v58  ;;  %v4216_v28 = vadd.f32 %v4215_v9, %v4214_v7  ;;  %v4090_v58 = vld [vmem:[%s8237_s8 + $0x18] sm:$0xff] }
 0x55c   : > { %v4070_v4 = vmul.f32 %v4066_v17, %v4062_v61 }
 0x55d   : > { %v4212_v25 = vmul.f32 %v4208_v35, %v4066_v17  ;;  %v4059_v13 = vpop.xlane.xlu0 %4058 }
 0x55e   : > { %v4076_v16 = vsel %vm4072_vm9, %v4070_v4, 0.0  ;;  %v4063_v49 = vmul.f32 0.00390625, %v4059_v13  ;;  %v4205_v26 = vpop.xlane.xlu1 %4204 }
 0x55f   : > { %v4217_v43 = vsel %vm4072_vm9, %v4212_v25, 0.0  ;;  %v4209_v33 = vmul.f32 0.00390625, %v4205_v26  ;;  %v4077_v42 = vadd.f32 %v4076_v16, %v4075_v51  ;;  %v4088_v25 = vld [vmem:[%s8237_s8 + $0x8] sm:$0xff]  ;;  %v4089_v16 = vld [vmem:[%s8237_s8 + $0x10] sm:$0xff] }
 0x560   : > { %v4071_v57 = vmul.f32 %v4067_v30, %v4063_v49  ;;  %v4218_v56 = vadd.f32 %v4217_v43, %v4216_v28 }
 0x561   : > { %v4213_v1 = vmul.f32 %v4209_v33, %v4067_v30  ;;  %v4087_v30 = vld [vmem:[%s8237_s8] sm:$0xff] }
 0x562   : > { %v4078_v0 = vsel %vm4072_vm9, %v4071_v57, 0.0 }
 0x563   : > { %v4079_v34 = vadd.f32 %v4078_v0, %v4077_v42  ;;  %v4219_v60 = vsel %vm4072_vm9, %v4213_v1, 0.0 }
 0x564   : > { %v4220_v53 = vadd.f32 %v4219_v60, %v4218_v56 }
 0x565   : > { %v4080_v36 = vrot.slane %v4079_v34, 4 }
 0x566   : > { %v4221_v18 = vrot.slane %v4220_v53, 4 }
 0x567   : > { %v4081_v17 = vadd.f32 %v4080_v36, %v4079_v34 }
 0x568   : > { %v4222_v19 = vadd.f32 %v4221_v18, %v4220_v53 }
 0x569   : > { %v4082_v40 = vrot.slane %v4081_v17, 2 }
 0x56a   : > { %v4223_v61 = vrot.slane %v4222_v19, 2 }
 0x56b   : > { %v4083_v37 = vadd.f32 %v4082_v40, %v4081_v17 }
 0x56c   : > { %v4224_v39 = vadd.f32 %v4223_v61, %v4222_v19 }
 0x56d   : > { %v4084_v35 = vrot.slane %v4083_v37, 1 }
 0x56e   : > { %v4225_v5 = vrot.slane %v4224_v39, 1 }
 0x56f   : > { %v4085_v4 = vadd.f32 %v4084_v35, %v4083_v37 }
 0x570   : > { %v4226_v9 = vadd.f32 %v4225_v5, %v4224_v39 }
 0x571   : > { %v4086_v13 = vmax.f32 %v4085_v4, 0.0 }
 0x572   : > { %v4227_v7 = vmax.f32 %v4226_v9, 0.0 }
 0x573   : > { %v4092_v49 = vmul.f32 %v4088_v25, %v4086_v13  ;;  %v4091_v26 = vmul.f32 %v4087_v30, %v4086_v13  ;;  %v4094_v33 = vmul.f32 %v4090_v58, %v4086_v13  ;;  %v4093_v28 = vmul.f32 %v4089_v16, %v4086_v13 }
 0x574   : > { %v4229_v1 = vmul.f32 %v4227_v7, %v4088_v25  ;;  %v4228_v56 = vmul.f32 %v4227_v7, %v4087_v30  ;;  %v4231_v60 = vmul.f32 %v4227_v7, %v4090_v58  ;;  %v4230_v53 = vmul.f32 %v4227_v7, %v4089_v16 }
 0x575   : > { %v4098_v51 = vsel %vm4072_vm9, %v4092_v49, 0.0  ;;  %v4095_v43 = vsel %vm4072_vm9, %v4091_v26, 0.0  ;;  %v4104_v57 = vsel %vm4072_vm9, %v4094_v33, 0.0  ;;  %v4101_v42 = vsel %vm4072_vm9, %v4093_v28, 0.0 }
 0x576   : > { %4099 = vadd.xlane.f32.xlu1 %v4098_v51  ;;  %4096 = vadd.xlane.f32.xlu0 %v4095_v43  ;;  %v4235_v0 = vsel %vm4072_vm9, %v4229_v1, 0.0  ;;  %v4232_v34 = vsel %vm4072_vm9, %v4228_v56, 0.0  ;;  %v4241_v36 = vsel %vm4072_vm9, %v4231_v60, 0.0  ;;  %v4238_v18 = vsel %vm4072_vm9, %v4230_v53, 0.0 }
 0x57a   : > { %4105 = vadd.xlane.f32.xlu1 %v4104_v57  ;;  %4102 = vadd.xlane.f32.xlu0 %v4101_v42 }
 0x57e   : > { %4236 = vadd.xlane.f32.xlu1 %v4235_v0  ;;  %4233 = vadd.xlane.f32.xlu0 %v4232_v34 }
 0x582   : > { %4242 = vadd.xlane.f32.xlu1 %v4241_v36  ;;  %4239 = vadd.xlane.f32.xlu0 %v4238_v18 }
 0x5ff   : > { %v4097_v17 = vpop.xlane.xlu0 %4096  ;;  %v4100_v19 = vpop.xlane.xlu1 %4099 }
 0x600   : > { %v4784_v40 = vmul.f32 -1.442695, %v4097_v17  ;;  %v4785_v61 = vmul.f32 -1.442695, %v4100_v19 }
 0x602   : > { %5178 = vpow2.f32 %v4784_v40 }
 0x603   : > { %5180 = vpow2.f32 %v4785_v61  ;;  %v4103_v37 = vpop.xlane.xlu0 %4102  ;;  %v4106_v39 = vpop.xlane.xlu1 %4105 }
 0x604   : > { %v4786_v35 = vmul.f32 -1.442695, %v4103_v37  ;;  %v4787_v5 = vmul.f32 -1.442695, %v4106_v39 }
 0x606   : > { %5182 = vpow2.f32 %v4786_v35 }
 0x607   : > { %5184 = vpow2.f32 %v4787_v5  ;;  %v4234_v4 = vpop.xlane.xlu0 %4233  ;;  %v4237_v9 = vpop.xlane.xlu1 %4236 }
 0x608   : > { %v4789_v25 = vmul.f32 -1.442695, %v4234_v4  ;;  %v4790_v30 = vmul.f32 -1.442695, %v4237_v9 }
 0x60a   : > { %5186 = vpow2.f32 %v4789_v25 }
 0x60b   : > { %5188 = vpow2.f32 %v4790_v30  ;;  %v4240_v13 = vpop.xlane.xlu0 %4239  ;;  %v4243_v58 = vpop.xlane.xlu1 %4242 }
 0x60c   : > { %v4791_v16 = vmul.f32 -1.442695, %v4240_v13  ;;  %v4792_v49 = vmul.f32 -1.442695, %v4243_v58 }
 0x60e   : > { %5190 = vpow2.f32 %v4791_v16  ;;  %v4302_v16 = vld [vmem:[%s5545_s20 + $0x10] sm:$0xff] }
 0x60f   : > { %v5179_v26 = vpop.eup %5178  ;;  %5192 = vpow2.f32 %v4792_v49  ;;  %v4304_v49 = vld [vmem:[%s5545_s20 + $0x20] sm:$0xff] }
 0x610   : > { %v5181_v7 = vpop.eup %5180  ;;  %v4119_v51 = vadd.f32 1.0, %v5179_v26 }
 0x611   : > { %v4120_v43 = vadd.f32 1.0, %v5181_v7 }
 0x612   : > { %5194 = vrcp.f32 %v4119_v51 }
 0x613   : > { %v5183_v33 = vpop.eup %5182  ;;  %5196 = vrcp.f32 %v4120_v43 }
 0x614   : > { %v5185_v28 = vpop.eup %5184  ;;  %v4121_v57 = vadd.f32 1.0, %v5183_v33 }
 0x615   : > { %v4122_v42 = vadd.f32 1.0, %v5185_v28  ;;  %v4305_v28 = vld [vmem:[%s5545_s20 + $0x28] sm:$0xff] }
 0x616   : > { %5198 = vrcp.f32 %v4121_v57  ;;  %v4306_v57 = vld [vmem:[%s5545_s20 + $0x30] sm:$0xff] }
 0x617   : > { %v5187_v1 = vpop.eup %5186  ;;  %5200 = vrcp.f32 %v4122_v42 }
 0x618   : > { %v5189_v56 = vpop.eup %5188  ;;  %v4256_v0 = vadd.f32 1.0, %v5187_v1 }
 0x619   : > { %v4257_v34 = vadd.f32 1.0, %v5189_v56 }
 0x61a   : > { %5202 = vrcp.f32 %v4256_v0 }
 0x61b   : > { %v5191_v60 = vpop.eup %5190  ;;  %5204 = vrcp.f32 %v4257_v34 }
 0x61c   : > { %v5193_v53 = vpop.eup %5192  ;;  %v4258_v36 = vadd.f32 1.0, %v5191_v60 }
 0x61d   : > { %v4259_v18 = vadd.f32 1.0, %v5193_v53 }
 0x61e   : > { %5206 = vrcp.f32 %v4258_v36 }
 0x61f   : > { %v5195_v17 = vpop.eup %5194  ;;  %5208 = vrcp.f32 %v4259_v18 }
 0x620   : > { %v5197_v19 = vpop.eup %5196  ;;  %v4131_v37 = vmul.f32 %v5195_v17, %v7915_v27  ;;  %v4132_v39 = vmul.f32 %v5195_v17, %v7898_v55  ;;  %v4133_v35 = vmul.f32 %v5195_v17, %v7948_v23  ;;  %v4134_v5 = vmul.f32 %v5195_v17, %v7965_v20 }
 0x621   : > { %v4135_v4 = vmul.f32 %v5197_v19, %v7924_v22  ;;  %v4136_v9 = vmul.f32 %v5197_v19, %v7930_v45  ;;  %v4137_v25 = vmul.f32 %v5197_v19, %v7981_v15  ;;  %v4138_v30 = vmul.f32 %v5197_v19, %v7993_v31  ;;  %v4300_v31 = vld [vmem:[%s5545_s20] sm:$0xff] }
 0x623   : > { %v5199_v40 = vpop.eup %5198 }
 0x624   : > { %v5201_v61 = vpop.eup %5200  ;;  %v8096_v13 = vmul.f32 %v5199_v40, %v7941_v48  ;;  %v8099_v55 = vmul.f32 %v5199_v40, %v7944_v8  ;;  %v8102_v27 = vmul.f32 %v5199_v40, %v7999_v41  ;;  %v8105_v22 = vmul.f32 %v5199_v40, %v8016_v62  ;;  %v4301_v41 = vld [vmem:[%s5545_s20 + $0x8] sm:$0xff] }
 0x625   : > { %v8108_v23 = vmul.f32 %v5201_v61, %v8006_v3  ;;  %v8111_v20 = vmul.f32 %v5201_v61, %v7987_v59  ;;  %v8114_v48 = vmul.f32 %v5201_v61, %v8032_v46  ;;  %v8117_v8 = vmul.f32 %v5201_v61, %v8040_v50  ;;  %v4303_v46 = vld [vmem:[%s5545_s20 + $0x18] sm:$0xff] }
 0x627   : > { %v5203_v45 = vpop.eup %5202 }
 0x628   : > { %v5205_v15 = vpop.eup %5204  ;;  %v4268_v62 = vmul.f32 %v5203_v45, %v7918_v54  ;;  %v4269_v58 = vmul.f32 %v5203_v45, %v7901_v29  ;;  %v4270_v3 = vmul.f32 %v5203_v45, %v7951_v6  ;;  %v4271_v59 = vmul.f32 %v5203_v45, %v7968_v32  ;;  %v4307_v6 = vld [vmem:[%s5545_s20 + $0x38] sm:$0xff] }
 0x629   : > { %v4272_v50 = vmul.f32 %v5205_v15, %v7927_v21  ;;  %v4273_v26 = vmul.f32 %v5205_v15, %v7938_v63  ;;  %v4274_v7 = vmul.f32 %v5205_v15, %v7984_v11  ;;  %v4275_v51 = vmul.f32 %v5205_v15, %v7996_v44 }
 0x62a   : > { %v4284_v54 = vadd.f32 %v4268_v62, %v4131_v37  ;;  %v4285_v43 = vadd.f32 %v4269_v58, %v4132_v39  ;;  %v4286_v33 = vadd.f32 %v4270_v3, %v4133_v35  ;;  %v4287_v29 = vadd.f32 %v4271_v59, %v4134_v5  ;;  %v4312_v62 = vld [vmem:[%s5545_s20 + $0x60] sm:$0xff] }
 0x62b   : > { %v4288_v42 = vadd.f32 %v4272_v50, %v4135_v4  ;;  %v4289_v32 = vadd.f32 %v4273_v26, %v4136_v9  ;;  %v4290_v1 = vadd.f32 %v4274_v7, %v4137_v25  ;;  %v4291_v56 = vadd.f32 %v4275_v51, %v4138_v30  ;;  %v5207_v60 = vpop.eup %5206  ;;  %v4308_v4 = vld [vmem:[%s5545_s20 + $0x40] sm:$0xff]  ;;  %v4309_v9 = vld [vmem:[%s5545_s20 + $0x48] sm:$0xff]  ;;  %v4315_v50 = vld [vmem:[%s5545_s20 + $0x78] sm:$0xff] }
 0x62c   : > { %v4316_v0 = vadd.f32 %v4300_v31, %v4284_v54  ;;  %v4317_v34 = vadd.f32 %v4301_v41, %v4285_v43  ;;  %v4318_v21 = vadd.f32 %v4302_v16, %v4286_v33  ;;  %v4319_v63 = vadd.f32 %v4303_v46, %v4287_v29  ;;  %v5209_v18 = vpop.eup %5208  ;;  %v4310_v31 = vld [vmem:[%s5545_s20 + $0x50] sm:$0xff]  ;;  %v4311_v41 = vld [vmem:[%s5545_s20 + $0x58] sm:$0xff]  ;;  %v4313_v46 = vld [vmem:[%s5545_s20 + $0x68] sm:$0xff] }
 0x62d   : > { %v4320_v11 = vadd.f32 %v4304_v49, %v4288_v42  ;;  %v4321_v53 = vadd.f32 %v4305_v28, %v4289_v32  ;;  %v4322_v44 = vadd.f32 %v4306_v57, %v4290_v1  ;;  %v4323_v36 = vadd.f32 %v4307_v6, %v4291_v56  ;;  %v4314_v49 = vld [vmem:[%s5545_s20 + $0x70] sm:$0xff] }
 0x62e   : > { %v4332_v17 = vmax.f32 %v4316_v0, 0.0  ;;  %v4333_v19 = vmax.f32 %v4317_v34, 0.0  ;;  %v4334_v40 = vmax.f32 %v4318_v21, 0.0  ;;  %v4335_v61 = vmax.f32 %v4319_v63, 0.0 }
 0x62f   : > { %v4336_v37 = vmax.f32 %v4320_v11, 0.0  ;;  %v4337_v39 = vmax.f32 %v4321_v53, 0.0  ;;  %v4338_v35 = vmax.f32 %v4322_v44, 0.0  ;;  %v4339_v5 = vmax.f32 %v4323_v36, 0.0 }
 0x630   : > { %4348 = vst [vmem:[%s8137_s15] sm:$0xff] %v4332_v17  ;;  %4349 = vst [vmem:[%s8137_s15 + $0x8] sm:$0xff] %v4333_v19  ;;  %v4276_v25 = vmul.f32 %v5207_v60, %v7955_v47  ;;  %v4277_v30 = vmul.f32 %v5207_v60, %v7958_v52  ;;  %v4278_v45 = vmul.f32 %v5207_v60, %v8002_v10 }
 0x631   : > { %4350 = vst [vmem:[%s8137_s15 + $0x10] sm:$0xff] %v4334_v40  ;;  %4351 = vst [vmem:[%s8137_s15 + $0x18] sm:$0xff] %v4335_v61  ;;  %v4279_v15 = vmul.f32 %v5207_v60, %v8019_v24  ;;  %v4280_v58 = vmul.f32 %v5209_v18, %v8022_v12  ;;  %v4281_v47 = vmul.f32 %v5209_v18, %v8009_v2 }
 0x632   : > { %4352 = vst [vmem:[%s8137_s15 + $0x20] sm:$0xff] %v4336_v37  ;;  %4353 = vst [vmem:[%s8137_s15 + $0x28] sm:$0xff] %v4337_v39  ;;  %v4282_v52 = vmul.f32 %v5209_v18, %v8035_v14  ;;  %v4283_v10 = vmul.f32 %v5209_v18, %v8043_v38  ;;  %v4292_v24 = vadd.f32 %v4276_v25, %v8096_v13 }
 0x633   : > { %4354 = vst [vmem:[%s8137_s15 + $0x30] sm:$0xff] %v4338_v35  ;;  %4355 = vst [vmem:[%s8137_s15 + $0x38] sm:$0xff] %v4339_v5  ;;  %v4293_v3 = vadd.f32 %v4277_v30, %v8099_v55  ;;  %v4294_v59 = vadd.f32 %v4278_v45, %v8102_v27  ;;  %v4295_v16 = vadd.f32 %v4279_v15, %v8105_v22 }
 0x634   : > { %v4296_v12 = vadd.f32 %v4280_v58, %v8108_v23  ;;  %v4297_v26 = vadd.f32 %v4281_v47, %v8111_v20  ;;  %v4298_v2 = vadd.f32 %v4282_v52, %v8114_v48  ;;  %v4299_v14 = vadd.f32 %v4283_v10, %v8117_v8 }
 0x635   : > { %v4324_v38 = vadd.f32 %v4308_v4, %v4292_v24  ;;  %v4325_v13 = vadd.f32 %v4309_v9, %v4293_v3  ;;  %v4326_v55 = vadd.f32 %v4310_v31, %v4294_v59  ;;  %v4327_v27 = vadd.f32 %v4311_v41, %v4295_v16 }
 0x636   : > { %v4328_v22 = vadd.f32 %v4312_v62, %v4296_v12  ;;  %v4329_v7 = vadd.f32 %v4313_v46, %v4297_v26  ;;  %v4330_v51 = vadd.f32 %v4314_v49, %v4298_v2  ;;  %v4331_v23 = vadd.f32 %v4315_v50, %v4299_v14 }
 0x637   : > { %v4340_v20 = vmax.f32 %v4324_v38, 0.0  ;;  %v4341_v48 = vmax.f32 %v4325_v13, 0.0  ;;  %v4342_v8 = vmax.f32 %v4326_v55, 0.0  ;;  %v4343_v54 = vmax.f32 %v4327_v27, 0.0 }
 0x638   : > { %v4344_v43 = vmax.f32 %v4328_v22, 0.0  ;;  %v4345_v33 = vmax.f32 %v4329_v7, 0.0  ;;  %v4346_v29 = vmax.f32 %v4330_v51, 0.0  ;;  %v4347_v28 = vmax.f32 %v4331_v23, 0.0 }
 0x639   : > { %4356 = vst [vmem:[%s8137_s15 + $0x40] sm:$0xff] %v4340_v20  ;;  %4357 = vst [vmem:[%s8137_s15 + $0x48] sm:$0xff] %v4341_v48 }
 0x63a   : > { %4358 = vst [vmem:[%s8137_s15 + $0x50] sm:$0xff] %v4342_v8  ;;  %4359 = vst [vmem:[%s8137_s15 + $0x58] sm:$0xff] %v4343_v54 }
 0x63b   : > { %4360 = vst [vmem:[%s8137_s15 + $0x60] sm:$0xff] %v4344_v43  ;;  %4361 = vst [vmem:[%s8137_s15 + $0x68] sm:$0xff] %v4345_v33 }
 0x63c   : > { %4362 = vst [vmem:[%s8137_s15 + $0x70] sm:$0xff] %v4346_v29  ;;  %4363 = vst [vmem:[%s8137_s15 + $0x78] sm:$0xff] %v4347_v28 }
 0x63d   : > { %5298 = shalt.err (!%p5295_p0)
}
 0x63e   : > { %s5299_s17 = scalar_lea.hbm %s8176_s22, 2048  ;;  %s5303_s16 = scalar_lea.hbm %s8238_s9, 4096 }
 0x63f   : > { %p5300_p5 = scmp.ne.s32.totalorder %s8176_s22, %s5299_s17  ;;  %p5304_p4 = scmp.lt.s32.totalorder %s8176_s22, %s8238_s9 }
 0x640   : > { %p5305_p6 = scmp.lt.s32.totalorder %s5303_s16, %s5299_s17 }
 0x641   : > { %p5301_p9 = pnand %p5300_p5, %p8507_p11 }
 0x642   : > { %p5306_p8 = por %p5305_p6, %p5304_p4 }
 0x643   : > { %p5302_p1 = pneg %p5301_p9 }
 0x645   : > { %p5307_p3 = pnand %p5306_p8, %p5302_p1 }
 0x647   : > { %5310 = shalt.err (!%p5307_p3)
}
 0x648   : > { %s5371_s13 = smov 512   ;;  %s5372_s20 = smov 32  }
 0x649   : > { %5094 = dma.vmem_to_hbm [thread:$0]  (%p8507_p11), %s8178_s27, 2048, %s8176_s22, %s4365_s23, %s5371_s13, %s5371_s13, %s5372_s20  }
 0x64a PF: > { %s8508_s26 = sld [smem:[#allocation12_spill]]  ;;  %s4393_s19 = sand.u32 1, %s5341_s30  }
 0x64b   : > { %p8510_p12 = scmp.ge.s32.totalorder %s5353_s12, 2  ;;  %s4394_s28 = scalar_lea.sflag [#allocation5], %s4393_s19 }
 0x650   : > { %p8509_p7 = scmp.ne.s32.totalorder %s8508_s26, 0 }
 0x652   : > { %p5105_p10 = pnand %p8510_p12, %p8509_p7 }
 0x654   : > { %p5106_p2 = pneg %p5105_p10 }
 0x656   : > { %5336 = dma.done.wait (%p5106_p2), %s4394_s28, 2048  }
 0x657   : > { %5338 = vsyncadd (%p5106_p2), %s4394_s28, 4294965248  ;;  %s8511_s12 = sld [smem:[#allocation13_spill]]  ;;  %s8512_s30 = smov %s5345_s10 }
 0x658   : > { %s8513_s10 = smov %s5349_s11  ;;  %s8514_s11 = smov %s5494_s29 }
 0x65d   : > { %p23_p13 = scmp.ge.s32.totalorder %s8511_s12, 4  }
 0x65f   :  { %25 = sbr.rel (!%p23_p13) target bundleno = 8 (0x8), region = 106 }
 0x664   :  { %4399 = vsyncpa [#allocation4], 1 }
 0x665   :  { %4401 = vsyncpa [#allocation4 + $0x1], 1 }
 0x666   :  { %4402 = vsyncpa [#allocation7], 1 }
 0x667   :  { %4403 = vsyncpa [#allocation5], 1 }
 0x668   :  { %4405 = vsyncpa [#allocation5 + $0x1], 1 }

</bundles_post_ra>
